<compile_context>
chip_gen: v7x
topology: tpu7x:2x2x1
jax: 0.10.0
libtpu: 0.0.40
codegen_flags: <defaults>
</compile_context>

<pallas_src>
import functools

import jax
import jax.numpy as jnp
from jax.experimental import pallas as pl
from jax.experimental.pallas import tpu as pltpu

LANE = 128      # channels padded to a multiple of the 128-wide lane dim
SUBLANE = 8     # padded width rounded to a multiple of 8 sublanes


def _round_up(x, m):
    return (x + m - 1) // m * m


def _pick_row_tile(h):
    """Output rows per grid step (largest divisor <= 8, incl. 7 for H=14/28)."""
    if h <= 8:
        return h
    for d in (8, 7, 6, 5, 4, 3, 2):
        if h % d == 0:
            return d
    # TODO(synk): masked partial last tile (pl.cdiv grid) for prime heights.
    return 1


def _make_conv3x3_kernel(TH, Wp, Cinp, Coutp, H, *, relu, has_residual,
                         has_shortcut):
    """3x3/stride-1/pad-1 conv with folded BN (scale, shift), optional residual
    add, optional ReLU, and optionally a second conv (the shortcut cconv)
    sharing the same resident input windows (run as a second tap pass)."""
    TW = TH * Wp  # flat output positions (incl. padding cols) per grid step

    def kernel(x_ref, w_ref, scale_ref, shift_ref, mask_ref, *rest):
        i = 0
        if has_shortcut:
            wsc_ref, ssc_ref, bsc_ref = rest[i:i + 3]
            i += 3
        if has_residual:
            res_ref = rest[i]
            i += 1
        out_ref = rest[i]
        i += 1
        if has_shortcut:
            sc_out_ref = rest[i]

        h = pl.program_id(1)
        row0 = h * TH                                     # first output row
        out_start = pl.multiple_of((row0 + 2) * Wp, SUBLANE)

        # Only the 4 pad rows are never covered by the per-step stores; zero
        # them once per image (every interior row is fully overwritten by the
        # masked lane-dense store below), so the next conv's zero ring is exact.
        @pl.when(h == 0)
        def _init():
            pad = jnp.zeros((2 * Wp, Coutp), out_ref.dtype)
            out_ref[0, pl.ds(0, 2 * Wp), :] = pad
            out_ref[0, pl.ds((H + 2) * Wp, 2 * Wp), :] = pad
            if has_shortcut:
                sc_out_ref[0, pl.ds(0, 2 * Wp), :] = pad
                sc_out_ref[0, pl.ds((H + 2) * Wp, 2 * Wp), :] = pad

        # Tiny resident (TW, 1) column mask keeps width-pad columns exactly 0.
        m = mask_ref[...]

        def _taps(wt_ref):
            # 9 MXU matmuls over contiguous windows of the resident input
            # block; native-dtype operands, single f32 accumulator chain.
            acc = jnp.zeros((TW, Coutp), jnp.float32)
            for kh in range(3):
                base = pl.multiple_of((row0 + kh + 1) * Wp, SUBLANE)
                for kw in range(3):
                    lhs = x_ref[0, pl.ds(base + (kw - 1), TW), :]
                    acc = acc + jnp.dot(lhs, wt_ref[kh * 3 + kw],
                                        preferred_element_type=jnp.float32)
            return acc

        def _finalize(a, s_ref, b_ref, res, do_relu, o_ref):
            y = a * s_ref[...] + b_ref[...]          # folded conv-bias + BN
            if res is not None:
                y = y + res.astype(jnp.float32)
            if do_relu:
                y = jnp.maximum(y, 0.0)
            y = y * m
            o_ref[0, pl.ds(out_start, TW), :] = y.astype(o_ref.dtype)

        res_val = (res_ref[0, pl.ds(out_start, TW), :]
                   if has_residual else None)
        _finalize(_taps(w_ref), scale_ref, shift_ref, res_val, relu, out_ref)
        if has_shortcut:
            # Second pass re-reads the resident input windows so the two f32
            # accumulators are never live at the same time.
            _finalize(_taps(wsc_ref), ssc_ref, bsc_ref, None, False,
                      sc_out_ref)

    return kernel


def _conv3x3(xp, w, scale, shift, *, H, W, relu,
             w_sc=None, scale_sc=None, shift_sc=None, residual=None):
    """Runs the fused conv kernel.  Activations use the flattened padded
    layout (N, (H+4)*Wp, Cpad)."""
    N, HF, Cinp = xp.shape
    Wp = HF // (H + 4)
    Coutp = w.shape[-1]
    TH = _pick_row_tile(H)
    TW = TH * Wp
    NH = H // TH
    has_sc = w_sc is not None
    has_res = residual is not None

    # Per-tile column-validity mask: (TW, 1) resident vector, replaces the old
    # full-image (HF, 1) buffer (no per-image DMA, ~1/((H+4)/TH) the VMEM).
    col = jnp.arange(Wp)
    col_valid = jnp.logical_and(col >= 1, col <= W).astype(jnp.float32)
    mask = jnp.tile(col_valid, TH).reshape(TW, 1)

    kernel = _make_conv3x3_kernel(TH, Wp, Cinp, Coutp, H, relu=relu,
                                  has_residual=has_res, has_shortcut=has_sc)

    x_spec = pl.BlockSpec((1, HF, Cinp), lambda n, h: (n, 0, 0))
    o_spec = pl.BlockSpec((1, HF, Coutp), lambda n, h: (n, 0, 0))
    # Weights / folded-BN vectors / column mask: constant index maps -> stay
    # resident across the whole grid.
    w_spec = pl.BlockSpec((9, Cinp, Coutp), lambda n, h: (0, 0, 0))
    v_spec = pl.BlockSpec((1, Coutp), lambda n, h: (0, 0))
    m_spec = pl.BlockSpec((TW, 1), lambda n, h: (0, 0))

    in_specs = [x_spec, w_spec, v_spec, v_spec, m_spec]
    args = [xp, w, scale, shift, mask]
    if has_sc:
        in_specs += [w_spec, v_spec, v_spec]
        args += [w_sc, scale_sc, shift_sc]
    if has_res:
        in_specs.append(o_spec)
        args.append(residual)

    out_sds = jax.ShapeDtypeStruct((N, HF, Coutp), xp.dtype)
    out_shape = (out_sds, out_sds) if has_sc else out_sds
    out_specs = (o_spec, o_spec) if has_sc else o_spec

    # Explicit VMEM budget: estimate resident/double-buffered blocks, raise
    # v5e's 16 MiB default, stay within v7x's 64 MiB physical VMEM.
    itemsize = jnp.dtype(xp.dtype).itemsize
    n_out = 2 if has_sc else 1
    est = HF * Cinp * itemsize * 2
    est += HF * Coutp * itemsize * 2 * (n_out + (1 if has_res else 0))
    est += 9 * Cinp * Coutp * itemsize * 2 * n_out
    est += (2 * n_out * Coutp * 4 + TW * LANE * 4) * 2
    est += TW * Coutp * 4                      # accumulator / spill headroom
    vmem_limit = int(min(max(est + (16 << 20), 32 << 20), 64 << 20))

    return pl.pallas_call(
        kernel,
        grid=(N, NH),
        in_specs=in_specs,
        out_specs=out_specs,
        out_shape=out_shape,
        compiler_params=pltpu.CompilerParams(
            dimension_semantics=("parallel", "arbitrary"),
            vmem_limit_bytes=vmem_limit),
    )(*args)


def _fold_bn(gamma, beta, mean, var, conv_bias, eps=1e-5):
    scale = gamma / jnp.sqrt(var + eps)
    shift = beta + (conv_bias - mean) * scale
    return scale, shift


def _prep_weight(w, cinp, coutp, dtype):
    cin, cout = w.shape[2], w.shape[3]
    w = jnp.pad(w, ((0, 0), (0, 0), (0, cinp - cin), (0, coutp - cout)))
    return w.reshape(9, cinp, coutp).astype(dtype)


def _prep_vec(v, coutp, fill=0.0):
    c = v.shape[0]
    return jnp.pad(v.astype(jnp.float32), (0, coutp - c),
                   constant_values=fill).reshape(1, coutp)


def basic_block_forward(x_nchw, params, *, compute_dtype=jnp.bfloat16):
    """BasicBlock forward.  x_nchw: (N, Cin, H, W), PyTorch layout.

    compute_dtype defaults to bfloat16 (MXU-native on v5e/v6e/v7x);
    accumulation and the BN fold stay f32.  Pass jnp.float32 for exact-f32
    numerics."""
    N, Cin, H, W = x_nchw.shape
    Cout = params["conv1_w"].shape[-1]
    dt = jnp.dtype(compute_dtype)

    cinp = _round_up(Cin, LANE)
    coutp = _round_up(Cout, LANE)
    wp = _round_up(W + 2, SUBLANE)
    hf = (H + 4) * wp

    # NCHW -> channels-last, padded (2 rows / 1+ cols / channels to a lane
    # multiple), flattened.  Done once for the whole block.
    x = jnp.transpose(x_nchw, (0, 2, 3, 1)).astype(dt)
    xp = jnp.pad(x, ((0, 0), (2, 2), (1, wp - W - 1), (0, cinp - Cin)))
    xp = xp.reshape(N, hf, cinp)

    s1, b1 = _fold_bn(params["bn1_gamma"], params["bn1_beta"],
                      params["bn1_mean"], params["bn1_var"], params["conv1_b"])
    s2, b2 = _fold_bn(params["bn2_gamma"], params["bn2_beta"],
                      params["bn2_mean"], params["bn2_var"], params["conv2_b"])

    w1 = _prep_weight(params["conv1_w"], cinp, coutp, dt)
    w2 = _prep_weight(params["conv2_w"], coutp, coutp, dt)
    s1p, b1p = _prep_vec(s1, coutp, 1.0), _prep_vec(b1, coutp)
    s2p, b2p = _prep_vec(s2, coutp, 1.0), _prep_vec(b2, coutp)

    if Cin != Cout:
        # conv1+bn1+relu and the shortcut conv fused in one kernel:
        # one input DMA, shared tap windows, two outputs.
        wsc = _prep_weight(params["cconv_w"], cinp, coutp, dt)
        ssc = _prep_vec(jnp.ones((Cout,), jnp.float32), coutp, 1.0)
        bsc = _prep_vec(params["cconv_b"], coutp)
        out1, shortcut = _conv3x3(xp, w1, s1p, b1p, H=H, W=W, relu=True,
                                  w_sc=wsc, scale_sc=ssc, shift_sc=bsc)
    else:
        out1 = _conv3x3(xp, w1, s1p, b1p, H=H, W=W, relu=True)
        shortcut = xp            # identity shortcut, already in this layout

    # conv2 + bn2 + residual add + relu, fused.
    out2 = _conv3x3(out1, w2, s2p, b2p, H=H, W=W, relu=True,
                    residual=shortcut)

    out = out2.reshape(N, H + 4, wp, coutp)[:, 2:H + 2, 1:W + 1, :Cout]
    return jnp.transpose(out, (0, 3, 1, 2)).astype(x_nchw.dtype)


# ---------------------------------------------------------------------------
# Pure-JAX reference (correctness check only)
# ---------------------------------------------------------------------------
def _conv_ref(x, w, b):
    y = jax.lax.conv_general_dilated(
        x, w, (1, 1), ((1, 1), (1, 1)),
        dimension_numbers=("NHWC", "HWIO", "NHWC"))
    return y + b


def _bn_ref(x, gamma, beta, mean, var, eps=1e-5):
    return (x - mean) / jnp.sqrt(var + eps) * gamma + beta


def basic_block_ref(x_nchw, params):
    x = jnp.transpose(x_nchw, (0, 2, 3, 1))
    inplanes = x.shape[-1]
    planes = params["conv1_w"].shape[-1]
    out = _conv_ref(x, params["conv1_w"], params["conv1_b"])
    out = _bn_ref(out, params["bn1_gamma"], params["bn1_beta"],
                  params["bn1_mean"], params["bn1_var"])
    out = jnp.maximum(out, 0.0)
    out = _conv_ref(out, params["conv2_w"], params["conv2_b"])
    out = _bn_ref(out, params["bn2_gamma"], params["bn2_beta"],
                  params["bn2_mean"], params["bn2_var"])
    if inplanes != planes:
        out = out + _conv_ref(x, params["cconv_w"], params["cconv_b"])
    else:
        out = out + x
    out = jnp.maximum(out, 0.0)
    return jnp.transpose(out, (0, 3, 1, 2))


def _make_params(key, inplanes, planes):
    ks = jax.random.split(key, 16)

    def _n(k, shape, s=0.1):
        return jax.random.normal(k, shape, jnp.float32) * s

    p = {
        "conv1_w": _n(ks[0], (3, 3, inplanes, planes)),
        "conv1_b": _n(ks[1], (planes,)),
        "bn1_gamma": 1.0 + _n(ks[2], (planes,)),
        "bn1_beta": _n(ks[3], (planes,)),
        "bn1_mean": _n(ks[4], (planes,)),
        "bn1_var": 1.0 + jnp.abs(_n(ks[5], (planes,))),
        "conv2_w": _n(ks[6], (3, 3, planes, planes)),
        "conv2_b": _n(ks[7], (planes,)),
        "bn2_gamma": 1.0 + _n(ks[8], (planes,)),
        "bn2_beta": _n(ks[9], (planes,)),
        "bn2_mean": _n(ks[10], (planes,)),
        "bn2_var": 1.0 + jnp.abs(_n(ks[11], (planes,))),
    }
    if inplanes != planes:
        p["cconv_w"] = _n(ks[12], (3, 3, inplanes, planes))
        p["cconv_b"] = _n(ks[13], (planes,))
    return p


if __name__ == "__main__":
    key = jax.random.PRNGKey(0)
    k1, k2, kx1, kx2 = jax.random.split(key, 4)

    fwd_f32 = jax.jit(functools.partial(basic_block_forward,
                                        compute_dtype=jnp.float32))
    fwd_bf16 = jax.jit(basic_block_forward)   # default: bf16 MXU operands

    # Case 1: inplanes != planes -> shortcut conv path (fused into kernel 1).
    N, inplanes, planes, H, W = 2, 4, 8, 16, 16
    params = _make_params(k1, inplanes, planes)
    x = jax.random.normal(kx1, (N, inplanes, H, W), jnp.float32)
    ref = basic_block_ref(x, params)

    out_f32 = jax.block_until_ready(fwd_f32(x, params))
    assert out_f32.shape == (N, planes, H, W), out_f32.shape
    err = float(jnp.max(jnp.abs(out_f32 - ref)))
    assert jnp.allclose(out_f32, ref, rtol=2e-4, atol=2e-4), err

    out_bf16 = jax.block_until_ready(fwd_bf16(x, params))
    err_bf = float(jnp.max(jnp.abs(out_bf16 - ref)))
    assert jnp.allclose(out_bf16, ref, rtol=5e-2, atol=1e-1), err_bf

    # Case 2: inplanes == planes -> identity shortcut path.
    params2 = _make_params(k2, planes, planes)
    x2 = jax.random.normal(kx2, (N, planes, H, W), jnp.float32)
    ref2 = basic_block_ref(x2, params2)

    out2_f32 = jax.block_until_ready(fwd_f32(x2, params2))
    assert out2_f32.shape == (N, planes, H, W), out2_f32.shape
    err2 = float(jnp.max(jnp.abs(out2_f32 - ref2)))
    assert jnp.allclose(out2_f32, ref2, rtol=2e-4, atol=2e-4), err2

    out2_bf16 = jax.block_until_ready(fwd_bf16(x2, params2))
    err2_bf = float(jnp.max(jnp.abs(out2_bf16 - ref2)))
    assert jnp.allclose(out2_bf16, ref2, rtol=5e-2, atol=1e-1), err2_bf

    print("KERNEL_OK")
</pallas_src>

<mosaic_0001>
module attributes {stable_mosaic.version = 11 : i64} {
  func.func @kernel(%arg0: i32, %arg1: i32, %arg2: memref<1x480x128xf32, #tpu.memory_space<vmem>>, %arg3: memref<9x128x128xf32, #tpu.memory_space<vmem>>, %arg4: memref<1x128xf32, #tpu.memory_space<vmem>>, %arg5: memref<1x128xf32, #tpu.memory_space<vmem>>, %arg6: memref<192x1xf32, #tpu.memory_space<vmem>>, %arg7: memref<9x128x128xf32, #tpu.memory_space<vmem>>, %arg8: memref<1x128xf32, #tpu.memory_space<vmem>>, %arg9: memref<1x128xf32, #tpu.memory_space<vmem>>, %arg10: memref<1x480x128xf32, #tpu.memory_space<vmem>>, %arg11: memref<1x480x128xf32, #tpu.memory_space<vmem>>) attributes {dimension_semantics = [#tpu.dimension_semantics<parallel>, #tpu.dimension_semantics<arbitrary>], iteration_bounds = array<i64: 2, 2>, scalar_prefetch = 0 : i64, scratch_operands = 0 : i64, tpu.core_type = #tpu.core_type<tc>, window_params = [{transform_indices = @transform_0, window_bounds = array<i64: 1, 480, 128>}, {pipeline_mode = #tpu.pipeline_mode<synchronous>, transform_indices = @transform_1, window_bounds = array<i64: 9, 128, 128>}, {pipeline_mode = #tpu.pipeline_mode<synchronous>, transform_indices = @transform_2, window_bounds = array<i64: 1, 128>}, {pipeline_mode = #tpu.pipeline_mode<synchronous>, transform_indices = @transform_3, window_bounds = array<i64: 1, 128>}, {pipeline_mode = #tpu.pipeline_mode<synchronous>, transform_indices = @transform_4, window_bounds = array<i64: 192, 1>}, {pipeline_mode = #tpu.pipeline_mode<synchronous>, transform_indices = @transform_5, window_bounds = array<i64: 9, 128, 128>}, {pipeline_mode = #tpu.pipeline_mode<synchronous>, transform_indices = @transform_6, window_bounds = array<i64: 1, 128>}, {pipeline_mode = #tpu.pipeline_mode<synchronous>, transform_indices = @transform_7, window_bounds = array<i64: 1, 128>}, {transform_indices = @transform_8, window_bounds = array<i64: 1, 480, 128>}, {transform_indices = @transform_9, window_bounds = array<i64: 1, 480, 128>}]} {
    %c8_i32 = arith.constant 8 : i32
    %0 = arith.muli %arg1, %c8_i32 : i32
    %c2_i32 = arith.constant 2 : i32
    %1 = arith.addi %0, %c2_i32 : i32
    %c24_i32 = arith.constant 24 : i32
    %2 = arith.muli %1, %c24_i32 : i32
    %3 = tpu.assume_multiple %2, 8 : i32
    %c0_i32 = arith.constant 0 : i32
    %4 = arith.cmpi eq, %arg1, %c0_i32 : i32
    %5 = arith.extui %4 : i1 to i32
    %c0_i32_0 = arith.constant 0 : i32
    %6 = arith.cmpi ne, %5, %c0_i32_0 : i32
    scf.if %6 {
      %cst_150 = arith.constant 0.000000e+00 : f32
      %204 = vector.broadcast %cst_150 : f32 to vector<48x128xf32>
      %c0_151 = arith.constant 0 : index
      %c0_152 = arith.constant 0 : index
      %c0_153 = arith.constant 0 : index
      %205 = vector.load %arg10[%c0_151, %c0_152, %c0_153] : memref<1x480x128xf32, #tpu.memory_space<vmem>>, vector<1x48x128xf32>
      %206 = vector.shape_cast %205 : vector<1x48x128xf32> to vector<48x128xf32>
      %207 = vector.shape_cast %204 : vector<48x128xf32> to vector<1x48x128xf32>
      tpu.vector_store %arg10[%c0_151, %c0_152, %c0_153], %207 {strides = array<i32>} : memref<1x480x128xf32, #tpu.memory_space<vmem>>, vector<1x48x128xf32>,
      %c0_154 = arith.constant 0 : index
      %c432 = arith.constant 432 : index
      %c0_155 = arith.constant 0 : index
      %208 = vector.load %arg10[%c0_154, %c432, %c0_155] : memref<1x480x128xf32, #tpu.memory_space<vmem>>, vector<1x48x128xf32>
      %209 = vector.shape_cast %208 : vector<1x48x128xf32> to vector<48x128xf32>
      %210 = vector.shape_cast %204 : vector<48x128xf32> to vector<1x48x128xf32>
      tpu.vector_store %arg10[%c0_154, %c432, %c0_155], %210 {strides = array<i32>} : memref<1x480x128xf32, #tpu.memory_space<vmem>>, vector<1x48x128xf32>,
      %c0_156 = arith.constant 0 : index
      %c0_157 = arith.constant 0 : index
      %c0_158 = arith.constant 0 : index
      %211 = vector.load %arg11[%c0_156, %c0_157, %c0_158] : memref<1x480x128xf32, #tpu.memory_space<vmem>>, vector<1x48x128xf32>
      %212 = vector.shape_cast %211 : vector<1x48x128xf32> to vector<48x128xf32>
      %213 = vector.shape_cast %204 : vector<48x128xf32> to vector<1x48x128xf32>
      tpu.vector_store %arg11[%c0_156, %c0_157, %c0_158], %213 {strides = array<i32>} : memref<1x480x128xf32, #tpu.memory_space<vmem>>, vector<1x48x128xf32>,
      %c0_159 = arith.constant 0 : index
      %c432_160 = arith.constant 432 : index
      %c0_161 = arith.constant 0 : index
      %214 = vector.load %arg11[%c0_159, %c432_160, %c0_161] : memref<1x480x128xf32, #tpu.memory_space<vmem>>, vector<1x48x128xf32>
      %215 = vector.shape_cast %214 : vector<1x48x128xf32> to vector<48x128xf32>
      %216 = vector.shape_cast %204 : vector<48x128xf32> to vector<1x48x128xf32>
      tpu.vector_store %arg11[%c0_159, %c432_160, %c0_161], %216 {strides = array<i32>} : memref<1x480x128xf32, #tpu.memory_space<vmem>>, vector<1x48x128xf32>,
    } else {
    }
    %c0 = arith.constant 0 : index
    %c0_1 = arith.constant 0 : index
    %7 = vector.load %arg6[%c0, %c0_1] : memref<192x1xf32, #tpu.memory_space<vmem>>, vector<192x1xf32>
    %cst = arith.constant 0.000000e+00 : f32
    %8 = vector.broadcast %cst : f32 to vector<192x128xf32>
    %c0_i32_2 = arith.constant 0 : i32
    %9 = arith.addi %0, %c0_i32_2 : i32
    %c1_i32 = arith.constant 1 : i32
    %10 = arith.addi %9, %c1_i32 : i32
    %c24_i32_3 = arith.constant 24 : i32
    %11 = arith.muli %10, %c24_i32_3 : i32
    %12 = tpu.assume_multiple %11, 8 : i32
    %c-1_i32 = arith.constant -1 : i32
    %13 = arith.addi %12, %c-1_i32 : i32
    %c0_4 = arith.constant 0 : index
    %14 = arith.index_cast %13 : i32 to index
    %c0_5 = arith.constant 0 : index
    %15 = vector.load %arg2[%c0_4, %14, %c0_5] : memref<1x480x128xf32, #tpu.memory_space<vmem>>, vector<1x192x128xf32>
    %16 = vector.shape_cast %15 : vector<1x192x128xf32> to vector<192x128xf32>
    %c0_6 = arith.constant 0 : index
    %c0_7 = arith.constant 0 : index
    %c0_8 = arith.constant 0 : index
    %17 = vector.load %arg3[%c0_6, %c0_7, %c0_8] : memref<9x128x128xf32, #tpu.memory_space<vmem>>, vector<1x128x128xf32>
    %18 = vector.shape_cast %17 : vector<1x128x128xf32> to vector<128x128xf32>
    %cst_9 = arith.constant dense<0.000000e+00> : vector<192x128xf32>
    %19 = tpu.matmul %16, %18, %cst_9 {dimension_numbers = #tpu.dot_dimension_numbers<[1], [0], [0], [1], [0, 0, 1, 1], [], []>} : vector<192x128xf32>, vector<128x128xf32>, vector<192x128xf32> -> vector<192x128xf32>
    %20 = arith.addf %8, %19 : vector<192x128xf32>
    %c0_i32_10 = arith.constant 0 : i32
    %21 = arith.addi %12, %c0_i32_10 : i32
    %c0_11 = arith.constant 0 : index
    %22 = arith.index_cast %21 : i32 to index
    %c0_12 = arith.constant 0 : index
    %23 = vector.load %arg2[%c0_11, %22, %c0_12] : memref<1x480x128xf32, #tpu.memory_space<vmem>>, vector<1x192x128xf32>
    %24 = vector.shape_cast %23 : vector<1x192x128xf32> to vector<192x128xf32>
    %c1 = arith.constant 1 : index
    %c0_13 = arith.constant 0 : index
    %c0_14 = arith.constant 0 : index
    %25 = vector.load %arg3[%c1, %c0_13, %c0_14] : memref<9x128x128xf32, #tpu.memory_space<vmem>>, vector<1x128x128xf32>
    %26 = vector.shape_cast %25 : vector<1x128x128xf32> to vector<128x128xf32>
    %cst_15 = arith.constant dense<0.000000e+00> : vector<192x128xf32>
    %27 = tpu.matmul %24, %26, %cst_15 {dimension_numbers = #tpu.dot_dimension_numbers<[1], [0], [0], [1], [0, 0, 1, 1], [], []>} : vector<192x128xf32>, vector<128x128xf32>, vector<192x128xf32> -> vector<192x128xf32>
    %28 = arith.addf %20, %27 : vector<192x128xf32>
    %c1_i32_16 = arith.constant 1 : i32
    %29 = arith.addi %12, %c1_i32_16 : i32
    %c0_17 = arith.constant 0 : index
    %30 = arith.index_cast %29 : i32 to index
    %c0_18 = arith.constant 0 : index
    %31 = vector.load %arg2[%c0_17, %30, %c0_18] : memref<1x480x128xf32, #tpu.memory_space<vmem>>, vector<1x192x128xf32>
    %32 = vector.shape_cast %31 : vector<1x192x128xf32> to vector<192x128xf32>
    %c2 = arith.constant 2 : index
    %c0_19 = arith.constant 0 : index
    %c0_20 = arith.constant 0 : index
    %33 = vector.load %arg3[%c2, %c0_19, %c0_20] : memref<9x128x128xf32, #tpu.memory_space<vmem>>, vector<1x128x128xf32>
    %34 = vector.shape_cast %33 : vector<1x128x128xf32> to vector<128x128xf32>
    %cst_21 = arith.constant dense<0.000000e+00> : vector<192x128xf32>
    %35 = tpu.matmul %32, %34, %cst_21 {dimension_numbers = #tpu.dot_dimension_numbers<[1], [0], [0], [1], [0, 0, 1, 1], [], []>} : vector<192x128xf32>, vector<128x128xf32>, vector<192x128xf32> -> vector<192x128xf32>
    %36 = arith.addf %28, %35 : vector<192x128xf32>
    %c1_i32_22 = arith.constant 1 : i32
    %37 = arith.addi %0, %c1_i32_22 : i32
    %c1_i32_23 = arith.constant 1 : i32
    %38 = arith.addi %37, %c1_i32_23 : i32
    %c24_i32_24 = arith.constant 24 : i32
    %39 = arith.muli %38, %c24_i32_24 : i32
    %40 = tpu.assume_multiple %39, 8 : i32
    %c-1_i32_25 = arith.constant -1 : i32
    %41 = arith.addi %40, %c-1_i32_25 : i32
    %c0_26 = arith.constant 0 : index
    %42 = arith.index_cast %41 : i32 to index
    %c0_27 = arith.constant 0 : index
    %43 = vector.load %arg2[%c0_26, %42, %c0_27] : memref<1x480x128xf32, #tpu.memory_space<vmem>>, vector<1x192x128xf32>
    %44 = vector.shape_cast %43 : vector<1x192x128xf32> to vector<192x128xf32>
    %c3 = arith.constant 3 : index
    %c0_28 = arith.constant 0 : index
    %c0_29 = arith.constant 0 : index
    %45 = vector.load %arg3[%c3, %c0_28, %c0_29] : memref<9x128x128xf32, #tpu.memory_space<vmem>>, vector<1x128x128xf32>
    %46 = vector.shape_cast %45 : vector<1x128x128xf32> to vector<128x128xf32>
    %cst_30 = arith.constant dense<0.000000e+00> : vector<192x128xf32>
    %47 = tpu.matmul %44, %46, %cst_30 {dimension_numbers = #tpu.dot_dimension_numbers<[1], [0], [0], [1], [0, 0, 1, 1], [], []>} : vector<192x128xf32>, vector<128x128xf32>, vector<192x128xf32> -> vector<192x128xf32>
    %48 = arith.addf %36, %47 : vector<192x128xf32>
    %c0_i32_31 = arith.constant 0 : i32
    %49 = arith.addi %40, %c0_i32_31 : i32
    %c0_32 = arith.constant 0 : index
    %50 = arith.index_cast %49 : i32 to index
    %c0_33 = arith.constant 0 : index
    %51 = vector.load %arg2[%c0_32, %50, %c0_33] : memref<1x480x128xf32, #tpu.memory_space<vmem>>, vector<1x192x128xf32>
    %52 = vector.shape_cast %51 : vector<1x192x128xf32> to vector<192x128xf32>
    %c4 = arith.constant 4 : index
    %c0_34 = arith.constant 0 : index
    %c0_35 = arith.constant 0 : index
    %53 = vector.load %arg3[%c4, %c0_34, %c0_35] : memref<9x128x128xf32, #tpu.memory_space<vmem>>, vector<1x128x128xf32>
    %54 = vector.shape_cast %53 : vector<1x128x128xf32> to vector<128x128xf32>
    %cst_36 = arith.constant dense<0.000000e+00> : vector<192x128xf32>
    %55 = tpu.matmul %52, %54, %cst_36 {dimension_numbers = #tpu.dot_dimension_numbers<[1], [0], [0], [1], [0, 0, 1, 1], [], []>} : vector<192x128xf32>, vector<128x128xf32>, vector<192x128xf32> -> vector<192x128xf32>
    %56 = arith.addf %48, %55 : vector<192x128xf32>
    %c1_i32_37 = arith.constant 1 : i32
    %57 = arith.addi %40, %c1_i32_37 : i32
    %c0_38 = arith.constant 0 : index
    %58 = arith.index_cast %57 : i32 to index
    %c0_39 = arith.constant 0 : index
    %59 = vector.load %arg2[%c0_38, %58, %c0_39] : memref<1x480x128xf32, #tpu.memory_space<vmem>>, vector<1x192x128xf32>
    %60 = vector.shape_cast %59 : vector<1x192x128xf32> to vector<192x128xf32>
    %c5 = arith.constant 5 : index
    %c0_40 = arith.constant 0 : index
    %c0_41 = arith.constant 0 : index
    %61 = vector.load %arg3[%c5, %c0_40, %c0_41] : memref<9x128x128xf32, #tpu.memory_space<vmem>>, vector<1x128x128xf32>
    %62 = vector.shape_cast %61 : vector<1x128x128xf32> to vector<128x128xf32>
    %cst_42 = arith.constant dense<0.000000e+00> : vector<192x128xf32>
    %63 = tpu.matmul %60, %62, %cst_42 {dimension_numbers = #tpu.dot_dimension_numbers<[1], [0], [0], [1], [0, 0, 1, 1], [], []>} : vector<192x128xf32>, vector<128x128xf32>, vector<192x128xf32> -> vector<192x128xf32>
    %64 = arith.addf %56, %63 : vector<192x128xf32>
    %c2_i32_43 = arith.constant 2 : i32
    %65 = arith.addi %0, %c2_i32_43 : i32
    %c1_i32_44 = arith.constant 1 : i32
    %66 = arith.addi %65, %c1_i32_44 : i32
    %c24_i32_45 = arith.constant 24 : i32
    %67 = arith.muli %66, %c24_i32_45 : i32
    %68 = tpu.assume_multiple %67, 8 : i32
    %c-1_i32_46 = arith.constant -1 : i32
    %69 = arith.addi %68, %c-1_i32_46 : i32
    %c0_47 = arith.constant 0 : index
    %70 = arith.index_cast %69 : i32 to index
    %c0_48 = arith.constant 0 : index
    %71 = vector.load %arg2[%c0_47, %70, %c0_48] : memref<1x480x128xf32, #tpu.memory_space<vmem>>, vector<1x192x128xf32>
    %72 = vector.shape_cast %71 : vector<1x192x128xf32> to vector<192x128xf32>
    %c6 = arith.constant 6 : index
    %c0_49 = arith.constant 0 : index
    %c0_50 = arith.constant 0 : index
    %73 = vector.load %arg3[%c6, %c0_49, %c0_50] : memref<9x128x128xf32, #tpu.memory_space<vmem>>, vector<1x128x128xf32>
    %74 = vector.shape_cast %73 : vector<1x128x128xf32> to vector<128x128xf32>
    %cst_51 = arith.constant dense<0.000000e+00> : vector<192x128xf32>
    %75 = tpu.matmul %72, %74, %cst_51 {dimension_numbers = #tpu.dot_dimension_numbers<[1], [0], [0], [1], [0, 0, 1, 1], [], []>} : vector<192x128xf32>, vector<128x128xf32>, vector<192x128xf32> -> vector<192x128xf32>
    %76 = arith.addf %64, %75 : vector<192x128xf32>
    %c0_i32_52 = arith.constant 0 : i32
    %77 = arith.addi %68, %c0_i32_52 : i32
    %c0_53 = arith.constant 0 : index
    %78 = arith.index_cast %77 : i32 to index
    %c0_54 = arith.constant 0 : index
    %79 = vector.load %arg2[%c0_53, %78, %c0_54] : memref<1x480x128xf32, #tpu.memory_space<vmem>>, vector<1x192x128xf32>
    %80 = vector.shape_cast %79 : vector<1x192x128xf32> to vector<192x128xf32>
    %c7 = arith.constant 7 : index
    %c0_55 = arith.constant 0 : index
    %c0_56 = arith.constant 0 : index
    %81 = vector.load %arg3[%c7, %c0_55, %c0_56] : memref<9x128x128xf32, #tpu.memory_space<vmem>>, vector<1x128x128xf32>
    %82 = vector.shape_cast %81 : vector<1x128x128xf32> to vector<128x128xf32>
    %cst_57 = arith.constant dense<0.000000e+00> : vector<192x128xf32>
    %83 = tpu.matmul %80, %82, %cst_57 {dimension_numbers = #tpu.dot_dimension_numbers<[1], [0], [0], [1], [0, 0, 1, 1], [], []>} : vector<192x128xf32>, vector<128x128xf32>, vector<192x128xf32> -> vector<192x128xf32>
    %84 = arith.addf %76, %83 : vector<192x128xf32>
    %c1_i32_58 = arith.constant 1 : i32
    %85 = arith.addi %68, %c1_i32_58 : i32
    %c0_59 = arith.constant 0 : index
    %86 = arith.index_cast %85 : i32 to index
    %c0_60 = arith.constant 0 : index
    %87 = vector.load %arg2[%c0_59, %86, %c0_60] : memref<1x480x128xf32, #tpu.memory_space<vmem>>, vector<1x192x128xf32>
    %88 = vector.shape_cast %87 : vector<1x192x128xf32> to vector<192x128xf32>
    %c8 = arith.constant 8 : index
    %c0_61 = arith.constant 0 : index
    %c0_62 = arith.constant 0 : index
    %89 = vector.load %arg3[%c8, %c0_61, %c0_62] : memref<9x128x128xf32, #tpu.memory_space<vmem>>, vector<1x128x128xf32>
    %90 = vector.shape_cast %89 : vector<1x128x128xf32> to vector<128x128xf32>
    %cst_63 = arith.constant dense<0.000000e+00> : vector<192x128xf32>
    %91 = tpu.matmul %88, %90, %cst_63 {dimension_numbers = #tpu.dot_dimension_numbers<[1], [0], [0], [1], [0, 0, 1, 1], [], []>} : vector<192x128xf32>, vector<128x128xf32>, vector<192x128xf32> -> vector<192x128xf32>
    %92 = arith.addf %84, %91 : vector<192x128xf32>
    %c0_64 = arith.constant 0 : index
    %c0_65 = arith.constant 0 : index
    %93 = vector.load %arg4[%c0_64, %c0_65] : memref<1x128xf32, #tpu.memory_space<vmem>>, vector<1x128xf32>
    %94 = vector.broadcast %93 : vector<1x128xf32> to vector<192x128xf32>
    %95 = arith.mulf %92, %94 : vector<192x128xf32>
    %c0_66 = arith.constant 0 : index
    %c0_67 = arith.constant 0 : index
    %96 = vector.load %arg5[%c0_66, %c0_67] : memref<1x128xf32, #tpu.memory_space<vmem>>, vector<1x128xf32>
    %97 = vector.broadcast %96 : vector<1x128xf32> to vector<192x128xf32>
    %98 = arith.addf %95, %97 : vector<192x128xf32>
    %cst_68 = arith.constant 0.000000e+00 : f32
    %99 = vector.broadcast %cst_68 : f32 to vector<192x128xf32>
    %100 = arith.maximumf %98, %99 : vector<192x128xf32>
    %101 = vector.broadcast %7 : vector<192x1xf32> to vector<192x128xf32>
    %102 = arith.mulf %100, %101 : vector<192x128xf32>
    %c0_69 = arith.constant 0 : index
    %103 = arith.index_cast %3 : i32 to index
    %c0_70 = arith.constant 0 : index
    %104 = vector.load %arg10[%c0_69, %103, %c0_70] : memref<1x480x128xf32, #tpu.memory_space<vmem>>, vector<1x192x128xf32>
    %105 = vector.shape_cast %104 : vector<1x192x128xf32> to vector<192x128xf32>
    %106 = vector.shape_cast %102 : vector<192x128xf32> to vector<1x192x128xf32>
    tpu.vector_store %arg10[%c0_69, %103, %c0_70], %106 {strides = array<i32>} : memref<1x480x128xf32, #tpu.memory_space<vmem>>, vector<1x192x128xf32>,
    %cst_71 = arith.constant 0.000000e+00 : f32
    %107 = vector.broadcast %cst_71 : f32 to vector<192x128xf32>
    %c0_i32_72 = arith.constant 0 : i32
    %108 = arith.addi %0, %c0_i32_72 : i32
    %c1_i32_73 = arith.constant 1 : i32
    %109 = arith.addi %108, %c1_i32_73 : i32
    %c24_i32_74 = arith.constant 24 : i32
    %110 = arith.muli %109, %c24_i32_74 : i32
    %111 = tpu.assume_multiple %110, 8 : i32
    %c-1_i32_75 = arith.constant -1 : i32
    %112 = arith.addi %111, %c-1_i32_75 : i32
    %c0_76 = arith.constant 0 : index
    %113 = arith.index_cast %112 : i32 to index
    %c0_77 = arith.constant 0 : index
    %114 = vector.load %arg2[%c0_76, %113, %c0_77] : memref<1x480x128xf32, #tpu.memory_space<vmem>>, vector<1x192x128xf32>
    %115 = vector.shape_cast %114 : vector<1x192x128xf32> to vector<192x128xf32>
    %c0_78 = arith.constant 0 : index
    %c0_79 = arith.constant 0 : index
    %c0_80 = arith.constant 0 : index
    %116 = vector.load %arg7[%c0_78, %c0_79, %c0_80] : memref<9x128x128xf32, #tpu.memory_space<vmem>>, vector<1x128x128xf32>
    %117 = vector.shape_cast %116 : vector<1x128x128xf32> to vector<128x128xf32>
    %cst_81 = arith.constant dense<0.000000e+00> : vector<192x128xf32>
    %118 = tpu.matmul %115, %117, %cst_81 {dimension_numbers = #tpu.dot_dimension_numbers<[1], [0], [0], [1], [0, 0, 1, 1], [], []>} : vector<192x128xf32>, vector<128x128xf32>, vector<192x128xf32> -> vector<192x128xf32>
    %119 = arith.addf %107, %118 : vector<192x128xf32>
    %c0_i32_82 = arith.constant 0 : i32
    %120 = arith.addi %111, %c0_i32_82 : i32
    %c0_83 = arith.constant 0 : index
    %121 = arith.index_cast %120 : i32 to index
    %c0_84 = arith.constant 0 : index
    %122 = vector.load %arg2[%c0_83, %121, %c0_84] : memref<1x480x128xf32, #tpu.memory_space<vmem>>, vector<1x192x128xf32>
    %123 = vector.shape_cast %122 : vector<1x192x128xf32> to vector<192x128xf32>
    %c1_85 = arith.constant 1 : index
    %c0_86 = arith.constant 0 : index
    %c0_87 = arith.constant 0 : index
    %124 = vector.load %arg7[%c1_85, %c0_86, %c0_87] : memref<9x128x128xf32, #tpu.memory_space<vmem>>, vector<1x128x128xf32>
    %125 = vector.shape_cast %124 : vector<1x128x128xf32> to vector<128x128xf32>
    %cst_88 = arith.constant dense<0.000000e+00> : vector<192x128xf32>
    %126 = tpu.matmul %123, %125, %cst_88 {dimension_numbers = #tpu.dot_dimension_numbers<[1], [0], [0], [1], [0, 0, 1, 1], [], []>} : vector<192x128xf32>, vector<128x128xf32>, vector<192x128xf32> -> vector<192x128xf32>
    %127 = arith.addf %119, %126 : vector<192x128xf32>
    %c1_i32_89 = arith.constant 1 : i32
    %128 = arith.addi %111, %c1_i32_89 : i32
    %c0_90 = arith.constant 0 : index
    %129 = arith.index_cast %128 : i32 to index
    %c0_91 = arith.constant 0 : index
    %130 = vector.load %arg2[%c0_90, %129, %c0_91] : memref<1x480x128xf32, #tpu.memory_space<vmem>>, vector<1x192x128xf32>
    %131 = vector.shape_cast %130 : vector<1x192x128xf32> to vector<192x128xf32>
    %c2_92 = arith.constant 2 : index
    %c0_93 = arith.constant 0 : index
    %c0_94 = arith.constant 0 : index
    %132 = vector.load %arg7[%c2_92, %c0_93, %c0_94] : memref<9x128x128xf32, #tpu.memory_space<vmem>>, vector<1x128x128xf32>
    %133 = vector.shape_cast %132 : vector<1x128x128xf32> to vector<128x128xf32>
    %cst_95 = arith.constant dense<0.000000e+00> : vector<192x128xf32>
    %134 = tpu.matmul %131, %133, %cst_95 {dimension_numbers = #tpu.dot_dimension_numbers<[1], [0], [0], [1], [0, 0, 1, 1], [], []>} : vector<192x128xf32>, vector<128x128xf32>, vector<192x128xf32> -> vector<192x128xf32>
    %135 = arith.addf %127, %134 : vector<192x128xf32>
    %c1_i32_96 = arith.constant 1 : i32
    %136 = arith.addi %0, %c1_i32_96 : i32
    %c1_i32_97 = arith.constant 1 : i32
    %137 = arith.addi %136, %c1_i32_97 : i32
    %c24_i32_98 = arith.constant 24 : i32
    %138 = arith.muli %137, %c24_i32_98 : i32
    %139 = tpu.assume_multiple %138, 8 : i32
    %c-1_i32_99 = arith.constant -1 : i32
    %140 = arith.addi %139, %c-1_i32_99 : i32
    %c0_100 = arith.constant 0 : index
    %141 = arith.index_cast %140 : i32 to index
    %c0_101 = arith.constant 0 : index
    %142 = vector.load %arg2[%c0_100, %141, %c0_101] : memref<1x480x128xf32, #tpu.memory_space<vmem>>, vector<1x192x128xf32>
    %143 = vector.shape_cast %142 : vector<1x192x128xf32> to vector<192x128xf32>
    %c3_102 = arith.constant 3 : index
    %c0_103 = arith.constant 0 : index
    %c0_104 = arith.constant 0 : index
    %144 = vector.load %arg7[%c3_102, %c0_103, %c0_104] : memref<9x128x128xf32, #tpu.memory_space<vmem>>, vector<1x128x128xf32>
    %145 = vector.shape_cast %144 : vector<1x128x128xf32> to vector<128x128xf32>
    %cst_105 = arith.constant dense<0.000000e+00> : vector<192x128xf32>
    %146 = tpu.matmul %143, %145, %cst_105 {dimension_numbers = #tpu.dot_dimension_numbers<[1], [0], [0], [1], [0, 0, 1, 1], [], []>} : vector<192x128xf32>, vector<128x128xf32>, vector<192x128xf32> -> vector<192x128xf32>
    %147 = arith.addf %135, %146 : vector<192x128xf32>
    %c0_i32_106 = arith.constant 0 : i32
    %148 = arith.addi %139, %c0_i32_106 : i32
    %c0_107 = arith.constant 0 : index
    %149 = arith.index_cast %148 : i32 to index
    %c0_108 = arith.constant 0 : index
    %150 = vector.load %arg2[%c0_107, %149, %c0_108] : memref<1x480x128xf32, #tpu.memory_space<vmem>>, vector<1x192x128xf32>
    %151 = vector.shape_cast %150 : vector<1x192x128xf32> to vector<192x128xf32>
    %c4_109 = arith.constant 4 : index
    %c0_110 = arith.constant 0 : index
    %c0_111 = arith.constant 0 : index
    %152 = vector.load %arg7[%c4_109, %c0_110, %c0_111] : memref<9x128x128xf32, #tpu.memory_space<vmem>>, vector<1x128x128xf32>
    %153 = vector.shape_cast %152 : vector<1x128x128xf32> to vector<128x128xf32>
    %cst_112 = arith.constant dense<0.000000e+00> : vector<192x128xf32>
    %154 = tpu.matmul %151, %153, %cst_112 {dimension_numbers = #tpu.dot_dimension_numbers<[1], [0], [0], [1], [0, 0, 1, 1], [], []>} : vector<192x128xf32>, vector<128x128xf32>, vector<192x128xf32> -> vector<192x128xf32>
    %155 = arith.addf %147, %154 : vector<192x128xf32>
    %c1_i32_113 = arith.constant 1 : i32
    %156 = arith.addi %139, %c1_i32_113 : i32
    %c0_114 = arith.constant 0 : index
    %157 = arith.index_cast %156 : i32 to index
    %c0_115 = arith.constant 0 : index
    %158 = vector.load %arg2[%c0_114, %157, %c0_115] : memref<1x480x128xf32, #tpu.memory_space<vmem>>, vector<1x192x128xf32>
    %159 = vector.shape_cast %158 : vector<1x192x128xf32> to vector<192x128xf32>
    %c5_116 = arith.constant 5 : index
    %c0_117 = arith.constant 0 : index
    %c0_118 = arith.constant 0 : index
    %160 = vector.load %arg7[%c5_116, %c0_117, %c0_118] : memref<9x128x128xf32, #tpu.memory_space<vmem>>, vector<1x128x128xf32>
    %161 = vector.shape_cast %160 : vector<1x128x128xf32> to vector<128x128xf32>
    %cst_119 = arith.constant dense<0.000000e+00> : vector<192x128xf32>
    %162 = tpu.matmul %159, %161, %cst_119 {dimension_numbers = #tpu.dot_dimension_numbers<[1], [0], [0], [1], [0, 0, 1, 1], [], []>} : vector<192x128xf32>, vector<128x128xf32>, vector<192x128xf32> -> vector<192x128xf32>
    %163 = arith.addf %155, %162 : vector<192x128xf32>
    %c2_i32_120 = arith.constant 2 : i32
    %164 = arith.addi %0, %c2_i32_120 : i32
    %c1_i32_121 = arith.constant 1 : i32
    %165 = arith.addi %164, %c1_i32_121 : i32
    %c24_i32_122 = arith.constant 24 : i32
    %166 = arith.muli %165, %c24_i32_122 : i32
    %167 = tpu.assume_multiple %166, 8 : i32
    %c-1_i32_123 = arith.constant -1 : i32
    %168 = arith.addi %167, %c-1_i32_123 : i32
    %c0_124 = arith.constant 0 : index
    %169 = arith.index_cast %168 : i32 to index
    %c0_125 = arith.constant 0 : index
    %170 = vector.load %arg2[%c0_124, %169, %c0_125] : memref<1x480x128xf32, #tpu.memory_space<vmem>>, vector<1x192x128xf32>
    %171 = vector.shape_cast %170 : vector<1x192x128xf32> to vector<192x128xf32>
    %c6_126 = arith.constant 6 : index
    %c0_127 = arith.constant 0 : index
    %c0_128 = arith.constant 0 : index
    %172 = vector.load %arg7[%c6_126, %c0_127, %c0_128] : memref<9x128x128xf32, #tpu.memory_space<vmem>>, vector<1x128x128xf32>
    %173 = vector.shape_cast %172 : vector<1x128x128xf32> to vector<128x128xf32>
    %cst_129 = arith.constant dense<0.000000e+00> : vector<192x128xf32>
    %174 = tpu.matmul %171, %173, %cst_129 {dimension_numbers = #tpu.dot_dimension_numbers<[1], [0], [0], [1], [0, 0, 1, 1], [], []>} : vector<192x128xf32>, vector<128x128xf32>, vector<192x128xf32> -> vector<192x128xf32>
    %175 = arith.addf %163, %174 : vector<192x128xf32>
    %c0_i32_130 = arith.constant 0 : i32
    %176 = arith.addi %167, %c0_i32_130 : i32
    %c0_131 = arith.constant 0 : index
    %177 = arith.index_cast %176 : i32 to index
    %c0_132 = arith.constant 0 : index
    %178 = vector.load %arg2[%c0_131, %177, %c0_132] : memref<1x480x128xf32, #tpu.memory_space<vmem>>, vector<1x192x128xf32>
    %179 = vector.shape_cast %178 : vector<1x192x128xf32> to vector<192x128xf32>
    %c7_133 = arith.constant 7 : index
    %c0_134 = arith.constant 0 : index
    %c0_135 = arith.constant 0 : index
    %180 = vector.load %arg7[%c7_133, %c0_134, %c0_135] : memref<9x128x128xf32, #tpu.memory_space<vmem>>, vector<1x128x128xf32>
    %181 = vector.shape_cast %180 : vector<1x128x128xf32> to vector<128x128xf32>
    %cst_136 = arith.constant dense<0.000000e+00> : vector<192x128xf32>
    %182 = tpu.matmul %179, %181, %cst_136 {dimension_numbers = #tpu.dot_dimension_numbers<[1], [0], [0], [1], [0, 0, 1, 1], [], []>} : vector<192x128xf32>, vector<128x128xf32>, vector<192x128xf32> -> vector<192x128xf32>
    %183 = arith.addf %175, %182 : vector<192x128xf32>
    %c1_i32_137 = arith.constant 1 : i32
    %184 = arith.addi %167, %c1_i32_137 : i32
    %c0_138 = arith.constant 0 : index
    %185 = arith.index_cast %184 : i32 to index
    %c0_139 = arith.constant 0 : index
    %186 = vector.load %arg2[%c0_138, %185, %c0_139] : memref<1x480x128xf32, #tpu.memory_space<vmem>>, vector<1x192x128xf32>
    %187 = vector.shape_cast %186 : vector<1x192x128xf32> to vector<192x128xf32>
    %c8_140 = arith.constant 8 : index
    %c0_141 = arith.constant 0 : index
    %c0_142 = arith.constant 0 : index
    %188 = vector.load %arg7[%c8_140, %c0_141, %c0_142] : memref<9x128x128xf32, #tpu.memory_space<vmem>>, vector<1x128x128xf32>
    %189 = vector.shape_cast %188 : vector<1x128x128xf32> to vector<128x128xf32>
    %cst_143 = arith.constant dense<0.000000e+00> : vector<192x128xf32>
    %190 = tpu.matmul %187, %189, %cst_143 {dimension_numbers = #tpu.dot_dimension_numbers<[1], [0], [0], [1], [0, 0, 1, 1], [], []>} : vector<192x128xf32>, vector<128x128xf32>, vector<192x128xf32> -> vector<192x128xf32>
    %191 = arith.addf %183, %190 : vector<192x128xf32>
    %c0_144 = arith.constant 0 : index
    %c0_145 = arith.constant 0 : index
    %192 = vector.load %arg8[%c0_144, %c0_145] : memref<1x128xf32, #tpu.memory_space<vmem>>, vector<1x128xf32>
    %193 = vector.broadcast %192 : vector<1x128xf32> to vector<192x128xf32>
    %194 = arith.mulf %191, %193 : vector<192x128xf32>
    %c0_146 = arith.constant 0 : index
    %c0_147 = arith.constant 0 : index
    %195 = vector.load %arg9[%c0_146, %c0_147] : memref<1x128xf32, #tpu.memory_space<vmem>>, vector<1x128xf32>
    %196 = vector.broadcast %195 : vector<1x128xf32> to vector<192x128xf32>
    %197 = arith.addf %194, %196 : vector<192x128xf32>
    %198 = vector.broadcast %7 : vector<192x1xf32> to vector<192x128xf32>
    %199 = arith.mulf %197, %198 : vector<192x128xf32>
    %c0_148 = arith.constant 0 : index
    %200 = arith.index_cast %3 : i32 to index
    %c0_149 = arith.constant 0 : index
    %201 = vector.load %arg11[%c0_148, %200, %c0_149] : memref<1x480x128xf32, #tpu.memory_space<vmem>>, vector<1x192x128xf32>
    %202 = vector.shape_cast %201 : vector<1x192x128xf32> to vector<192x128xf32>
    %203 = vector.shape_cast %199 : vector<192x128xf32> to vector<1x192x128xf32>
    tpu.vector_store %arg11[%c0_148, %200, %c0_149], %203 {strides = array<i32>} : memref<1x480x128xf32, #tpu.memory_space<vmem>>, vector<1x192x128xf32>,
    return
  }
  func.func @transform_0(%arg0: i32, %arg1: i32) -> (i32, i32, i32) {
    %c0_i32 = arith.constant 0 : i32
    %c0_i32_0 = arith.constant 0 : i32
    %c0_i32_1 = arith.constant 0 : i32
    return %arg0, %c0_i32, %c0_i32_0 : i32, i32, i32
  }
  func.func @transform_1(%arg0: i32, %arg1: i32) -> (i32, i32, i32) {
    %c0_i32 = arith.constant 0 : i32
    %c0_i32_0 = arith.constant 0 : i32
    %c0_i32_1 = arith.constant 0 : i32
    %c0_i32_2 = arith.constant 0 : i32
    return %c0_i32, %c0_i32_0, %c0_i32_1 : i32, i32, i32
  }
  func.func @transform_2(%arg0: i32, %arg1: i32) -> (i32, i32) {
    %c0_i32 = arith.constant 0 : i32
    %c0_i32_0 = arith.constant 0 : i32
    %c0_i32_1 = arith.constant 0 : i32
    return %c0_i32, %c0_i32_0 : i32, i32
  }
  func.func @transform_3(%arg0: i32, %arg1: i32) -> (i32, i32) {
    %c0_i32 = arith.constant 0 : i32
    %c0_i32_0 = arith.constant 0 : i32
    %c0_i32_1 = arith.constant 0 : i32
    return %c0_i32, %c0_i32_0 : i32, i32
  }
  func.func @transform_4(%arg0: i32, %arg1: i32) -> (i32, i32) {
    %c0_i32 = arith.constant 0 : i32
    %c0_i32_0 = arith.constant 0 : i32
    %c0_i32_1 = arith.constant 0 : i32
    return %c0_i32, %c0_i32_0 : i32, i32
  }
  func.func @transform_5(%arg0: i32, %arg1: i32) -> (i32, i32, i32) {
    %c0_i32 = arith.constant 0 : i32
    %c0_i32_0 = arith.constant 0 : i32
    %c0_i32_1 = arith.constant 0 : i32
    %c0_i32_2 = arith.constant 0 : i32
    return %c0_i32, %c0_i32_0, %c0_i32_1 : i32, i32, i32
  }
  func.func @transform_6(%arg0: i32, %arg1: i32) -> (i32, i32) {
    %c0_i32 = arith.constant 0 : i32
    %c0_i32_0 = arith.constant 0 : i32
    %c0_i32_1 = arith.constant 0 : i32
    return %c0_i32, %c0_i32_0 : i32, i32
  }
  func.func @transform_7(%arg0: i32, %arg1: i32) -> (i32, i32) {
    %c0_i32 = arith.constant 0 : i32
    %c0_i32_0 = arith.constant 0 : i32
    %c0_i32_1 = arith.constant 0 : i32
    return %c0_i32, %c0_i32_0 : i32, i32
  }
  func.func @transform_8(%arg0: i32, %arg1: i32) -> (i32, i32, i32) {
    %c0_i32 = arith.constant 0 : i32
    %c0_i32_0 = arith.constant 0 : i32
    %c0_i32_1 = arith.constant 0 : i32
    return %arg0, %c0_i32, %c0_i32_0 : i32, i32, i32
  }
  func.func @transform_9(%arg0: i32, %arg1: i32) -> (i32, i32, i32) {
    %c0_i32 = arith.constant 0 : i32
    %c0_i32_0 = arith.constant 0 : i32
    %c0_i32_1 = arith.constant 0 : i32
    return %arg0, %c0_i32, %c0_i32_0 : i32, i32, i32
  }
}

module attributes {stable_mosaic.version = 11 : i64} {
  func.func @kernel(%arg0: i32, %arg1: i32, %arg2: memref<1x480x128xf32, #tpu.memory_space<vmem>>, %arg3: memref<9x128x128xf32, #tpu.memory_space<vmem>>, %arg4: memref<1x128xf32, #tpu.memory_space<vmem>>, %arg5: memref<1x128xf32, #tpu.memory_space<vmem>>, %arg6: memref<192x1xf32, #tpu.memory_space<vmem>>, %arg7: memref<1x480x128xf32, #tpu.memory_space<vmem>>, %arg8: memref<1x480x128xf32, #tpu.memory_space<vmem>>) attributes {dimension_semantics = [#tpu.dimension_semantics<parallel>, #tpu.dimension_semantics<arbitrary>], iteration_bounds = array<i64: 2, 2>, scalar_prefetch = 0 : i64, scratch_operands = 0 : i64, tpu.core_type = #tpu.core_type<tc>, window_params = [{transform_indices = @transform_0, window_bounds = array<i64: 1, 480, 128>}, {pipeline_mode = #tpu.pipeline_mode<synchronous>, transform_indices = @transform_1, window_bounds = array<i64: 9, 128, 128>}, {pipeline_mode = #tpu.pipeline_mode<synchronous>, transform_indices = @transform_2, window_bounds = array<i64: 1, 128>}, {pipeline_mode = #tpu.pipeline_mode<synchronous>, transform_indices = @transform_3, window_bounds = array<i64: 1, 128>}, {pipeline_mode = #tpu.pipeline_mode<synchronous>, transform_indices = @transform_4, window_bounds = array<i64: 192, 1>}, {transform_indices = @transform_5, window_bounds = array<i64: 1, 480, 128>}, {transform_indices = @transform_6, window_bounds = array<i64: 1, 480, 128>}]} {
    %c8_i32 = arith.constant 8 : i32
    %0 = arith.muli %arg1, %c8_i32 : i32
    %c2_i32 = arith.constant 2 : i32
    %1 = arith.addi %0, %c2_i32 : i32
    %c24_i32 = arith.constant 24 : i32
    %2 = arith.muli %1, %c24_i32 : i32
    %3 = tpu.assume_multiple %2, 8 : i32
    %c0_i32 = arith.constant 0 : i32
    %4 = arith.cmpi eq, %arg1, %c0_i32 : i32
    %5 = arith.extui %4 : i1 to i32
    %c0_i32_0 = arith.constant 0 : i32
    %6 = arith.cmpi ne, %5, %c0_i32_0 : i32
    scf.if %6 {
      %cst_73 = arith.constant 0.000000e+00 : f32
      %111 = vector.broadcast %cst_73 : f32 to vector<48x128xf32>
      %c0_74 = arith.constant 0 : index
      %c0_75 = arith.constant 0 : index
      %c0_76 = arith.constant 0 : index
      %112 = vector.load %arg8[%c0_74, %c0_75, %c0_76] : memref<1x480x128xf32, #tpu.memory_space<vmem>>, vector<1x48x128xf32>
      %113 = vector.shape_cast %112 : vector<1x48x128xf32> to vector<48x128xf32>
      %114 = vector.shape_cast %111 : vector<48x128xf32> to vector<1x48x128xf32>
      tpu.vector_store %arg8[%c0_74, %c0_75, %c0_76], %114 {strides = array<i32>} : memref<1x480x128xf32, #tpu.memory_space<vmem>>, vector<1x48x128xf32>,
      %c0_77 = arith.constant 0 : index
      %c432 = arith.constant 432 : index
      %c0_78 = arith.constant 0 : index
      %115 = vector.load %arg8[%c0_77, %c432, %c0_78] : memref<1x480x128xf32, #tpu.memory_space<vmem>>, vector<1x48x128xf32>
      %116 = vector.shape_cast %115 : vector<1x48x128xf32> to vector<48x128xf32>
      %117 = vector.shape_cast %111 : vector<48x128xf32> to vector<1x48x128xf32>
      tpu.vector_store %arg8[%c0_77, %c432, %c0_78], %117 {strides = array<i32>} : memref<1x480x128xf32, #tpu.memory_space<vmem>>, vector<1x48x128xf32>,
    } else {
    }
    %c0 = arith.constant 0 : index
    %c0_1 = arith.constant 0 : index
    %7 = vector.load %arg6[%c0, %c0_1] : memref<192x1xf32, #tpu.memory_space<vmem>>, vector<192x1xf32>
    %c0_2 = arith.constant 0 : index
    %8 = arith.index_cast %3 : i32 to index
    %c0_3 = arith.constant 0 : index
    %9 = vector.load %arg7[%c0_2, %8, %c0_3] : memref<1x480x128xf32, #tpu.memory_space<vmem>>, vector<1x192x128xf32>
    %10 = vector.shape_cast %9 : vector<1x192x128xf32> to vector<192x128xf32>
    %cst = arith.constant 0.000000e+00 : f32
    %11 = vector.broadcast %cst : f32 to vector<192x128xf32>
    %c0_i32_4 = arith.constant 0 : i32
    %12 = arith.addi %0, %c0_i32_4 : i32
    %c1_i32 = arith.constant 1 : i32
    %13 = arith.addi %12, %c1_i32 : i32
    %c24_i32_5 = arith.constant 24 : i32
    %14 = arith.muli %13, %c24_i32_5 : i32
    %15 = tpu.assume_multiple %14, 8 : i32
    %c-1_i32 = arith.constant -1 : i32
    %16 = arith.addi %15, %c-1_i32 : i32
    %c0_6 = arith.constant 0 : index
    %17 = arith.index_cast %16 : i32 to index
    %c0_7 = arith.constant 0 : index
    %18 = vector.load %arg2[%c0_6, %17, %c0_7] : memref<1x480x128xf32, #tpu.memory_space<vmem>>, vector<1x192x128xf32>
    %19 = vector.shape_cast %18 : vector<1x192x128xf32> to vector<192x128xf32>
    %c0_8 = arith.constant 0 : index
    %c0_9 = arith.constant 0 : index
    %c0_10 = arith.constant 0 : index
    %20 = vector.load %arg3[%c0_8, %c0_9, %c0_10] : memref<9x128x128xf32, #tpu.memory_space<vmem>>, vector<1x128x128xf32>
    %21 = vector.shape_cast %20 : vector<1x128x128xf32> to vector<128x128xf32>
    %cst_11 = arith.constant dense<0.000000e+00> : vector<192x128xf32>
    %22 = tpu.matmul %19, %21, %cst_11 {dimension_numbers = #tpu.dot_dimension_numbers<[1], [0], [0], [1], [0, 0, 1, 1], [], []>} : vector<192x128xf32>, vector<128x128xf32>, vector<192x128xf32> -> vector<192x128xf32>
    %23 = arith.addf %11, %22 : vector<192x128xf32>
    %c0_i32_12 = arith.constant 0 : i32
    %24 = arith.addi %15, %c0_i32_12 : i32
    %c0_13 = arith.constant 0 : index
    %25 = arith.index_cast %24 : i32 to index
    %c0_14 = arith.constant 0 : index
    %26 = vector.load %arg2[%c0_13, %25, %c0_14] : memref<1x480x128xf32, #tpu.memory_space<vmem>>, vector<1x192x128xf32>
    %27 = vector.shape_cast %26 : vector<1x192x128xf32> to vector<192x128xf32>
    %c1 = arith.constant 1 : index
    %c0_15 = arith.constant 0 : index
    %c0_16 = arith.constant 0 : index
    %28 = vector.load %arg3[%c1, %c0_15, %c0_16] : memref<9x128x128xf32, #tpu.memory_space<vmem>>, vector<1x128x128xf32>
    %29 = vector.shape_cast %28 : vector<1x128x128xf32> to vector<128x128xf32>
    %cst_17 = arith.constant dense<0.000000e+00> : vector<192x128xf32>
    %30 = tpu.matmul %27, %29, %cst_17 {dimension_numbers = #tpu.dot_dimension_numbers<[1], [0], [0], [1], [0, 0, 1, 1], [], []>} : vector<192x128xf32>, vector<128x128xf32>, vector<192x128xf32> -> vector<192x128xf32>
    %31 = arith.addf %23, %30 : vector<192x128xf32>
    %c1_i32_18 = arith.constant 1 : i32
    %32 = arith.addi %15, %c1_i32_18 : i32
    %c0_19 = arith.constant 0 : index
    %33 = arith.index_cast %32 : i32 to index
    %c0_20 = arith.constant 0 : index
    %34 = vector.load %arg2[%c0_19, %33, %c0_20] : memref<1x480x128xf32, #tpu.memory_space<vmem>>, vector<1x192x128xf32>
    %35 = vector.shape_cast %34 : vector<1x192x128xf32> to vector<192x128xf32>
    %c2 = arith.constant 2 : index
    %c0_21 = arith.constant 0 : index
    %c0_22 = arith.constant 0 : index
    %36 = vector.load %arg3[%c2, %c0_21, %c0_22] : memref<9x128x128xf32, #tpu.memory_space<vmem>>, vector<1x128x128xf32>
    %37 = vector.shape_cast %36 : vector<1x128x128xf32> to vector<128x128xf32>
    %cst_23 = arith.constant dense<0.000000e+00> : vector<192x128xf32>
    %38 = tpu.matmul %35, %37, %cst_23 {dimension_numbers = #tpu.dot_dimension_numbers<[1], [0], [0], [1], [0, 0, 1, 1], [], []>} : vector<192x128xf32>, vector<128x128xf32>, vector<192x128xf32> -> vector<192x128xf32>
    %39 = arith.addf %31, %38 : vector<192x128xf32>
    %c1_i32_24 = arith.constant 1 : i32
    %40 = arith.addi %0, %c1_i32_24 : i32
    %c1_i32_25 = arith.constant 1 : i32
    %41 = arith.addi %40, %c1_i32_25 : i32
    %c24_i32_26 = arith.constant 24 : i32
    %42 = arith.muli %41, %c24_i32_26 : i32
    %43 = tpu.assume_multiple %42, 8 : i32
    %c-1_i32_27 = arith.constant -1 : i32
    %44 = arith.addi %43, %c-1_i32_27 : i32
    %c0_28 = arith.constant 0 : index
    %45 = arith.index_cast %44 : i32 to index
    %c0_29 = arith.constant 0 : index
    %46 = vector.load %arg2[%c0_28, %45, %c0_29] : memref<1x480x128xf32, #tpu.memory_space<vmem>>, vector<1x192x128xf32>
    %47 = vector.shape_cast %46 : vector<1x192x128xf32> to vector<192x128xf32>
    %c3 = arith.constant 3 : index
    %c0_30 = arith.constant 0 : index
    %c0_31 = arith.constant 0 : index
    %48 = vector.load %arg3[%c3, %c0_30, %c0_31] : memref<9x128x128xf32, #tpu.memory_space<vmem>>, vector<1x128x128xf32>
    %49 = vector.shape_cast %48 : vector<1x128x128xf32> to vector<128x128xf32>
    %cst_32 = arith.constant dense<0.000000e+00> : vector<192x128xf32>
    %50 = tpu.matmul %47, %49, %cst_32 {dimension_numbers = #tpu.dot_dimension_numbers<[1], [0], [0], [1], [0, 0, 1, 1], [], []>} : vector<192x128xf32>, vector<128x128xf32>, vector<192x128xf32> -> vector<192x128xf32>
    %51 = arith.addf %39, %50 : vector<192x128xf32>
    %c0_i32_33 = arith.constant 0 : i32
    %52 = arith.addi %43, %c0_i32_33 : i32
    %c0_34 = arith.constant 0 : index
    %53 = arith.index_cast %52 : i32 to index
    %c0_35 = arith.constant 0 : index
    %54 = vector.load %arg2[%c0_34, %53, %c0_35] : memref<1x480x128xf32, #tpu.memory_space<vmem>>, vector<1x192x128xf32>
    %55 = vector.shape_cast %54 : vector<1x192x128xf32> to vector<192x128xf32>
    %c4 = arith.constant 4 : index
    %c0_36 = arith.constant 0 : index
    %c0_37 = arith.constant 0 : index
    %56 = vector.load %arg3[%c4, %c0_36, %c0_37] : memref<9x128x128xf32, #tpu.memory_space<vmem>>, vector<1x128x128xf32>
    %57 = vector.shape_cast %56 : vector<1x128x128xf32> to vector<128x128xf32>
    %cst_38 = arith.constant dense<0.000000e+00> : vector<192x128xf32>
    %58 = tpu.matmul %55, %57, %cst_38 {dimension_numbers = #tpu.dot_dimension_numbers<[1], [0], [0], [1], [0, 0, 1, 1], [], []>} : vector<192x128xf32>, vector<128x128xf32>, vector<192x128xf32> -> vector<192x128xf32>
    %59 = arith.addf %51, %58 : vector<192x128xf32>
    %c1_i32_39 = arith.constant 1 : i32
    %60 = arith.addi %43, %c1_i32_39 : i32
    %c0_40 = arith.constant 0 : index
    %61 = arith.index_cast %60 : i32 to index
    %c0_41 = arith.constant 0 : index
    %62 = vector.load %arg2[%c0_40, %61, %c0_41] : memref<1x480x128xf32, #tpu.memory_space<vmem>>, vector<1x192x128xf32>
    %63 = vector.shape_cast %62 : vector<1x192x128xf32> to vector<192x128xf32>
    %c5 = arith.constant 5 : index
    %c0_42 = arith.constant 0 : index
    %c0_43 = arith.constant 0 : index
    %64 = vector.load %arg3[%c5, %c0_42, %c0_43] : memref<9x128x128xf32, #tpu.memory_space<vmem>>, vector<1x128x128xf32>
    %65 = vector.shape_cast %64 : vector<1x128x128xf32> to vector<128x128xf32>
    %cst_44 = arith.constant dense<0.000000e+00> : vector<192x128xf32>
    %66 = tpu.matmul %63, %65, %cst_44 {dimension_numbers = #tpu.dot_dimension_numbers<[1], [0], [0], [1], [0, 0, 1, 1], [], []>} : vector<192x128xf32>, vector<128x128xf32>, vector<192x128xf32> -> vector<192x128xf32>
    %67 = arith.addf %59, %66 : vector<192x128xf32>
    %c2_i32_45 = arith.constant 2 : i32
    %68 = arith.addi %0, %c2_i32_45 : i32
    %c1_i32_46 = arith.constant 1 : i32
    %69 = arith.addi %68, %c1_i32_46 : i32
    %c24_i32_47 = arith.constant 24 : i32
    %70 = arith.muli %69, %c24_i32_47 : i32
    %71 = tpu.assume_multiple %70, 8 : i32
    %c-1_i32_48 = arith.constant -1 : i32
    %72 = arith.addi %71, %c-1_i32_48 : i32
    %c0_49 = arith.constant 0 : index
    %73 = arith.index_cast %72 : i32 to index
    %c0_50 = arith.constant 0 : index
    %74 = vector.load %arg2[%c0_49, %73, %c0_50] : memref<1x480x128xf32, #tpu.memory_space<vmem>>, vector<1x192x128xf32>
    %75 = vector.shape_cast %74 : vector<1x192x128xf32> to vector<192x128xf32>
    %c6 = arith.constant 6 : index
    %c0_51 = arith.constant 0 : index
    %c0_52 = arith.constant 0 : index
    %76 = vector.load %arg3[%c6, %c0_51, %c0_52] : memref<9x128x128xf32, #tpu.memory_space<vmem>>, vector<1x128x128xf32>
    %77 = vector.shape_cast %76 : vector<1x128x128xf32> to vector<128x128xf32>
    %cst_53 = arith.constant dense<0.000000e+00> : vector<192x128xf32>
    %78 = tpu.matmul %75, %77, %cst_53 {dimension_numbers = #tpu.dot_dimension_numbers<[1], [0], [0], [1], [0, 0, 1, 1], [], []>} : vector<192x128xf32>, vector<128x128xf32>, vector<192x128xf32> -> vector<192x128xf32>
    %79 = arith.addf %67, %78 : vector<192x128xf32>
    %c0_i32_54 = arith.constant 0 : i32
    %80 = arith.addi %71, %c0_i32_54 : i32
    %c0_55 = arith.constant 0 : index
    %81 = arith.index_cast %80 : i32 to index
    %c0_56 = arith.constant 0 : index
    %82 = vector.load %arg2[%c0_55, %81, %c0_56] : memref<1x480x128xf32, #tpu.memory_space<vmem>>, vector<1x192x128xf32>
    %83 = vector.shape_cast %82 : vector<1x192x128xf32> to vector<192x128xf32>
    %c7 = arith.constant 7 : index
    %c0_57 = arith.constant 0 : index
    %c0_58 = arith.constant 0 : index
    %84 = vector.load %arg3[%c7, %c0_57, %c0_58] : memref<9x128x128xf32, #tpu.memory_space<vmem>>, vector<1x128x128xf32>
    %85 = vector.shape_cast %84 : vector<1x128x128xf32> to vector<128x128xf32>
    %cst_59 = arith.constant dense<0.000000e+00> : vector<192x128xf32>
    %86 = tpu.matmul %83, %85, %cst_59 {dimension_numbers = #tpu.dot_dimension_numbers<[1], [0], [0], [1], [0, 0, 1, 1], [], []>} : vector<192x128xf32>, vector<128x128xf32>, vector<192x128xf32> -> vector<192x128xf32>
    %87 = arith.addf %79, %86 : vector<192x128xf32>
    %c1_i32_60 = arith.constant 1 : i32
    %88 = arith.addi %71, %c1_i32_60 : i32
    %c0_61 = arith.constant 0 : index
    %89 = arith.index_cast %88 : i32 to index
    %c0_62 = arith.constant 0 : index
    %90 = vector.load %arg2[%c0_61, %89, %c0_62] : memref<1x480x128xf32, #tpu.memory_space<vmem>>, vector<1x192x128xf32>
    %91 = vector.shape_cast %90 : vector<1x192x128xf32> to vector<192x128xf32>
    %c8 = arith.constant 8 : index
    %c0_63 = arith.constant 0 : index
    %c0_64 = arith.constant 0 : index
    %92 = vector.load %arg3[%c8, %c0_63, %c0_64] : memref<9x128x128xf32, #tpu.memory_space<vmem>>, vector<1x128x128xf32>
    %93 = vector.shape_cast %92 : vector<1x128x128xf32> to vector<128x128xf32>
    %cst_65 = arith.constant dense<0.000000e+00> : vector<192x128xf32>
    %94 = tpu.matmul %91, %93, %cst_65 {dimension_numbers = #tpu.dot_dimension_numbers<[1], [0], [0], [1], [0, 0, 1, 1], [], []>} : vector<192x128xf32>, vector<128x128xf32>, vector<192x128xf32> -> vector<192x128xf32>
    %95 = arith.addf %87, %94 : vector<192x128xf32>
    %c0_66 = arith.constant 0 : index
    %c0_67 = arith.constant 0 : index
    %96 = vector.load %arg4[%c0_66, %c0_67] : memref<1x128xf32, #tpu.memory_space<vmem>>, vector<1x128xf32>
    %97 = vector.broadcast %96 : vector<1x128xf32> to vector<192x128xf32>
    %98 = arith.mulf %95, %97 : vector<192x128xf32>
    %c0_68 = arith.constant 0 : index
    %c0_69 = arith.constant 0 : index
    %99 = vector.load %arg5[%c0_68, %c0_69] : memref<1x128xf32, #tpu.memory_space<vmem>>, vector<1x128xf32>
    %100 = vector.broadcast %99 : vector<1x128xf32> to vector<192x128xf32>
    %101 = arith.addf %98, %100 : vector<192x128xf32>
    %102 = arith.addf %101, %10 : vector<192x128xf32>
    %cst_70 = arith.constant 0.000000e+00 : f32
    %103 = vector.broadcast %cst_70 : f32 to vector<192x128xf32>
    %104 = arith.maximumf %102, %103 : vector<192x128xf32>
    %105 = vector.broadcast %7 : vector<192x1xf32> to vector<192x128xf32>
    %106 = arith.mulf %104, %105 : vector<192x128xf32>
    %c0_71 = arith.constant 0 : index
    %107 = arith.index_cast %3 : i32 to index
    %c0_72 = arith.constant 0 : index
    %108 = vector.load %arg8[%c0_71, %107, %c0_72] : memref<1x480x128xf32, #tpu.memory_space<vmem>>, vector<1x192x128xf32>
    %109 = vector.shape_cast %108 : vector<1x192x128xf32> to vector<192x128xf32>
    %110 = vector.shape_cast %106 : vector<192x128xf32> to vector<1x192x128xf32>
    tpu.vector_store %arg8[%c0_71, %107, %c0_72], %110 {strides = array<i32>} : memref<1x480x128xf32, #tpu.memory_space<vmem>>, vector<1x192x128xf32>,
    return
  }
  func.func @transform_0(%arg0: i32, %arg1: i32) -> (i32, i32, i32) {
    %c0_i32 = arith.constant 0 : i32
    %c0_i32_0 = arith.constant 0 : i32
    %c0_i32_1 = arith.constant 0 : i32
    return %arg0, %c0_i32, %c0_i32_0 : i32, i32, i32
  }
  func.func @transform_1(%arg0: i32, %arg1: i32) -> (i32, i32, i32) {
    %c0_i32 = arith.constant 0 : i32
    %c0_i32_0 = arith.constant 0 : i32
    %c0_i32_1 = arith.constant 0 : i32
    %c0_i32_2 = arith.constant 0 : i32
    return %c0_i32, %c0_i32_0, %c0_i32_1 : i32, i32, i32
  }
  func.func @transform_2(%arg0: i32, %arg1: i32) -> (i32, i32) {
    %c0_i32 = arith.constant 0 : i32
    %c0_i32_0 = arith.constant 0 : i32
    %c0_i32_1 = arith.constant 0 : i32
    return %c0_i32, %c0_i32_0 : i32, i32
  }
  func.func @transform_3(%arg0: i32, %arg1: i32) -> (i32, i32) {
    %c0_i32 = arith.constant 0 : i32
    %c0_i32_0 = arith.constant 0 : i32
    %c0_i32_1 = arith.constant 0 : i32
    return %c0_i32, %c0_i32_0 : i32, i32
  }
  func.func @transform_4(%arg0: i32, %arg1: i32) -> (i32, i32) {
    %c0_i32 = arith.constant 0 : i32
    %c0_i32_0 = arith.constant 0 : i32
    %c0_i32_1 = arith.constant 0 : i32
    return %c0_i32, %c0_i32_0 : i32, i32
  }
  func.func @transform_5(%arg0: i32, %arg1: i32) -> (i32, i32, i32) {
    %c0_i32 = arith.constant 0 : i32
    %c0_i32_0 = arith.constant 0 : i32
    %c0_i32_1 = arith.constant 0 : i32
    return %arg0, %c0_i32, %c0_i32_0 : i32, i32, i32
  }
  func.func @transform_6(%arg0: i32, %arg1: i32) -> (i32, i32, i32) {
    %c0_i32 = arith.constant 0 : i32
    %c0_i32_0 = arith.constant 0 : i32
    %c0_i32_1 = arith.constant 0 : i32
    return %arg0, %c0_i32, %c0_i32_0 : i32, i32, i32
  }
}

</mosaic_0001>

<bundles_post_ra>
// kernel: tile.13
= control target key start
LH: loop header
LB: loop body
LE: loop exit
PB: predicated region body
PF: predicated region fallthrough
CT: control target
= control target key end

     0   :  { %s22_s0 = inlined_call_operand.vmem [shape: f32[24], index: 0, kind: input, shape index: {}]   ;;  %s23_s1 = inlined_call_operand.vmem [shape: f32[8,24], index: 1, kind: output, shape index: {}]  }
   0x1   :  { %v4_v0 = vld [vmem:[%s22_s0] ss:$0 sm:$0xff] }
   0x2   :  { %5 = vst [vmem:[%s23_s1] sm:$0xff] %v4_v0 }

// kernel: tile.0
= control target key start
LH: loop header
LB: loop body
LE: loop exit
PB: predicated region body
PF: predicated region fallthrough
CT: control target
= control target key end

     0   :  { %s397_s8 = smov 127   ;;  %s398_s9 = smov 125   ;;  %vm3_vm0 = vcmask 7168   ;;  %s818_s0 = inlined_call_operand.vmem [shape: f32[8,24], index: 0, kind: input, shape index: {}]   ;;  %s819_s1 = inlined_call_operand.vmem [shape: f32[192,1], index: 1, kind: output, shape index: {}]  }
   0x1   :  { %v6_v0 = vld.sshfl [vmem:[%s818_s0] sm:$0xff pattern:$0x56741230]   ;;  %s399_s10 = smov 126   ;;  %s400_s11 = smov 124  }
   0x2   :  { %7 = vrot.lane.b32.xlu0 %v6_v0, %s397_s8  ;;  %31 = vrot.lane.b32.xlu1 %v6_v0, %s398_s9  ;;  %s401_s12 = smov 123   ;;  %s402_s13 = smov 122   ;;  %v90_v1 = vld.sshfl [vmem:[%s818_s0] sm:$0xff pattern:$0x67452301]  }
   0x3   :  { %s403_s16 = smov 121   ;;  %s404_s17 = smov 120   ;;  %v186_v2 = vld.sshfl [vmem:[%s818_s0] sm:$0xff pattern:$0x74563012]  }
   0x4   :  { %s405_s18 = smov 119   ;;  %s406_s19 = smov 118   ;;  %v2_v3 = vld [vmem:[%s818_s0] sm:$0xff]  }
   0x5   :  { %s407_s20 = smov 117   ;;  %s408_s21 = smov 116   ;;  %4 = vst.msk [vmem:[%s819_s1] ss:$24 sm:$0xf] %vm3_vm0, %v2_v3  }
   0x6   :  { %19 = vrot.lane.b32.xlu0 %v6_v0, %s399_s10  ;;  %43 = vrot.lane.b32.xlu1 %v6_v0, %s400_s11  ;;  %s409_s22 = smov 115   ;;  %s410_s23 = smov 114   ;;  %5 = vst.msk [vmem:[%s819_s1] ss:$24 sm:$0xf0] %vm3_vm0, %v2_v3  }
   0x7   :  { %s411_s26 = smov 113   ;;  %s412_s27 = smov 112  }
   0x8   :  { %s413_s4 = smov 111   ;;  %s414_s5 = smov 110  }
   0x9   :  { %s415_s6 = smov 109   ;;  %s416_s7 = smov 108  }
   0xa   :  { %55 = vrot.lane.b32.xlu0 %v6_v0, %s401_s12  ;;  %67 = vrot.lane.b32.xlu1 %v6_v0, %s402_s13  ;;  %s417_s8 = smov 107   ;;  %s418_s9 = smov 106  }
   0xb   :  { %s419_s10 = smov 105  }
   0xe   :  { %79 = vrot.lane.b32.xlu0 %v6_v0, %s403_s16  ;;  %91 = vrot.lane.b32.xlu1 %v90_v1, %s404_s17 }
  0x12   :  { %103 = vrot.lane.b32.xlu0 %v90_v1, %s405_s18  ;;  %115 = vrot.lane.b32.xlu1 %v90_v1, %s406_s19 }
  0x16   :  { %127 = vrot.lane.b32.xlu0 %v90_v1, %s407_s20  ;;  %139 = vrot.lane.b32.xlu1 %v90_v1, %s408_s21 }
  0x1a   :  { %151 = vrot.lane.b32.xlu0 %v90_v1, %s409_s22  ;;  %163 = vrot.lane.b32.xlu1 %v90_v1, %s410_s23 }
  0x1e   :  { %175 = vrot.lane.b32.xlu0 %v90_v1, %s411_s26  ;;  %187 = vrot.lane.b32.xlu1 %v186_v2, %s412_s27 }
  0x22   :  { %199 = vrot.lane.b32.xlu0 %v186_v2, %s413_s4  ;;  %211 = vrot.lane.b32.xlu1 %v186_v2, %s414_s5 }
  0x26   :  { %223 = vrot.lane.b32.xlu0 %v186_v2, %s415_s6  ;;  %235 = vrot.lane.b32.xlu1 %v186_v2, %s416_s7 }
  0x2a   :  { %247 = vrot.lane.b32.xlu0 %v186_v2, %s417_s8  ;;  %259 = vrot.lane.b32.xlu1 %v186_v2, %s418_s9 }
  0x2e   :  { %271 = vrot.lane.b32.xlu0 %v186_v2, %s419_s10 }
  0x74   :  { %v8_v4 = vpop.permute.xlu0 %7   ;;  %v32_v5 = vpop.permute.xlu1 %31  }
  0x75   :  { %282 = vst.msk [vmem:[%s819_s1 + $0x1] ss:$72 sm:$0x3] %vm3_vm0, %v8_v4   ;;  %283 = vst.msk [vmem:[%s819_s1 + $0x61] ss:$-24 sm:$0xc] %vm3_vm0, %v8_v4  }
  0x76   :  { %284 = vst.msk [vmem:[%s819_s1 - $0xbf] ss:$72 sm:$0x30] %vm3_vm0, %v8_v4   ;;  %285 = vst.msk [vmem:[%s819_s1 + $0x121] ss:$-24 sm:$0xc0] %vm3_vm0, %v8_v4  }
  0x77   :  { %290 = vst.msk [vmem:[%s819_s1 + $0x3] ss:$72 sm:$0x3] %vm3_vm0, %v32_v5   ;;  %291 = vst.msk [vmem:[%s819_s1 + $0x63] ss:$-24 sm:$0xc] %vm3_vm0, %v32_v5  }
  0x78   :  { %292 = vst.msk [vmem:[%s819_s1 - $0xbd] ss:$72 sm:$0x30] %vm3_vm0, %v32_v5   ;;  %293 = vst.msk [vmem:[%s819_s1 + $0x123] ss:$-24 sm:$0xc0] %vm3_vm0, %v32_v5   ;;  %v20_v6 = vpop.permute.xlu0 %19   ;;  %v44_v7 = vpop.permute.xlu1 %43  }
  0x79   :  { %286 = vst.msk [vmem:[%s819_s1 + $0x2] ss:$72 sm:$0x3] %vm3_vm0, %v20_v6   ;;  %287 = vst.msk [vmem:[%s819_s1 + $0x62] ss:$-24 sm:$0xc] %vm3_vm0, %v20_v6  }
  0x7a   :  { %288 = vst.msk [vmem:[%s819_s1 - $0xbe] ss:$72 sm:$0x30] %vm3_vm0, %v20_v6   ;;  %289 = vst.msk [vmem:[%s819_s1 + $0x122] ss:$-24 sm:$0xc0] %vm3_vm0, %v20_v6  }
  0x7b   :  { %294 = vst.msk [vmem:[%s819_s1 + $0x4] ss:$72 sm:$0x3] %vm3_vm0, %v44_v7   ;;  %295 = vst.msk [vmem:[%s819_s1 + $0x64] ss:$-24 sm:$0xc] %vm3_vm0, %v44_v7  }
  0x7c   :  { %296 = vst.msk [vmem:[%s819_s1 - $0xbc] ss:$72 sm:$0x30] %vm3_vm0, %v44_v7   ;;  %297 = vst.msk [vmem:[%s819_s1 + $0x124] ss:$-24 sm:$0xc0] %vm3_vm0, %v44_v7   ;;  %v56_v8 = vpop.permute.xlu0 %55   ;;  %v68_v9 = vpop.permute.xlu1 %67  }
  0x7d   :  { %298 = vst.msk [vmem:[%s819_s1 + $0x5] ss:$72 sm:$0x3] %vm3_vm0, %v56_v8   ;;  %299 = vst.msk [vmem:[%s819_s1 + $0x65] ss:$-24 sm:$0xc] %vm3_vm0, %v56_v8  }
  0x7e   :  { %300 = vst.msk [vmem:[%s819_s1 - $0xbb] ss:$72 sm:$0x30] %vm3_vm0, %v56_v8   ;;  %301 = vst.msk [vmem:[%s819_s1 + $0x125] ss:$-24 sm:$0xc0] %vm3_vm0, %v56_v8  }
  0x7f   :  { %302 = vst.msk [vmem:[%s819_s1 + $0x6] ss:$72 sm:$0x3] %vm3_vm0, %v68_v9   ;;  %303 = vst.msk [vmem:[%s819_s1 + $0x66] ss:$-24 sm:$0xc] %vm3_vm0, %v68_v9  }
  0x80   :  { %304 = vst.msk [vmem:[%s819_s1 - $0xba] ss:$72 sm:$0x30] %vm3_vm0, %v68_v9   ;;  %305 = vst.msk [vmem:[%s819_s1 + $0x126] ss:$-24 sm:$0xc0] %vm3_vm0, %v68_v9   ;;  %v80_v10 = vpop.permute.xlu0 %79   ;;  %v92_v11 = vpop.permute.xlu1 %91  }
  0x81   :  { %306 = vst.msk [vmem:[%s819_s1 + $0x7] ss:$72 sm:$0x3] %vm3_vm0, %v80_v10   ;;  %307 = vst.msk [vmem:[%s819_s1 + $0x67] ss:$-24 sm:$0xc] %vm3_vm0, %v80_v10  }
  0x82   :  { %308 = vst.msk [vmem:[%s819_s1 - $0xb9] ss:$72 sm:$0x30] %vm3_vm0, %v80_v10   ;;  %309 = vst.msk [vmem:[%s819_s1 + $0x127] ss:$-24 sm:$0xc0] %vm3_vm0, %v80_v10  }
  0x83   :  { %310 = vst.msk [vmem:[%s819_s1 + $0x20] ss:$-24 sm:$0x3] %vm3_vm0, %v92_v11   ;;  %311 = vst.msk [vmem:[%s819_s1 + $0x80] ss:$-24 sm:$0xc] %vm3_vm0, %v92_v11  }
  0x84   :  { %312 = vst.msk [vmem:[%s819_s1 + $0xe0] ss:$-24 sm:$0x30] %vm3_vm0, %v92_v11   ;;  %313 = vst.msk [vmem:[%s819_s1 + $0x140] ss:$-24 sm:$0xc0] %vm3_vm0, %v92_v11   ;;  %v104_v12 = vpop.permute.xlu0 %103   ;;  %v116_v13 = vpop.permute.xlu1 %115  }
  0x85   :  { %314 = vst.msk [vmem:[%s819_s1 + $0x21] ss:$-24 sm:$0x3] %vm3_vm0, %v104_v12   ;;  %315 = vst.msk [vmem:[%s819_s1 + $0x81] ss:$-24 sm:$0xc] %vm3_vm0, %v104_v12  }
  0x86   :  { %316 = vst.msk [vmem:[%s819_s1 + $0xe1] ss:$-24 sm:$0x30] %vm3_vm0, %v104_v12   ;;  %317 = vst.msk [vmem:[%s819_s1 + $0x141] ss:$-24 sm:$0xc0] %vm3_vm0, %v104_v12  }
  0x87   :  { %318 = vst.msk [vmem:[%s819_s1 + $0x22] ss:$-24 sm:$0x3] %vm3_vm0, %v116_v13   ;;  %319 = vst.msk [vmem:[%s819_s1 + $0x82] ss:$-24 sm:$0xc] %vm3_vm0, %v116_v13  }
  0x88   :  { %320 = vst.msk [vmem:[%s819_s1 + $0xe2] ss:$-24 sm:$0x30] %vm3_vm0, %v116_v13   ;;  %321 = vst.msk [vmem:[%s819_s1 + $0x142] ss:$-24 sm:$0xc0] %vm3_vm0, %v116_v13   ;;  %v128_v14 = vpop.permute.xlu0 %127   ;;  %v140_v15 = vpop.permute.xlu1 %139  }
  0x89   :  { %322 = vst.msk [vmem:[%s819_s1 + $0x23] ss:$-24 sm:$0x3] %vm3_vm0, %v128_v14   ;;  %323 = vst.msk [vmem:[%s819_s1 + $0x83] ss:$-24 sm:$0xc] %vm3_vm0, %v128_v14  }
  0x8a   :  { %324 = vst.msk [vmem:[%s819_s1 + $0xe3] ss:$-24 sm:$0x30] %vm3_vm0, %v128_v14   ;;  %325 = vst.msk [vmem:[%s819_s1 + $0x143] ss:$-24 sm:$0xc0] %vm3_vm0, %v128_v14  }
  0x8b   :  { %326 = vst.msk [vmem:[%s819_s1 + $0x24] ss:$-24 sm:$0x3] %vm3_vm0, %v140_v15   ;;  %327 = vst.msk [vmem:[%s819_s1 + $0x84] ss:$-24 sm:$0xc] %vm3_vm0, %v140_v15  }
  0x8c   :  { %328 = vst.msk [vmem:[%s819_s1 + $0xe4] ss:$-24 sm:$0x30] %vm3_vm0, %v140_v15   ;;  %329 = vst.msk [vmem:[%s819_s1 + $0x144] ss:$-24 sm:$0xc0] %vm3_vm0, %v140_v15   ;;  %v152_v16 = vpop.permute.xlu0 %151   ;;  %v164_v17 = vpop.permute.xlu1 %163  }
  0x8d   :  { %330 = vst.msk [vmem:[%s819_s1 + $0x25] ss:$-24 sm:$0x3] %vm3_vm0, %v152_v16   ;;  %331 = vst.msk [vmem:[%s819_s1 + $0x85] ss:$-24 sm:$0xc] %vm3_vm0, %v152_v16  }
  0x8e   :  { %332 = vst.msk [vmem:[%s819_s1 + $0xe5] ss:$-24 sm:$0x30] %vm3_vm0, %v152_v16   ;;  %333 = vst.msk [vmem:[%s819_s1 + $0x145] ss:$-24 sm:$0xc0] %vm3_vm0, %v152_v16  }
  0x8f   :  { %334 = vst.msk [vmem:[%s819_s1 + $0x26] ss:$-24 sm:$0x3] %vm3_vm0, %v164_v17   ;;  %335 = vst.msk [vmem:[%s819_s1 + $0x86] ss:$-24 sm:$0xc] %vm3_vm0, %v164_v17  }
  0x90   :  { %336 = vst.msk [vmem:[%s819_s1 + $0xe6] ss:$-24 sm:$0x30] %vm3_vm0, %v164_v17   ;;  %337 = vst.msk [vmem:[%s819_s1 + $0x146] ss:$-24 sm:$0xc0] %vm3_vm0, %v164_v17   ;;  %v176_v18 = vpop.permute.xlu0 %175   ;;  %v188_v19 = vpop.permute.xlu1 %187  }
  0x91   :  { %338 = vst.msk [vmem:[%s819_s1 + $0x27] ss:$-24 sm:$0x3] %vm3_vm0, %v176_v18   ;;  %339 = vst.msk [vmem:[%s819_s1 + $0x87] ss:$-24 sm:$0xc] %vm3_vm0, %v176_v18  }
  0x92   :  { %340 = vst.msk [vmem:[%s819_s1 + $0xe7] ss:$-24 sm:$0x30] %vm3_vm0, %v176_v18   ;;  %341 = vst.msk [vmem:[%s819_s1 + $0x147] ss:$-24 sm:$0xc0] %vm3_vm0, %v176_v18  }
  0x93   :  { %342 = vst.msk [vmem:[%s819_s1 + $0x40] ss:$-24 sm:$0x7] %vm3_vm0, %v188_v19   ;;  %343 = vst.msk [vmem:[%s819_s1 - $0x80] ss:$72 sm:$0x18] %vm3_vm0, %v188_v19  }
  0x94   :  { %344 = vst.msk [vmem:[%s819_s1 + $0x100] ss:$-24 sm:$0x60] %vm3_vm0, %v188_v19   ;;  %345 = vst.msk [vmem:[%s819_s1 + $0xb1] sm:$0x80] %vm3_vm0, %v188_v19   ;;  %v200_v20 = vpop.permute.xlu0 %199   ;;  %v212_v21 = vpop.permute.xlu1 %211  }
  0x95   :  { %346 = vst.msk [vmem:[%s819_s1 + $0x41] ss:$-24 sm:$0x7] %vm3_vm0, %v200_v20   ;;  %347 = vst.msk [vmem:[%s819_s1 - $0x7f] ss:$72 sm:$0x18] %vm3_vm0, %v200_v20  }
  0x96   :  { %348 = vst.msk [vmem:[%s819_s1 + $0x101] ss:$-24 sm:$0x60] %vm3_vm0, %v200_v20   ;;  %349 = vst.msk [vmem:[%s819_s1 + $0xb2] sm:$0x80] %vm3_vm0, %v200_v20  }
  0x97   :  { %350 = vst.msk [vmem:[%s819_s1 + $0x42] ss:$-24 sm:$0x7] %vm3_vm0, %v212_v21   ;;  %351 = vst.msk [vmem:[%s819_s1 - $0x7e] ss:$72 sm:$0x18] %vm3_vm0, %v212_v21  }
  0x98   :  { %352 = vst.msk [vmem:[%s819_s1 + $0x102] ss:$-24 sm:$0x60] %vm3_vm0, %v212_v21   ;;  %353 = vst.msk [vmem:[%s819_s1 + $0xb3] sm:$0x80] %vm3_vm0, %v212_v21   ;;  %v224_v22 = vpop.permute.xlu0 %223   ;;  %v236_v23 = vpop.permute.xlu1 %235  }
  0x99   :  { %354 = vst.msk [vmem:[%s819_s1 + $0x43] ss:$-24 sm:$0x7] %vm3_vm0, %v224_v22   ;;  %355 = vst.msk [vmem:[%s819_s1 - $0x7d] ss:$72 sm:$0x18] %vm3_vm0, %v224_v22  }
  0x9a   :  { %356 = vst.msk [vmem:[%s819_s1 + $0x103] ss:$-24 sm:$0x60] %vm3_vm0, %v224_v22   ;;  %357 = vst.msk [vmem:[%s819_s1 + $0xb4] sm:$0x80] %vm3_vm0, %v224_v22  }
  0x9b   :  { %358 = vst.msk [vmem:[%s819_s1 + $0x44] ss:$-24 sm:$0x7] %vm3_vm0, %v236_v23   ;;  %359 = vst.msk [vmem:[%s819_s1 - $0x7c] ss:$72 sm:$0x18] %vm3_vm0, %v236_v23  }
  0x9c   :  { %360 = vst.msk [vmem:[%s819_s1 + $0x104] ss:$-24 sm:$0x60] %vm3_vm0, %v236_v23   ;;  %361 = vst.msk [vmem:[%s819_s1 + $0xb5] sm:$0x80] %vm3_vm0, %v236_v23   ;;  %v248_v24 = vpop.permute.xlu0 %247   ;;  %v260_v25 = vpop.permute.xlu1 %259  }
  0x9d   :  { %362 = vst.msk [vmem:[%s819_s1 + $0x45] ss:$-24 sm:$0x7] %vm3_vm0, %v248_v24   ;;  %363 = vst.msk [vmem:[%s819_s1 - $0x7b] ss:$72 sm:$0x18] %vm3_vm0, %v248_v24  }
  0x9e   :  { %364 = vst.msk [vmem:[%s819_s1 + $0x105] ss:$-24 sm:$0x60] %vm3_vm0, %v248_v24   ;;  %365 = vst.msk [vmem:[%s819_s1 + $0xb6] sm:$0x80] %vm3_vm0, %v248_v24  }
  0x9f   :  { %366 = vst.msk [vmem:[%s819_s1 + $0x46] ss:$-24 sm:$0x7] %vm3_vm0, %v260_v25   ;;  %367 = vst.msk [vmem:[%s819_s1 - $0x7a] ss:$72 sm:$0x18] %vm3_vm0, %v260_v25  }
  0xa0   :  { %368 = vst.msk [vmem:[%s819_s1 + $0x106] ss:$-24 sm:$0x60] %vm3_vm0, %v260_v25   ;;  %369 = vst.msk [vmem:[%s819_s1 + $0xb7] sm:$0x80] %vm3_vm0, %v260_v25   ;;  %v272_v26 = vpop.permute.xlu0 %271  }
  0xa1   :  { %370 = vst.msk [vmem:[%s819_s1 + $0x47] ss:$-24 sm:$0x7] %vm3_vm0, %v272_v26   ;;  %371 = vst.msk [vmem:[%s819_s1 - $0x79] ss:$72 sm:$0x18] %vm3_vm0, %v272_v26  }
  0xa2   :  { %372 = vst.msk [vmem:[%s819_s1 + $0x107] ss:$-24 sm:$0x60] %vm3_vm0, %v272_v26   ;;  %373 = vst.msk [vmem:[%s819_s1 + $0xb8] sm:$0x80] %vm3_vm0, %v272_v26  }

// kernel: basic_block_forward.3
= control target key start
LH: loop header
LB: loop body
LE: loop exit
PB: predicated region body
PF: predicated region fallthrough
CT: control target
= control target key end

     0   :  { %s4990_s21 = smov 0   ;;  %s4992_s22 = smov 0   ;;  %s6227_s0 = inlined_call_operand.vmem [shape: f32[2,480,128], index: 0, kind: input, shape index: {}]   ;;  %s6228_s1 = inlined_call_operand.vmem [shape: f32[9,128,128], index: 1, kind: input, shape index: {}]   ;;  %s6229_s2 = inlined_call_operand.vmem [shape: f32[1,128], index: 2, kind: input, shape index: {}]   ;;  %s6230_s3 = inlined_call_operand.vmem [shape: f32[1,128], index: 3, kind: input, shape index: {}]   ;;  %s6231_s4 = inlined_call_operand.vmem [shape: f32[192,1], index: 4, kind: input, shape index: {}]   ;;  %s6232_s5 = inlined_call_operand.vmem [shape: f32[2,480,128], index: 5, kind: input, shape index: {}]   ;;  %s6233_s6 = inlined_call_operand.vmem [shape: f32[2,480,128], index: 6, kind: output, shape index: {}]  }
   0x1   :  { %s4994_s23 = smov 0   ;;  %s4996_s24 = smov 0  }
   0x2   :  { %s4998_s25 = smov 0  }
   0x3 LB: > { %s25_s26 = sadd.s32 1, %s4943_s23  ;;  %s28_s27 = sadd.s32 1, %s4947_s24  ;;  %s4951_s25 = sphi %s4998_s25, %s16_s25   ;;  %s4947_s24 = sphi %s4996_s24, %s6285_s24   ;;  %s4943_s23 = sphi %s4994_s23, %s6284_s23   ;;  %s4939_s22 = sphi %s4992_s22, %s6283_s22   ;;  %s4935_s21 = sphi %s4990_s21, %s6282_s21  }
   0x4   : > { %p26_p0 = scmp.ge.s32.totalorder %s25_s26, 2  ;;  %p2977_p1 = scmp.ge.s32.totalorder %s4951_s25, 1 }
   0x5   : > { %p234_p2 = scmp.lt.s32.totalorder %s4951_s25, 5 }
   0x6   : > { %s6287_s26 = smov (%p26_p0, %s25_s26), 0  ;;  %s6289_s27 = smov (!%p26_p0, %s28_s27), %s4947_s24 }
   0x7   : > { %p235_p3 = pnand %p2977_p1, %p234_p2  ;;  %p30_p4 = scmp.ge.s32.totalorder %s6289_s27, 2 }
   0x9   : > { %s6291_s27 = smov (%p30_p4, %s6289_s27), 0  ;;  %238 = sbr.rel (%p235_p3) target bundleno = 512 (0x200), region = 44 }
  0x10   : > { %p269_p5 = scmp.lt.s32.totalorder %s4939_s22, 1  ;;  %p2981_p6 = scmp.ne.s32.totalorder %s4935_s21, 0 }
  0x11   : > { %v4953_v0 = vmov (!%p2981_p6), 0.0  }
  0x12   : > { %s6293_s22 = smov (!%p269_p5, %s4939_s22), 1  ;;  %290 = sbr.rel (%p2981_p6) target bundleno = 29 (0x1d), region = 48 }
  0x13   : > { %s5022_s28 = smul.u32 480, %s6293_s22 }
  0x15   : > { %s273_s7 = scalar_lea.vmem %s6227_s0, %s5022_s28  ;;  %s278_s10 = scalar_lea.vmem %s6232_s5, %s5022_s28 }
  0x16   : > { %s5036_s13 = scalar_lea.vmem %s6233_s6, %s5022_s28 }
  0x17   : > { %291 = vst [vmem:[%s5036_s13] sm:$0xff] (!%p2981_p6), %v4953_v0  ;;  %292 = vst [vmem:[%s5036_s13 + $0x8] sm:$0xff] (!%p2981_p6), %v4953_v0 }
  0x18   : > { %293 = vst [vmem:[%s5036_s13 + $0x10] sm:$0xff] (!%p2981_p6), %v4953_v0  ;;  %294 = vst [vmem:[%s5036_s13 + $0x18] sm:$0xff] (!%p2981_p6), %v4953_v0 }
  0x19   : > { %295 = vst [vmem:[%s5036_s13 + $0x20] sm:$0xff] %v4953_v0  ;;  %296 = vst [vmem:[%s5036_s13 + $0x28] sm:$0xff] %v4953_v0 }
  0x1a   : > { %297 = vst [vmem:[%s5036_s13 + $0x1b0] sm:$0xff] %v4953_v0  ;;  %298 = vst [vmem:[%s5036_s13 + $0x1b8] sm:$0xff] %v4953_v0 }
  0x1b   : > { %299 = vst [vmem:[%s5036_s13 + $0x1c0] sm:$0xff] %v4953_v0  ;;  %300 = vst [vmem:[%s5036_s13 + $0x1c8] sm:$0xff] %v4953_v0 }
  0x1c   : > { %301 = vst [vmem:[%s5036_s13 + $0x1d0] sm:$0xff] %v4953_v0  ;;  %302 = vst [vmem:[%s5036_s13 + $0x1d8] sm:$0xff] %v4953_v0 }
  0x1d PF: > { %v3060_v1 = vld [vmem:[%s6228_s1 + $0x80] sm:$0xff]  ;;  %v3061_v2 = vld [vmem:[%s6228_s1 + $0x88] sm:$0xff]  ;;  %v3062_v6 = vld [vmem:[%s6228_s1 + $0x90] sm:$0xff]  ;;  %s5088_s8 = smul.u32 192, %s4935_s21 }
  0x1e   : > { %v3186_v3 = vld [vmem:[%s6228_s1 + $0x200] sm:$0xff]  ;;  %v4372_v4 = vpack.c.bf16 %v3061_v2, %v3060_v1  ;;  %v3187_v5 = vld [vmem:[%s6228_s1 + $0x208] sm:$0xff]  ;;  %v3063_v7 = vld [vmem:[%s6228_s1 + $0x98] sm:$0xff] }
  0x1f   : > { %v4500_v8 = vpack.c.bf16 %v3187_v5, %v3186_v3  ;;  %v4376_v9 = vpack.c.bf16 %v3063_v7, %v3062_v6  ;;  %v3188_v10 = vld [vmem:[%s6228_s1 + $0x210] sm:$0xff]  ;;  %v3189_v11 = vld [vmem:[%s6228_s1 + $0x218] sm:$0xff]  ;;  %v3064_v12 = vld [vmem:[%s6228_s1 + $0xa0] sm:$0xff]  ;;  %s5108_s20 = scalar_lea.vmem %s273_s7, %s5088_s8  ;;  %s6071_s19 = scalar_lea.vmem %s278_s10, %s5088_s8 }
  0x20   : > { %4373 = vmatprep.subr.bf16.mxu1 %v4372_v4  ;;  %v4504_v13 = vpack.c.bf16 %v3189_v11, %v3188_v10  ;;  %v3065_v14 = vld [vmem:[%s6228_s1 + $0xa8] sm:$0xff]  ;;  %v3190_v15 = vld [vmem:[%s6228_s1 + $0x220] sm:$0xff]  ;;  %v3066_v19 = vld [vmem:[%s6228_s1 + $0xb0] sm:$0xff]  ;;  %s6106_s28 = scalar_lea.vmem %s5036_s13, %s5088_s8 }
  0x21   : > { %v3191_v16 = vld [vmem:[%s6228_s1 + $0x228] sm:$0xff]  ;;  %4501 = vmatprep.subr.bf16.mxu0 %v4500_v8  ;;  %4375 = vmatpush3.bf16.msra.mxu1 %v4372_v4  ;;  %v4380_v17 = vpack.c.bf16 %v3065_v14, %v3064_v12  ;;  %v3067_v20 = vld [vmem:[%s6228_s1 + $0xb8] sm:$0xff]  ;;  %v3192_v21 = vld [vmem:[%s6228_s1 + $0x230] sm:$0xff] }
  0x22   : > { %4503 = vmatpush3.bf16.msra.mxu0 %v4500_v8  ;;  %4377 = vmatprep.subr.bf16.mxu1 %v4376_v9  ;;  %v4508_v18 = vpack.c.bf16 %v3191_v16, %v3190_v15  ;;  %v3193_v22 = vld [vmem:[%s6228_s1 + $0x238] sm:$0xff]  ;;  %v4384_v23 = vpack.c.bf16 %v3067_v20, %v3066_v19  ;;  %v3068_v25 = vld [vmem:[%s6228_s1 + $0xc0] sm:$0xff]  ;;  %v3069_v26 = vld [vmem:[%s6228_s1 + $0xc8] sm:$0xff] }
  0x23   : > { %4505 = vmatprep.subr.bf16.mxu0 %v4504_v13  ;;  %v4512_v24 = vpack.c.bf16 %v3193_v22, %v3192_v21  ;;  %v3036_v27 = vld [vmem:[%s5108_s20 + $0x18] sm:$0xff]  ;;  %v3194_v28 = vld [vmem:[%s6228_s1 + $0x240] sm:$0xff]  ;;  %v3195_v29 = vld [vmem:[%s6228_s1 + $0x248] sm:$0xff]  ;;  %v4388_v31 = vpack.c.bf16 %v3069_v26, %v3068_v25 }
  0x24   : > { %3792 = vmatprep.mubr.f32.mxu1 %v3036_v27  ;;  %v5124_v30 = vld [vmem:[%s5108_s20 + $0x30] sm:$0xff]  ;;  %v4516_v32 = vpack.c.bf16 %v3195_v29, %v3194_v28  ;;  %v3071_v34 = vld [vmem:[%s6228_s1 + $0xd8] sm:$0xff]  ;;  %v3072_v39 = vld [vmem:[%s6228_s1 + $0xe0] sm:$0xff] }
  0x25   : > { %4379 = vmatpush3.bf16.msra.mxu1 %v4376_v9  ;;  %4064 = vmatprep.mubr.f32.mxu0 %v5124_v30  ;;  %v3070_v33 = vld [vmem:[%s6228_s1 + $0xd0] sm:$0xff]  ;;  %v3197_v36 = vld [vmem:[%s6228_s1 + $0x258] sm:$0xff]  ;;  %v3073_v40 = vld [vmem:[%s6228_s1 + $0xe8] sm:$0xff] }
  0x26   : > { %4507 = vmatpush3.bf16.msra.mxu0 %v4504_v13  ;;  %4381 = vmatprep.subr.bf16.mxu1 %v4380_v17  ;;  %v3196_v35 = vld [vmem:[%s6228_s1 + $0x250] sm:$0xff]  ;;  %v4392_v37 = vpack.c.bf16 %v3071_v34, %v3070_v33  ;;  %v3198_v41 = vld [vmem:[%s6228_s1 + $0x260] sm:$0xff]  ;;  %v3199_v42 = vld [vmem:[%s6228_s1 + $0x268] sm:$0xff]  ;;  %v4396_v43 = vpack.c.bf16 %v3073_v40, %v3072_v39 }
  0x27   : > { %4509 = vmatprep.subr.bf16.mxu0 %v4508_v18  ;;  %v4520_v38 = vpack.c.bf16 %v3197_v36, %v3196_v35  ;;  %v4524_v44 = vpack.c.bf16 %v3199_v42, %v3198_v41  ;;  %v3074_v45 = vld [vmem:[%s6228_s1 + $0xf0] sm:$0xff]  ;;  %v3075_v46 = vld [vmem:[%s6228_s1 + $0xf8] sm:$0xff]  ;;  %v380_v51 = vld [vmem:[%s6228_s1] sm:$0xff] }
  0x28   : > { %v3200_v47 = vld [vmem:[%s6228_s1 + $0x270] sm:$0xff]  ;;  %v3201_v48 = vld [vmem:[%s6228_s1 + $0x278] sm:$0xff]  ;;  %v4400_v49 = vpack.c.bf16 %v3075_v46, %v3074_v45  ;;  %v381_v52 = vld [vmem:[%s6228_s1 + $0x8] sm:$0xff] }
  0x29   : > { %4383 = vmatpush3.bf16.msra.mxu1 %v4380_v17  ;;  %v4528_v50 = vpack.c.bf16 %v3201_v48, %v3200_v47  ;;  %v3228_v53 = vld [vmem:[%s6228_s1 + $0x280] sm:$0xff]  ;;  %v3229_v54 = vld [vmem:[%s6228_s1 + $0x288] sm:$0xff]  ;;  %v4404_v55 = vpack.c.bf16 %v381_v52, %v380_v51  ;;  %v382_v57 = vld [vmem:[%s6228_s1 + $0x10] sm:$0xff] }
  0x2a   : > { %4511 = vmatpush3.bf16.msra.mxu0 %v4508_v18  ;;  %4385 = vmatprep.subr.bf16.mxu1 %v4384_v23  ;;  %v4532_v56 = vpack.c.bf16 %v3229_v54, %v3228_v53  ;;  %v383_v58 = vld [vmem:[%s6228_s1 + $0x18] sm:$0xff]  ;;  %v3037_v59 = vld [vmem:[%s5108_s20 + $0x20] sm:$0xff]  ;;  %v3230_v60 = vld [vmem:[%s6228_s1 + $0x290] sm:$0xff] }
  0x2b   : > { %4513 = vmatprep.subr.bf16.mxu0 %v4512_v24  ;;  %v3231_v61 = vld [vmem:[%s6228_s1 + $0x298] sm:$0xff]  ;;  %v3038_v63 = vld [vmem:[%s5108_s20 + $0x28] sm:$0xff]  ;;  %v4408_v0 = vpack.c.bf16 %v383_v58, %v382_v57  ;;  %v3164_v1 = vld [vmem:[%s5108_s20 + $0x40] sm:$0xff] }
  0x2c   : > { %v3163_v62 = vld [vmem:[%s5108_s20 + $0x38] sm:$0xff]  ;;  %v4536_v2 = vpack.c.bf16 %v3231_v61, %v3230_v60  ;;  %v384_v3 = vld [vmem:[%s6228_s1 + $0x20] sm:$0xff]  ;;  %v385_v4 = vld [vmem:[%s6228_s1 + $0x28] sm:$0xff] }
  0x2d   : > { %4387 = vmatpush3.bf16.msra.mxu1 %v4384_v23  ;;  %v3232_v5 = vld [vmem:[%s6228_s1 + $0x2a0] sm:$0xff]  ;;  %v3233_v6 = vld [vmem:[%s6228_s1 + $0x2a8] sm:$0xff]  ;;  %v5207_v8 = vld [vmem:[%s5108_s20 + $0x50] sm:$0xff]  ;;  %v4412_v9 = vpack.c.bf16 %v385_v4, %v384_v3 }
  0x2e   : > { %4515 = vmatpush3.bf16.msra.mxu0 %v4512_v24  ;;  %4389 = vmatprep.subr.bf16.mxu1 %v4388_v31  ;;  %v5204_v7 = vld [vmem:[%s5108_s20 + $0x48] sm:$0xff]  ;;  %v4540_v10 = vpack.c.bf16 %v3233_v6, %v3232_v5  ;;  %v386_v11 = vld [vmem:[%s6228_s1 + $0x30] sm:$0xff]  ;;  %v387_v12 = vld [vmem:[%s6228_s1 + $0x38] sm:$0xff] }
  0x2f   : > { %4517 = vmatprep.subr.bf16.mxu0 %v4516_v32  ;;  %v3234_v13 = vld [vmem:[%s6228_s1 + $0x2b0] sm:$0xff]  ;;  %v3235_v14 = vld [vmem:[%s6228_s1 + $0x2b8] sm:$0xff]  ;;  %v5228_v16 = vld [vmem:[%s5108_s20 + $0x60] sm:$0xff]  ;;  %v4416_v17 = vpack.c.bf16 %v387_v12, %v386_v11 }
  0x30   : > { %v5225_v15 = vld [vmem:[%s5108_s20 + $0x58] sm:$0xff]  ;;  %v4544_v18 = vpack.c.bf16 %v3235_v14, %v3234_v13  ;;  %v388_v19 = vld [vmem:[%s6228_s1 + $0x40] sm:$0xff]  ;;  %v389_v20 = vld [vmem:[%s6228_s1 + $0x48] sm:$0xff] }
  0x31   : > { %4391 = vmatpush3.bf16.msra.mxu1 %v4388_v31  ;;  %v3236_v21 = vld [vmem:[%s6228_s1 + $0x2c0] sm:$0xff]  ;;  %v3237_v22 = vld [vmem:[%s6228_s1 + $0x2c8] sm:$0xff]  ;;  %v5249_v24 = vld [vmem:[%s5108_s20 + $0x70] sm:$0xff]  ;;  %v4420_v25 = vpack.c.bf16 %v389_v20, %v388_v19 }
  0x32   : > { %4519 = vmatpush3.bf16.msra.mxu0 %v4516_v32  ;;  %4393 = vmatprep.subr.bf16.mxu1 %v4392_v37  ;;  %v5246_v23 = vld [vmem:[%s5108_s20 + $0x68] sm:$0xff]  ;;  %v4548_v26 = vpack.c.bf16 %v3237_v22, %v3236_v21  ;;  %v390_v27 = vld [vmem:[%s6228_s1 + $0x50] sm:$0xff]  ;;  %v391_v28 = vld [vmem:[%s6228_s1 + $0x58] sm:$0xff] }
  0x33   : > { %4521 = vmatprep.subr.bf16.mxu0 %v4520_v38  ;;  %v3238_v29 = vld [vmem:[%s6228_s1 + $0x2d0] sm:$0xff]  ;;  %v5268_v31 = vld [vmem:[%s5108_s20 + $0x78] sm:$0xff]  ;;  %v5271_v32 = vld [vmem:[%s5108_s20 + $0x80] sm:$0xff]  ;;  %v4424_v33 = vpack.c.bf16 %v391_v28, %v390_v27 }
  0x34   : > { %v392_v35 = vld [vmem:[%s6228_s1 + $0x60] sm:$0xff]  ;;  %v393_v36 = vld [vmem:[%s6228_s1 + $0x68] sm:$0xff]  ;;  %v5293_v40 = vld [vmem:[%s5108_s20 + $0x90] sm:$0xff] }
  0x35   : > { %4395 = vmatpush3.bf16.msra.mxu1 %v4392_v37  ;;  %v3240_v37 = vld [vmem:[%s6228_s1 + $0x2e0] sm:$0xff]  ;;  %v5290_v39 = vld [vmem:[%s5108_s20 + $0x88] sm:$0xff]  ;;  %6251 = vst [vmem:[#allocation3_spill] sm:$0xff] %v5293_v40  ;;  %v4428_v41 = vpack.c.bf16 %v393_v36, %v392_v35  ;;  %v3242_v45 = vld [vmem:[%s6228_s1 + $0x2f0] sm:$0xff] }
  0x36   : > { %4523 = vmatpush3.bf16.msra.mxu0 %v4520_v38  ;;  %4397 = vmatprep.subr.bf16.mxu1 %v4396_v43  ;;  %v3241_v38 = vld [vmem:[%s6228_s1 + $0x2e8] sm:$0xff]  ;;  %6250 = vst [vmem:[#allocation2_spill] sm:$0xff] %v5290_v39  ;;  %v3243_v46 = vld [vmem:[%s6228_s1 + $0x2f8] sm:$0xff]  ;;  %v5315_v48 = vld [vmem:[%s5108_s20 + $0xa0] sm:$0xff] }
  0x37   : > { %4525 = vmatprep.subr.bf16.mxu0 %v4524_v44  ;;  %v4556_v42 = vpack.c.bf16 %v3241_v38, %v3240_v37  ;;  %v5312_v47 = vld [vmem:[%s5108_s20 + $0x98] sm:$0xff]  ;;  %6253 = vst [vmem:[#allocation5_spill] sm:$0xff] %v5315_v48  ;;  %v3102_v51 = vld [vmem:[%s6228_s1 + $0x100] sm:$0xff]  ;;  %v3103_v52 = vld [vmem:[%s6228_s1 + $0x108] sm:$0xff] }
  0x38   : > { %6252 = vst [vmem:[#allocation4_spill] sm:$0xff] %v5312_v47  ;;  %v3270_v53 = vld [vmem:[%s6228_s1 + $0x300] sm:$0xff]  ;;  %v3271_v54 = vld [vmem:[%s6228_s1 + $0x308] sm:$0xff]  ;;  %v4436_v57 = vpack.c.bf16 %v3103_v52, %v3102_v51  ;;  %v5378_v3 = vld [vmem:[%s5108_s20 + $0x31] sm:$0xff] }
  0x39   : > { %4399 = vmatpush3.bf16.msra.mxu1 %v4396_v43  ;;  %v394_v43 = vld [vmem:[%s6228_s1 + $0x70] sm:$0xff]  ;;  %v4564_v58 = vpack.c.bf16 %v3271_v54, %v3270_v53  ;;  %v5347_v60 = vld [vmem:[%s5108_s20 + $0xc0] sm:$0xff]  ;;  %v5354_v61 = vld [vmem:[%s5108_s20 + $0xc8] sm:$0xff] }
  0x3a   : > { %4527 = vmatpush3.bf16.msra.mxu0 %v4524_v44  ;;  %4401 = vmatprep.subr.bf16.mxu1 %v4400_v49  ;;  %v395_v44 = vld [vmem:[%s6228_s1 + $0x78] sm:$0xff]  ;;  %6257 = vst [vmem:[#allocation9_spill] sm:$0xff] %v5347_v60  ;;  %6258 = vst [vmem:[#allocation10_spill] sm:$0xff] %v5354_v61  ;;  %v3104_v4 = vld [vmem:[%s6228_s1 + $0x110] sm:$0xff] }
  0x3b   : > { %4529 = vmatprep.subr.bf16.mxu0 %v4528_v50  ;;  %v3105_v5 = vld [vmem:[%s6228_s1 + $0x118] sm:$0xff]  ;;  %v3012_v12 = vld [vmem:[%s5108_s20 + $0x27] sm:$0xff]  ;;  %v5411_v20 = vld [vmem:[%s5108_s20 + $0x2f] sm:$0xff] }
  0x3c   : > { %v3011_v6 = vld [vmem:[%s5108_s20 + $0x1f] sm:$0xff]  ;;  %v4440_v13 = vpack.c.bf16 %v3105_v5, %v3104_v4  ;;  %v3107_v19 = vld [vmem:[%s6228_s1 + $0x128] sm:$0xff]  ;;  %v5427_v27 = vld [vmem:[%s5108_s20 + $0x51] sm:$0xff] }
  0x3d   : > { %4403 = vmatpush3.bf16.msra.mxu1 %v4400_v49  ;;  %v4432_v49 = vpack.c.bf16 %v395_v44, %v394_v43  ;;  %v5397_v11 = vld [vmem:[%s5108_s20 + $0x39] sm:$0xff]  ;;  %v5401_v14 = vld [vmem:[%s5108_s20 + $0x41] sm:$0xff]  ;;  %v3276_v35 = vld [vmem:[%s6228_s1 + $0x330] sm:$0xff] }
  0x3e   : > { %4531 = vmatpush3.bf16.msra.mxu0 %v4528_v50  ;;  %4405 = vmatprep.subr.bf16.mxu1 %v4404_v55  ;;  %v4560_v50 = vpack.c.bf16 %v3243_v46, %v3242_v45  ;;  %v3274_v21 = vld [vmem:[%s6228_s1 + $0x320] sm:$0xff]  ;;  %v3275_v22 = vld [vmem:[%s6228_s1 + $0x328] sm:$0xff]  ;;  %v3277_v36 = vld [vmem:[%s6228_s1 + $0x338] sm:$0xff] }
  0x3f   : > { %4533 = vmatprep.subr.bf16.mxu0 %v4532_v56  ;;  %v5449_v37 = vld [vmem:[%s5108_s20 + $0x59] sm:$0xff]  ;;  %v5452_v38 = vld [vmem:[%s5108_s20 + $0x47] sm:$0xff]  ;;  %v4576_v43 = vpack.c.bf16 %v3277_v36, %v3276_v35  ;;  %v5467_v46 = vld [vmem:[%s5108_s20 + $0x4f] sm:$0xff] }
  0x40   : > { %3793 = vmatmul.mubr.f32.vlgmr.msra.gmra.mrb[0].mxu1 %v3037_v59  ;;  %v5344_v59 = vld [vmem:[%s5108_s20 + $0xb8] sm:$0xff]  ;;  %v3110_v44 = vld [vmem:[%s6228_s1 + $0x140] sm:$0xff]  ;;  %v3111_v45 = vld [vmem:[%s6228_s1 + $0x148] sm:$0xff] }
  0x41   : > { %4065 = vmatmul.mubr.f32.vlgmr.msra.gmra.mrb[0].mxu0 %v3163_v62  ;;  %4407 = vmatpush3.bf16.msra.mxu1 %v4404_v55  ;;  %v5334_v55 = vld [vmem:[%s5108_s20 + $0xa8] sm:$0xff]  ;;  %6256 = vst [vmem:[#allocation8_spill] sm:$0xff] %v5344_v59  ;;  %v5480_v52 = vld [vmem:[%s5108_s20 + $0x57] sm:$0xff]  ;;  %v4452_v54 = vpack.c.bf16 %v3111_v45, %v3110_v44  ;;  %v5495_v4 = vld [vmem:[%s5108_s20 + $0x5f] sm:$0xff] }
  0x42   : > { %4535 = vmatpush3.bf16.msra.mxu0 %v4532_v56  ;;  %3795 = vmatprep.mubr.f32.mxu1 %v3038_v63  ;;  %6254 = vst [vmem:[#allocation6_spill] sm:$0xff] %v5334_v55  ;;  %v5337_v56 = vld [vmem:[%s5108_s20 + $0xb0] sm:$0xff]  ;;  %v5364_v63 = vld [vmem:[%s5108_s20 + $0xd8] sm:$0xff] }
  0x43   : > { %4067 = vmatprep.mubr.f32.mxu0 %v3164_v1  ;;  %4409 = vmatprep.subr.bf16.mxu1 %v4408_v0  ;;  %6255 = vst [vmem:[#allocation7_spill] sm:$0xff] %v5337_v56  ;;  %6260 = vst [vmem:[#allocation12_spill] sm:$0xff] %v5364_v63  ;;  %v5477_v51 = vld [vmem:[%s5108_s20 + $0x69] sm:$0xff]  ;;  %v5483_v53 = vld [vmem:[%s5108_s20 + $0x71] sm:$0xff] }
  0x44   : > { %3796 = vmatmul.mubr.f32.gmra.mrb[2].mxu1 %v5124_v30  ;;  %4537 = vmatprep.subr.bf16.mxu0 %v4536_v2  ;;  %v3239_v30 = vld [vmem:[%s6228_s1 + $0x2d8] sm:$0xff]  ;;  %v3280_v5 = vld [vmem:[%s6228_s1 + $0x350] sm:$0xff] }
  0x45   : > { %4068 = vmatmul.mubr.f32.gmra.mrb[2].mxu0 %v5204_v7  ;;  %3798 = vmatprep.mubr.f32.mxu1 %v3163_v62  ;;  %v4552_v34 = vpack.c.bf16 %v3239_v30, %v3238_v29  ;;  %v5357_v62 = vld [vmem:[%s5108_s20 + $0xd0] sm:$0xff]  ;;  %v4572_v29 = vpack.c.bf16 %v3275_v22, %v3274_v21  ;;  %v3282_v22 = vld [vmem:[%s6228_s1 + $0x360] sm:$0xff] }
  0x46   : > { %4411 = vmatpush3.bf16.msra.mxu1 %v4408_v0  ;;  %4070 = vmatprep.mubr.f32.mxu0 %v5207_v8  ;;  %6259 = vst [vmem:[#allocation11_spill] sm:$0xff] %v5357_v62  ;;  %v5367_v0 = vld [vmem:[%s5108_s20 + $0xe0] sm:$0xff]  ;;  %v3108_v30 = vld [vmem:[%s6228_s1 + $0x130] sm:$0xff] }
  0x47   : > { %4539 = vmatpush3.bf16.msra.mxu0 %v4536_v2  ;;  %4413 = vmatprep.subr.bf16.mxu1 %v4412_v9  ;;  %6261 = vst [vmem:[#allocation13_spill] sm:$0xff] %v5367_v0  ;;  %v3010_v2 = vld [vmem:[%s5108_s20 + $0x17] sm:$0xff]  ;;  %v5523_v21 = vld [vmem:[%s5108_s20 + $0x6f] sm:$0xff]  ;;  %v5551_v44 = vld [vmem:[%s5108_s20 + $0x7f] sm:$0xff] }
  0x48   : > { %3799 = vmatmul.mubr.f32.gmra.mrb[4].mxu1 %v3164_v1  ;;  %4541 = vmatprep.subr.bf16.mxu0 %v4540_v10  ;;  %v5374_v1 = vld [vmem:[%s5108_s20 + $0xe8] sm:$0xff]  ;;  %v3284_v45 = vld [vmem:[%s6228_s1 + $0x370] sm:$0xff] }
  0x49   : > { %4071 = vmatmul.mubr.f32.gmra.mrb[4].mxu0 %v5225_v15  ;;  %3801 = vmatprep.mubr.f32.mxu1 %v5204_v7  ;;  %6262 = vst [vmem:[#allocation14_spill] sm:$0xff] %v5374_v1 }
  0x4a   : > { %4073 = vmatprep.mubr.f32.mxu0 %v5228_v16  ;;  %4415 = vmatpush3.bf16.msra.mxu1 %v4412_v9  ;;  %v3272_v9 = vld [vmem:[%s6228_s1 + $0x310] sm:$0xff] }
  0x4b   : > { %4543 = vmatpush3.bf16.msra.mxu0 %v4540_v10  ;;  %4417 = vmatprep.subr.bf16.mxu1 %v4416_v17  ;;  %v3273_v10 = vld [vmem:[%s6228_s1 + $0x318] sm:$0xff] }
  0x4c   : > { %3802 = vmatmul.mubr.f32.gmra.mrb[6].mxu1 %v5207_v8  ;;  %4545 = vmatprep.subr.bf16.mxu0 %v4544_v18 }
  0x4d   : > { %4074 = vmatmul.mubr.f32.gmra.mrb[6].mxu0 %v5246_v23  ;;  %3804 = vmatprep.mubr.f32.mxu1 %v5225_v15 }
  0x4e   : > { %4076 = vmatprep.mubr.f32.mxu0 %v5249_v24  ;;  %4419 = vmatpush3.bf16.msra.mxu1 %v4416_v17  ;;  %v4568_v17 = vpack.c.bf16 %v3273_v10, %v3272_v9  ;;  %v5505_v9 = vld [vmem:[%s5108_s20 + $0x79] sm:$0xff]  ;;  %v5508_v10 = vld [vmem:[%s5108_s20 + $0x67] sm:$0xff] }
  0x4f   : > { %4547 = vmatpush3.bf16.msra.mxu0 %v4544_v18  ;;  %4421 = vmatprep.subr.bf16.mxu1 %v4420_v25  ;;  %v3106_v18 = vld [vmem:[%s6228_s1 + $0x120] sm:$0xff] }
  0x50   : > { %3805 = vmatmul.mubr.f32.gmra.mrb[8].mxu1 %v5228_v16  ;;  %4549 = vmatprep.subr.bf16.mxu0 %v4548_v26  ;;  %v4444_v28 = vpack.c.bf16 %v3107_v19, %v3106_v18  ;;  %v3114_v18 = vld [vmem:[%s6228_s1 + $0x160] sm:$0xff]  ;;  %v3115_v19 = vld [vmem:[%s6228_s1 + $0x168] sm:$0xff] }
  0x51   : > { %4077 = vmatmul.mubr.f32.gmra.mrb[8].mxu0 %v5268_v31  ;;  %3807 = vmatprep.mubr.f32.mxu1 %v5246_v23  ;;  %v4460_v35 = vpack.c.bf16 %v3115_v19, %v3114_v18  ;;  %v3313_v18 = vld [vmem:[%s6228_s1 + $0x388] sm:$0xff] }
  0x52   : > { %4079 = vmatprep.mubr.f32.mxu0 %v5271_v32  ;;  %4423 = vmatpush3.bf16.msra.mxu1 %v4420_v25  ;;  %v5420_v25 = vld [vmem:[%s5108_s20 + $0x49] sm:$0xff] }
  0x53   : > { %4551 = vmatpush3.bf16.msra.mxu0 %v4548_v26  ;;  %4425 = vmatprep.subr.bf16.mxu1 %v4424_v33  ;;  %v5423_v26 = vld [vmem:[%s5108_s20 + $0x37] sm:$0xff]  ;;  %v5589_v19 = vld [vmem:[%s5108_s20 + $0xa9] sm:$0xff] }
  0x54   : > { %3808 = vmatmul.mubr.f32.gmra.mrb[10].mxu1 %v5249_v24  ;;  %4553 = vmatprep.subr.bf16.mxu0 %v4552_v34 }
  0x55   : > { %4080 = vmatmul.mubr.f32.gmra.mrb[10].mxu0 %v5290_v39  ;;  %3810 = vmatprep.mubr.f32.mxu1 %v5268_v31 }
  0x56   : > { %4082 = vmatprep.mubr.f32.mxu0 %v5293_v40  ;;  %4427 = vmatpush3.bf16.msra.mxu1 %v4424_v33  ;;  %v3109_v33 = vld [vmem:[%s6228_s1 + $0x138] sm:$0xff] }
  0x57   : > { %4555 = vmatpush3.bf16.msra.mxu0 %v4552_v34  ;;  %4429 = vmatprep.subr.bf16.mxu1 %v4428_v41  ;;  %v5439_v34 = vld [vmem:[%s5108_s20 + $0x3f] sm:$0xff] }
  0x58   : > { %3811 = vmatmul.mubr.f32.gmra.mrb[12].mxu1 %v5271_v32  ;;  %4557 = vmatprep.subr.bf16.mxu0 %v4556_v42 }
  0x59   : > { %4083 = vmatmul.mubr.f32.gmra.mrb[12].mxu0 %v5312_v47  ;;  %3813 = vmatprep.mubr.f32.mxu1 %v5290_v39  ;;  %v3149_v39 = vld [vmem:[%s6228_s1 + $0x1a8] sm:$0xff] }
  0x5a   : > { %4085 = vmatprep.mubr.f32.mxu0 %v5315_v48  ;;  %4431 = vmatpush3.bf16.msra.mxu1 %v4428_v41  ;;  %v5455_v41 = vld [vmem:[%s5108_s20 + $0x61] sm:$0xff] }
  0x5b   : > { %4559 = vmatpush3.bf16.msra.mxu0 %v4556_v42  ;;  %4433 = vmatprep.subr.bf16.mxu1 %v4432_v49  ;;  %v4448_v42 = vpack.c.bf16 %v3109_v33, %v3108_v30  ;;  %v5536_v30 = vld [vmem:[%s5108_s20 + $0x77] sm:$0xff] }
  0x5c   : > { %3814 = vmatmul.mubr.f32.gmra.mrb[14].mxu1 %v5293_v40  ;;  %4561 = vmatprep.subr.bf16.mxu0 %v4560_v50  ;;  %v5539_v33 = vld [vmem:[%s5108_s20 + $0x91] sm:$0xff] }
  0x5d   : > { %4086 = vmatmul.mubr.f32.gmra.mrb[14].mxu0 %v5334_v55  ;;  %3816 = vmatprep.mubr.f32.mxu1 %v5312_v47  ;;  %v307_v47 = vld [vmem:[%s6231_s4 + $0x20] sm:$0xff] }
  0x5e   : > { %4088 = vmatprep.mubr.f32.mxu0 %v5337_v56  ;;  %4435 = vmatpush3.bf16.msra.mxu1 %v4432_v49  ;;  %v3278_v49 = vld [vmem:[%s6228_s1 + $0x340] sm:$0xff] }
  0x5f   : > { %4563 = vmatpush3.bf16.msra.mxu0 %v4560_v50  ;;  %4437 = vmatprep.subr.bf16.mxu1 %v4436_v57  ;;  %v3279_v50 = vld [vmem:[%s6228_s1 + $0x348] sm:$0xff] }
  0x60   : > { %3817 = vmatmul.mubr.f32.gmra.mrb[16].mxu1 %v5315_v48  ;;  %4565 = vmatprep.subr.bf16.mxu0 %v4564_v58  ;;  %v3315_v48 = vld [vmem:[%s6228_s1 + $0x398] sm:$0xff] }
  0x61   : > { %4089 = vmatmul.mubr.f32.gmra.mrb[16].mxu0 %v5344_v59  ;;  %3819 = vmatprep.mubr.f32.mxu1 %v5334_v55  ;;  %v3147_v55 = vld [vmem:[%s6228_s1 + $0x198] sm:$0xff] }
  0x62   : > { %4091 = vmatprep.mubr.f32.mxu0 %v5347_v60 }
  0x64   : > { %3820 = vmatmul.mubr.f32.gmra.mrb[18].mxu1 %v5337_v56  ;;  %v304_v56 = vld [vmem:[%s6231_s4 + $0x8] sm:$0xff] }
  0x65   : > { %4092 = vmatmul.mubr.f32.gmra.mrb[18].mxu0 %v5354_v61  ;;  %3822 = vmatprep.mubr.f32.mxu1 %v5344_v59  ;;  %v5664_v59 = vld [vmem:[%s5108_s20 + $0xcf] sm:$0xff] }
  0x66   : > { %4094 = vmatprep.mubr.f32.mxu0 %v5357_v62 }
  0x68   : > { %3823 = vmatmul.mubr.f32.gmra.mrb[20].mxu1 %v5347_v60  ;;  %v306_v60 = vld [vmem:[%s6231_s4 + $0x18] sm:$0xff] }
  0x69   : > { %4095 = vmatmul.mubr.f32.gmra.mrb[20].mxu0 %v5364_v63  ;;  %3825 = vmatprep.mubr.f32.mxu1 %v5354_v61  ;;  %v5652_v63 = vld [vmem:[%s5108_s20 + $0xc7] sm:$0xff] }
  0x6a   : > { %4097 = vmatprep.mubr.f32.mxu0 %v5367_v0  ;;  %v5649_v0 = vld [vmem:[%s5108_s20 + $0xd9] sm:$0xff]  ;;  %v5655_v61 = vld [vmem:[%s5108_s20 + $0xe1] sm:$0xff] }
  0x6b   : > { %6263 = vst [vmem:[#allocation15_spill] sm:$0xff] %v5649_v0  ;;  %6264 = vst [vmem:[#allocation16_spill] sm:$0xff] %v5655_v61 }
  0x6c   : > { %3826 = vmatmul.mubr.f32.gmra.mrb[22].mxu1 %v5357_v62  ;;  %v4954_v62 = vmov 0  }
  0x6d   : > { %4098 = vmatmul.mubr.f32.gmra.mrb[22].mxu0 %v5374_v1  ;;  %3860 = vmatprep.mubr.f32.mxu1 %v3010_v2  ;;  %v3113_v2 = vld [vmem:[%s6228_s1 + $0x158] sm:$0xff]  ;;  %v303_v1 = vld [vmem:[%s6231_s4] sm:$0xff] }
  0x6e   : > { %4132 = vmatprep.mubr.f32.mxu0 %v5378_v3  ;;  %4912 = vset.pattern.permute.xlu1 %v4954_v62 }
  0x6f   : > { %4911 = vset.pattern.permute.xlu0 %v4954_v62  ;;  %v5671_v62 = vld [vmem:[%s5108_s20 + $0xe9] sm:$0xff] }
  0x70   : > { %3861 = vmatmul.mubr.f32.vlgmr.msra.gmra.mrb[0].mxu1 %v3011_v6  ;;  %v3281_v6 = vld [vmem:[%s6228_s1 + $0x358] sm:$0xff]  ;;  %2684 = vperm.xlu0 %4911, %v303_v1   ;;  %6265 = vst [vmem:[#allocation17_spill] sm:$0xff] %v5671_v62 }
  0x71   : > { %4133 = vmatmul.mubr.f32.vlgmr.msra.gmra.mrb[0].mxu0 %v5397_v11  ;;  %4439 = vmatpush3.bf16.msra.mxu1 %v4436_v57  ;;  %v4580_v57 = vpack.c.bf16 %v3279_v50, %v3278_v49  ;;  %v3285_v49 = vld [vmem:[%s6228_s1 + $0x378] sm:$0xff] }
  0x72   : > { %4567 = vmatpush3.bf16.msra.mxu0 %v4564_v58  ;;  %3863 = vmatprep.mubr.f32.mxu1 %v3012_v12  ;;  %v3112_v58 = vld [vmem:[%s6228_s1 + $0x150] sm:$0xff]  ;;  %v5511_v12 = vld [vmem:[%s5108_s20 + $0x81] sm:$0xff]  ;;  %v5561_v50 = vld [vmem:[%s5108_s20 + $0x99] sm:$0xff] }
  0x73   : > { %4135 = vmatprep.mubr.f32.mxu0 %v5401_v14  ;;  %4441 = vmatprep.subr.bf16.mxu1 %v4440_v13  ;;  %v3078_v1 = vld [vmem:[%s5108_s20 + $0x19] sm:$0xff] }
  0x74   : > { %3864 = vmatmul.mubr.f32.gmra.mrb[2].mxu1 %v5411_v20  ;;  %4569 = vmatprep.subr.bf16.mxu0 %v4568_v17 }
  0x75   : > { %4136 = vmatmul.mubr.f32.gmra.mrb[2].mxu0 %v5420_v25  ;;  %3866 = vmatprep.mubr.f32.mxu1 %v5423_v26 }
  0x76   : > { %4443 = vmatpush3.bf16.msra.mxu1 %v4440_v13  ;;  %4138 = vmatprep.mubr.f32.mxu0 %v5427_v27  ;;  %v4456_v13 = vpack.c.bf16 %v3113_v2, %v3112_v58  ;;  %v4592_v2 = vpack.c.bf16 %v3285_v49, %v3284_v45  ;;  %v5605_v45 = vld [vmem:[%s5108_s20 + $0x9f] sm:$0xff] }
  0x77   : > { %4571 = vmatpush3.bf16.msra.mxu0 %v4568_v17  ;;  %4445 = vmatprep.subr.bf16.mxu1 %v4444_v28  ;;  %v4584_v17 = vpack.c.bf16 %v3281_v6, %v3280_v5  ;;  %v3144_v5 = vld [vmem:[%s6228_s1 + $0x180] sm:$0xff]  ;;  %v3145_v6 = vld [vmem:[%s6228_s1 + $0x188] sm:$0xff] }
  0x78   : > { %3867 = vmatmul.mubr.f32.gmra.mrb[4].mxu1 %v5439_v34  ;;  %4573 = vmatprep.subr.bf16.mxu0 %v4572_v29  ;;  %v5615_v49 = vld [vmem:[%s5108_s20 + $0xc1] sm:$0xff] }
  0x79   : > { %4139 = vmatmul.mubr.f32.gmra.mrb[4].mxu0 %v5449_v37  ;;  %3869 = vmatprep.mubr.f32.mxu1 %v5452_v38 }
  0x7a   : > { %4141 = vmatprep.mubr.f32.mxu0 %v5455_v41  ;;  %4447 = vmatpush3.bf16.msra.mxu1 %v4444_v28  ;;  %v3283_v28 = vld [vmem:[%s6228_s1 + $0x368] sm:$0xff] }
  0x7b   : > { %4575 = vmatpush3.bf16.msra.mxu0 %v4572_v29  ;;  %4449 = vmatprep.subr.bf16.mxu1 %v4448_v42  ;;  %v5533_v29 = vld [vmem:[%s5108_s20 + $0x89] sm:$0xff]  ;;  %v4588_v36 = vpack.c.bf16 %v3283_v28, %v3282_v22  ;;  %v5592_v22 = vld [vmem:[%s5108_s20 + $0x97] sm:$0xff] }
  0x7c   : > { %3870 = vmatmul.mubr.f32.gmra.mrb[6].mxu1 %v5467_v46  ;;  %4577 = vmatprep.subr.bf16.mxu0 %v4576_v43  ;;  %v5595_v28 = vld [vmem:[%s5108_s20 + $0xb1] sm:$0xff] }
  0x7d   : > { %4142 = vmatmul.mubr.f32.gmra.mrb[6].mxu0 %v5477_v51  ;;  %3872 = vmatprep.mubr.f32.mxu1 %v5480_v52 }
  0x7e   : > { %4144 = vmatprep.mubr.f32.mxu0 %v5483_v53  ;;  %4451 = vmatpush3.bf16.msra.mxu1 %v4448_v42  ;;  %v3116_v42 = vld [vmem:[%s6228_s1 + $0x170] sm:$0xff] }
  0x7f   : > { %4579 = vmatpush3.bf16.msra.mxu0 %v4576_v43  ;;  %4453 = vmatprep.subr.bf16.mxu1 %v4452_v54  ;;  %v3117_v43 = vld [vmem:[%s6228_s1 + $0x178] sm:$0xff] }
  0x80   : > { %3873 = vmatmul.mubr.f32.gmra.mrb[8].mxu1 %v5495_v4  ;;  %4581 = vmatprep.subr.bf16.mxu0 %v4580_v57  ;;  %v4464_v58 = vpack.c.bf16 %v3117_v43, %v3116_v42  ;;  %v5597_v42 = vpack.c.bf16 %v3145_v6, %v3144_v5  ;;  %v5623_v5 = vld [vmem:[%s5108_s20 + $0xaf] sm:$0xff] }
  0x81   : > { %4145 = vmatmul.mubr.f32.gmra.mrb[8].mxu0 %v5505_v9  ;;  %3875 = vmatprep.mubr.f32.mxu1 %v5508_v10  ;;  %v5633_v6 = vld [vmem:[%s5108_s20 + $0xd1] sm:$0xff] }
  0x82   : > { %4147 = vmatprep.mubr.f32.mxu0 %v5511_v12  ;;  %4455 = vmatpush3.bf16.msra.mxu1 %v4452_v54  ;;  %v5564_v54 = vld [vmem:[%s5108_s20 + $0x87] sm:$0xff] }
  0x83   : > { %4583 = vmatpush3.bf16.msra.mxu0 %v4580_v57  ;;  %4457 = vmatprep.subr.bf16.mxu1 %v4456_v13  ;;  %v5567_v57 = vld [vmem:[%s5108_s20 + $0xa1] sm:$0xff] }
  0x84   : > { %3876 = vmatmul.mubr.f32.gmra.mrb[10].mxu1 %v5523_v21  ;;  %4585 = vmatprep.subr.bf16.mxu0 %v4584_v17 }
  0x85   : > { %4148 = vmatmul.mubr.f32.gmra.mrb[10].mxu0 %v5533_v29  ;;  %3878 = vmatprep.mubr.f32.mxu1 %v5536_v30 }
  0x86   : > { %4150 = vmatprep.mubr.f32.mxu0 %v5539_v33  ;;  %4459 = vmatpush3.bf16.msra.mxu1 %v4456_v13  ;;  %v5579_v13 = vld [vmem:[%s5108_s20 + $0x8f] sm:$0xff] }
  0x87   : > { %4587 = vmatpush3.bf16.msra.mxu0 %v4584_v17  ;;  %4461 = vmatprep.subr.bf16.mxu1 %v4460_v35  ;;  %v3312_v17 = vld [vmem:[%s6228_s1 + $0x380] sm:$0xff] }
  0x88   : > { %3879 = vmatmul.mubr.f32.gmra.mrb[12].mxu1 %v5551_v44  ;;  %4589 = vmatprep.subr.bf16.mxu0 %v4588_v36  ;;  %v5600_v43 = vpack.c.bf16 %v3313_v18, %v3312_v17  ;;  %v5639_v17 = vld [vmem:[%s5108_s20 + $0xbf] sm:$0xff]  ;;  %v305_v18 = vld [vmem:[%s6231_s4 + $0x10] sm:$0xff] }
  0x89   : > { %4151 = vmatmul.mubr.f32.gmra.mrb[12].mxu0 %v5561_v50  ;;  %3881 = vmatprep.mubr.f32.mxu1 %v5564_v54 }
  0x8a   : > { %4153 = vmatprep.mubr.f32.mxu0 %v5567_v57  ;;  %4463 = vmatpush3.bf16.msra.mxu1 %v4460_v35  ;;  %v5609_v35 = vld [vmem:[%s5108_s20 + $0xb9] sm:$0xff] }
  0x8b   : > { %4591 = vmatpush3.bf16.msra.mxu0 %v4588_v36  ;;  %4465 = vmatprep.subr.bf16.mxu1 %v4464_v58  ;;  %v5612_v36 = vld [vmem:[%s5108_s20 + $0xa7] sm:$0xff] }
  0x8c   : > { %3882 = vmatmul.mubr.f32.gmra.mrb[14].mxu1 %v5579_v13  ;;  %4593 = vmatprep.subr.bf16.mxu0 %v4592_v2 }
  0x8d   : > { %4154 = vmatmul.mubr.f32.gmra.mrb[14].mxu0 %v5589_v19  ;;  %3884 = vmatprep.mubr.f32.mxu1 %v5592_v22 }
  0x8e   : > { %4156 = vmatprep.mubr.f32.mxu0 %v5595_v28  ;;  %4467 = vmatpush3.bf16.msra.mxu1 %v4464_v58  ;;  %v5627_v58 = vld [vmem:[%s5108_s20 + $0xc9] sm:$0xff] }
  0x8f   : > { %4595 = vmatpush3.bf16.msra.mxu0 %v4592_v2  ;;  %4469 = vmatprep.subr.bf16.mxu1 %v5597_v42  ;;  %v5630_v2 = vld [vmem:[%s5108_s20 + $0xb7] sm:$0xff] }
  0x90   : > { %3885 = vmatmul.mubr.f32.gmra.mrb[16].mxu1 %v5605_v45  ;;  %4597 = vmatprep.subr.bf16.mxu0 %v5600_v43 }
  0x91   : > { %4157 = vmatmul.mubr.f32.gmra.mrb[16].mxu0 %v5609_v35  ;;  %3887 = vmatprep.mubr.f32.mxu1 %v5612_v36 }
  0x92   : > { %4159 = vmatprep.mubr.f32.mxu0 %v5615_v49  ;;  %2694 = vperm.xlu1 %4912, %v305_v18   ;;  %v3079_v18 = vld [vmem:[%s5108_s20 + $0x21] sm:$0xff] }
  0x93   : > { %2689 = vperm.xlu0 %4911, %v304_v56   ;;  %v3080_v56 = vld [vmem:[%s5108_s20 + $0x29] sm:$0xff] }
  0x94   : > { %3888 = vmatmul.mubr.f32.gmra.mrb[18].mxu1 %v5623_v5 }
  0x95   : > { %4160 = vmatmul.mubr.f32.gmra.mrb[18].mxu0 %v5627_v58  ;;  %3890 = vmatprep.mubr.f32.mxu1 %v5630_v2 }
  0x96   : > { %4162 = vmatprep.mubr.f32.mxu0 %v5633_v6  ;;  %2699 = vperm.xlu1 %4912, %v306_v60   ;;  %v3314_v60 = vld [vmem:[%s6228_s1 + $0x390] sm:$0xff] }
  0x97   : > { %2704 = vperm.xlu0 %4911, %v307_v47  }
  0x98   : > { %3891 = vmatmul.mubr.f32.gmra.mrb[20].mxu1 %v5639_v17 }
  0x99   : > { %4163 = vmatmul.mubr.f32.gmra.mrb[20].mxu0 %v5649_v0  ;;  %3893 = vmatprep.mubr.f32.mxu1 %v5652_v63  ;;  %v3146_v0 = vld [vmem:[%s6228_s1 + $0x190] sm:$0xff] }
  0x9a   : > { %4165 = vmatprep.mubr.f32.mxu0 %v5655_v61  ;;  %v308_v61 = vld [vmem:[%s6231_s4 + $0x28] sm:$0xff]  ;;  %v4472_v40 = vpack.c.bf16 %v3147_v55, %v3146_v0  ;;  %v3316_v55 = vld [vmem:[%s6228_s1 + $0x3a0] sm:$0xff]  ;;  %v3150_v0 = vld [vmem:[%s6228_s1 + $0x1b0] sm:$0xff] }
  0x9b   : > { %2709 = vperm.xlu1 %4912, %v308_v61  }
  0x9c   : > { %3894 = vmatmul.mubr.f32.gmra.mrb[22].mxu1 %v5664_v59 }
  0x9d   : > { %4166 = vmatmul.mubr.f32.gmra.mrb[22].mxu0 %v5671_v62  ;;  %3928 = vmatprep.mubr.f32.mxu1 %v3078_v1  ;;  %v4600_v62 = vpack.c.bf16 %v3315_v48, %v3314_v60  ;;  %v3148_v1 = vld [vmem:[%s6228_s1 + $0x1a0] sm:$0xff]  ;;  %v3317_v48 = vld [vmem:[%s6228_s1 + $0x3a8] sm:$0xff] }
  0x9e   : > { %4200 = vmatprep.mubr.f32.mxu0 %v5452_v38  ;;  %v4476_v61 = vpack.c.bf16 %v3149_v39, %v3148_v1  ;;  %v4604_v47 = vpack.c.bf16 %v3317_v48, %v3316_v55  ;;  %v3318_v39 = vld [vmem:[%s6228_s1 + $0x3b0] sm:$0xff]  ;;  %v3153_v60 = vld [vmem:[%s6228_s1 + $0x1c8] sm:$0xff]  ;;  %v3155_v55 = vld [vmem:[%s6228_s1 + $0x1d8] sm:$0xff] }
  0x9f   : > { %v3154_v1 = vld [vmem:[%s6228_s1 + $0x1d0] sm:$0xff] }
  0xa0   : > { %3929 = vmatmul.mubr.f32.vlgmr.msra.gmra.mrb[0].mxu1 %v3079_v18  ;;  %v3322_v48 = vld [vmem:[%s6228_s1 + $0x3d0] sm:$0xff] }
  0xa1   : > { %4201 = vmatmul.mubr.f32.vlgmr.msra.gmra.mrb[0].mxu0 %v5467_v46  ;;  %4471 = vmatpush3.bf16.msra.mxu1 %v5597_v42  ;;  %v3151_v42 = vld [vmem:[%s6228_s1 + $0x1b8] sm:$0xff] }
  0xa2   : > { %4599 = vmatpush3.bf16.msra.mxu0 %v5600_v43  ;;  %3931 = vmatprep.mubr.f32.mxu1 %v3080_v56  ;;  %v4480_v43 = vpack.c.bf16 %v3151_v42, %v3150_v0  ;;  %v3156_v42 = vld [vmem:[%s6228_s1 + $0x1e0] sm:$0xff] }
  0xa3   : > { %4203 = vmatprep.mubr.f32.mxu0 %v5480_v52  ;;  %4473 = vmatprep.subr.bf16.mxu1 %v4472_v40 }
  0xa4   : > { %3932 = vmatmul.mubr.f32.gmra.mrb[2].mxu1 %v5378_v3  ;;  %4601 = vmatprep.subr.bf16.mxu0 %v4600_v62  ;;  %v3319_v3 = vld [vmem:[%s6228_s1 + $0x3b8] sm:$0xff] }
  0xa5   : > { %4204 = vmatmul.mubr.f32.gmra.mrb[2].mxu0 %v5495_v4  ;;  %3934 = vmatprep.mubr.f32.mxu1 %v5397_v11  ;;  %v4608_v18 = vpack.c.bf16 %v3319_v3, %v3318_v39  ;;  %v3152_v11 = vld [vmem:[%s6228_s1 + $0x1c0] sm:$0xff]  ;;  %v3157_v39 = vld [vmem:[%s6228_s1 + $0x1e8] sm:$0xff] }
  0xa6   : > { %4475 = vmatpush3.bf16.msra.mxu1 %v4472_v40  ;;  %4206 = vmatprep.mubr.f32.mxu0 %v5508_v10  ;;  %v3320_v40 = vld [vmem:[%s6228_s1 + $0x3c0] sm:$0xff] }
  0xa7   : > { %4603 = vmatpush3.bf16.msra.mxu0 %v4600_v62  ;;  %4477 = vmatprep.subr.bf16.mxu1 %v4476_v61  ;;  %v4484_v62 = vpack.c.bf16 %v3153_v60, %v3152_v11  ;;  %v3324_v3 = vld [vmem:[%s6228_s1 + $0x3e0] sm:$0xff]  ;;  %v3158_v60 = vld [vmem:[%s6228_s1 + $0x1f0] sm:$0xff] }
  0xa8   : > { %3935 = vmatmul.mubr.f32.gmra.mrb[4].mxu1 %v5401_v14  ;;  %4605 = vmatprep.subr.bf16.mxu0 %v4604_v47  ;;  %v3321_v14 = vld [vmem:[%s6228_s1 + $0x3c8] sm:$0xff] }
  0xa9   : > { %4207 = vmatmul.mubr.f32.gmra.mrb[4].mxu0 %v5523_v21  ;;  %3937 = vmatprep.mubr.f32.mxu1 %v5420_v25  ;;  %v4612_v56 = vpack.c.bf16 %v3321_v14, %v3320_v40  ;;  %v3159_v40 = vld [vmem:[%s6228_s1 + $0x1f8] sm:$0xff]  ;;  %v3326_v14 = vld [vmem:[%s6228_s1 + $0x3f0] sm:$0xff] }
  0xaa   : > { %4209 = vmatprep.mubr.f32.mxu0 %v5536_v30  ;;  %4479 = vmatpush3.bf16.msra.mxu1 %v4476_v61  ;;  %v3323_v61 = vld [vmem:[%s6228_s1 + $0x3d8] sm:$0xff] }
  0xab   : > { %4607 = vmatpush3.bf16.msra.mxu0 %v4604_v47  ;;  %4481 = vmatprep.subr.bf16.mxu1 %v4480_v43  ;;  %v4488_v47 = vpack.c.bf16 %v3155_v55, %v3154_v1  ;;  %v4616_v0 = vpack.c.bf16 %v3323_v61, %v3322_v48  ;;  %v3354_v55 = vld [vmem:[%s6228_s1 + $0x400] sm:$0xff]  ;;  %v3355_v48 = vld [vmem:[%s6228_s1 + $0x408] sm:$0xff] }
  0xac   : > { %3938 = vmatmul.mubr.f32.gmra.mrb[6].mxu1 %v5427_v27  ;;  %4609 = vmatprep.subr.bf16.mxu0 %v4608_v18  ;;  %v4628_v61 = vpack.c.bf16 %v3355_v48, %v3354_v55  ;;  %v3357_v55 = vld [vmem:[%s6228_s1 + $0x418] sm:$0xff]  ;;  %v315_v48 = vld [vmem:[%s6231_s4 + $0x60] sm:$0xff] }
  0xad   : > { %4210 = vmatmul.mubr.f32.gmra.mrb[6].mxu0 %v5551_v44  ;;  %3940 = vmatprep.mubr.f32.mxu1 %v5449_v37 }
  0xae   : > { %4212 = vmatprep.mubr.f32.mxu0 %v5564_v54  ;;  %4483 = vmatpush3.bf16.msra.mxu1 %v4480_v43  ;;  %v3325_v43 = vld [vmem:[%s6228_s1 + $0x3e8] sm:$0xff] }
  0xaf   : > { %4611 = vmatpush3.bf16.msra.mxu0 %v4608_v18  ;;  %4485 = vmatprep.subr.bf16.mxu1 %v4484_v62  ;;  %v4492_v18 = vpack.c.bf16 %v3157_v39, %v3156_v42  ;;  %v4620_v11 = vpack.c.bf16 %v3325_v43, %v3324_v3  ;;  %v309_v42 = vld [vmem:[%s6231_s4 + $0x30] sm:$0xff]  ;;  %v5821_v39 = vld [vmem:[%s5108_s20 + $0xdf] sm:$0xff]  ;;  %v5824_v3 = vld [vmem:[%s5108_s20 + $0xe7] sm:$0xff] }
  0xb0   : > { %3941 = vmatmul.mubr.f32.gmra.mrb[8].mxu1 %v5455_v41  ;;  %4613 = vmatprep.subr.bf16.mxu0 %v4612_v56  ;;  %v312_v43 = vld [vmem:[%s6231_s4 + $0x48] sm:$0xff] }
  0xb1   : > { %4213 = vmatmul.mubr.f32.gmra.mrb[8].mxu0 %v5579_v13  ;;  %3943 = vmatprep.mubr.f32.mxu1 %v5477_v51 }
  0xb2   : > { %4215 = vmatprep.mubr.f32.mxu0 %v5592_v22  ;;  %4487 = vmatpush3.bf16.msra.mxu1 %v4484_v62  ;;  %v3327_v62 = vld [vmem:[%s6228_s1 + $0x3f8] sm:$0xff] }
  0xb3   : > { %4615 = vmatpush3.bf16.msra.mxu0 %v4612_v56  ;;  %4489 = vmatprep.subr.bf16.mxu1 %v4488_v47  ;;  %v4496_v56 = vpack.c.bf16 %v3159_v40, %v3158_v60  ;;  %v4624_v1 = vpack.c.bf16 %v3327_v62, %v3326_v14  ;;  %v3268_v60 = vld [vmem:[%s5108_s20 + $0xf7] sm:$0xff]  ;;  %v3269_v62 = vld [vmem:[%s5108_s20 + $0xff] sm:$0xff] }
  0xb4   : > { %3944 = vmatmul.mubr.f32.gmra.mrb[10].mxu1 %v5483_v53  ;;  %4617 = vmatprep.subr.bf16.mxu0 %v4616_v0  ;;  %v314_v40 = vld [vmem:[%s6231_s4 + $0x58] sm:$0xff]  ;;  %v313_v14 = vld [vmem:[%s6231_s4 + $0x50] sm:$0xff] }
  0xb5   : > { %4216 = vmatmul.mubr.f32.gmra.mrb[10].mxu0 %v5605_v45  ;;  %3946 = vmatprep.mubr.f32.mxu1 %v5505_v9 }
  0xb6   : > { %4218 = vmatprep.mubr.f32.mxu0 %v5612_v36  ;;  %4491 = vmatpush3.bf16.msra.mxu1 %v4488_v47  ;;  %v5808_v47 = vld [vmem:[%s5108_s20 + $0xd7] sm:$0xff] }
  0xb7   : > { %4619 = vmatpush3.bf16.msra.mxu0 %v4616_v0  ;;  %4493 = vmatprep.subr.bf16.mxu1 %v4492_v18  ;;  %v310_v0 = vld [vmem:[%s6231_s4 + $0x38] sm:$0xff] }
  0xb8   : > { %3947 = vmatmul.mubr.f32.gmra.mrb[12].mxu1 %v5511_v12  ;;  %4621 = vmatprep.subr.bf16.mxu0 %v4620_v11 }
  0xb9   : > { %4219 = vmatmul.mubr.f32.gmra.mrb[12].mxu0 %v5623_v5  ;;  %3949 = vmatprep.mubr.f32.mxu1 %v5533_v29 }
  0xba   : > { %4221 = vmatprep.mubr.f32.mxu0 %v5630_v2  ;;  %4495 = vmatpush3.bf16.msra.mxu1 %v4492_v18  ;;  %v311_v18 = vld [vmem:[%s6231_s4 + $0x40] sm:$0xff] }
  0xbb   : > { %4623 = vmatpush3.bf16.msra.mxu0 %v4620_v11  ;;  %4497 = vmatprep.subr.bf16.mxu1 %v4496_v56  ;;  %v3267_v11 = vld [vmem:[%s5108_s20 + $0xef] sm:$0xff] }
  0xbc   : > { %3950 = vmatmul.mubr.f32.gmra.mrb[14].mxu1 %v5539_v33  ;;  %4625 = vmatprep.subr.bf16.mxu0 %v4624_v1 }
  0xbd   : > { %4222 = vmatmul.mubr.f32.gmra.mrb[14].mxu0 %v5639_v17  ;;  %3952 = vmatprep.mubr.f32.mxu1 %v5561_v50 }
  0xbe   : > { %4224 = vmatprep.mubr.f32.mxu0 %v5652_v63  ;;  %4499 = vmatpush3.bf16.msra.mxu1 %v4496_v56  ;;  %v316_v56 = vld [vmem:[%s6231_s4 + $0x68] sm:$0xff] }
  0xbf   : > { %4627 = vmatpush3.bf16.msra.mxu0 %v4624_v1  ;;  %4660 = vmatprep.subr.bf16.mxu1 %v4628_v61  ;;  %v3356_v1 = vld [vmem:[%s6228_s1 + $0x410] sm:$0xff] }
  0xc0   : > { %3953 = vmatmul.mubr.f32.gmra.mrb[16].mxu1 %v5567_v57  ;;  %4629 = vmatprep.subr.bf16.mxu0 %v4628_v61 }
  0xc1   : > { %4225 = vmatmul.mubr.f32.gmra.mrb[16].mxu0 %v5664_v59  ;;  %3955 = vmatprep.mubr.f32.mxu1 %v5589_v19 }
  0xc2   : > { %4227 = vmatprep.mubr.f32.mxu0 %v5808_v47  ;;  %2719 = vperm.xlu1 %4912, %v310_v0   ;;  %v4632_v0 = vpack.c.bf16 %v3357_v55, %v3356_v1  ;;  %v3309_v1 = vld [vmem:[%s5108_s20 + $0xf0] sm:$0xff]  ;;  %v3310_v55 = vld [vmem:[%s5108_s20 + $0xf8] sm:$0xff] }
  0xc3   : > { %2714 = vperm.xlu0 %4911, %v309_v42   ;;  %v3358_v42 = vld [vmem:[%s6228_s1 + $0x420] sm:$0xff] }
  0xc4   : > { %3956 = vmatmul.mubr.f32.gmra.mrb[18].mxu1 %v5595_v28 }
  0xc5   : > { %4228 = vmatmul.mubr.f32.gmra.mrb[18].mxu0 %v5821_v39  ;;  %3958 = vmatprep.mubr.f32.mxu1 %v5609_v35 }
  0xc6   : > { %4230 = vmatprep.mubr.f32.mxu0 %v5824_v3  ;;  %2729 = vperm.xlu1 %4912, %v312_v43   ;;  %v3359_v43 = vld [vmem:[%s6228_s1 + $0x428] sm:$0xff] }
  0xc7   : > { %2724 = vperm.xlu0 %4911, %v311_v18  }
  0xc8   : > { %3959 = vmatmul.mubr.f32.gmra.mrb[20].mxu1 %v5615_v49 }
  0xc9   : > { %4231 = vmatmul.mubr.f32.gmra.mrb[20].mxu0 %v3267_v11  ;;  %3961 = vmatprep.mubr.f32.mxu1 %v5627_v58  ;;  %v6272_v11 = vld [vmem:[#allocation8_spill] sm:$0xff] }
  0xca   : > { %4233 = vmatprep.mubr.f32.mxu0 %v3268_v60  ;;  %2739 = vperm.xlu1 %4912, %v314_v40   ;;  %v6273_v60 = vld [vmem:[#allocation9_spill] sm:$0xff]  ;;  %v6275_v40 = vld [vmem:[#allocation11_spill] sm:$0xff] }
  0xcb   : > { %2734 = vperm.xlu0 %4911, %v313_v14   ;;  %v6276_v14 = vld [vmem:[#allocation12_spill] sm:$0xff] }
  0xcc   : > { %3962 = vmatmul.mubr.f32.gmra.mrb[22].mxu1 %v5633_v6 }
  0xcd   : > { %4234 = vmatmul.mubr.f32.gmra.mrb[22].mxu0 %v3269_v62  ;;  %3996 = vmatprep.mubr.f32.mxu1 %v5411_v20  ;;  %v3360_v20 = vld [vmem:[%s6228_s1 + $0x430] sm:$0xff]  ;;  %v6277_v62 = vld [vmem:[#allocation13_spill] sm:$0xff] }
  0xce   : > { %4268 = vmatprep.mubr.f32.mxu0 %v5204_v7  ;;  %2749 = vperm.xlu1 %4912, %v316_v56   ;;  %v4636_v7 = vpack.c.bf16 %v3359_v43, %v3358_v42  ;;  %v6278_v56 = vld [vmem:[#allocation14_spill] sm:$0xff] }
  0xcf   : > { %2744 = vperm.xlu0 %4911, %v315_v48   ;;  %v3311_v48 = vld [vmem:[%s5108_s20 + $0x100] sm:$0xff] }
  0xd0   : > { %3997 = vmatmul.mubr.f32.vlgmr.msra.gmra.mrb[0].mxu1 %v5423_v26  ;;  %v3361_v26 = vld [vmem:[%s6228_s1 + $0x438] sm:$0xff] }
  0xd1   : > { %4269 = vmatmul.mubr.f32.vlgmr.msra.gmra.mrb[0].mxu0 %v5207_v8  ;;  %4668 = vmatpush3.bf16.msra.mxu1 %v4628_v61  ;;  %v4640_v8 = vpack.c.bf16 %v3361_v26, %v3360_v20 }
  0xd2   : > { %4631 = vmatpush3.bf16.msra.mxu0 %v4628_v61  ;;  %3999 = vmatprep.mubr.f32.mxu1 %v5439_v34  ;;  %v3363_v34 = vld [vmem:[%s6228_s1 + $0x448] sm:$0xff]  ;;  %v6269_v61 = vld [vmem:[#allocation5_spill] sm:$0xff] }
  0xd3   : > { %4271 = vmatprep.mubr.f32.mxu0 %v5225_v15  ;;  %4633 = vmatprep.subr.bf16.mxu0 %v4632_v0  ;;  %v3362_v15 = vld [vmem:[%s6228_s1 + $0x440] sm:$0xff] }
  0xd4   : > { %4000 = vmatmul.mubr.f32.gmra.mrb[2].mxu1 %v5452_v38  ;;  %4661 = vmatprep.subr.bf16.mxu1 %v4632_v0  ;;  %v3365_v38 = vld [vmem:[%s6228_s1 + $0x458] sm:$0xff] }
  0xd5   : > { %4272 = vmatmul.mubr.f32.gmra.mrb[2].mxu0 %v5228_v16  ;;  %4002 = vmatprep.mubr.f32.mxu1 %v5467_v46  ;;  %v4644_v16 = vpack.c.bf16 %v3363_v34, %v3362_v15  ;;  %v3366_v46 = vld [vmem:[%s6228_s1 + $0x460] sm:$0xff] }
  0xd6   : > { %4274 = vmatprep.mubr.f32.mxu0 %v5246_v23  ;;  %4635 = vmatpush3.bf16.msra.mxu0 %v4632_v0  ;;  %v3364_v23 = vld [vmem:[%s6228_s1 + $0x450] sm:$0xff] }
  0xd7   : > { %4669 = vmatpush3.bf16.msra.mxu1 %v4632_v0  ;;  %4637 = vmatprep.subr.bf16.mxu0 %v4636_v7 }
  0xd8   : > { %4003 = vmatmul.mubr.f32.gmra.mrb[4].mxu1 %v5480_v52  ;;  %4662 = vmatprep.subr.bf16.mxu1 %v4636_v7  ;;  %v3367_v52 = vld [vmem:[%s6228_s1 + $0x468] sm:$0xff] }
  0xd9   : > { %4275 = vmatmul.mubr.f32.gmra.mrb[4].mxu0 %v5249_v24  ;;  %4005 = vmatprep.mubr.f32.mxu1 %v5495_v4  ;;  %v6266_v24 = vld [vmem:[#allocation2_spill] sm:$0xff]  ;;  %v6268_v4 = vld [vmem:[#allocation4_spill] sm:$0xff] }
  0xda   : > { %4277 = vmatprep.mubr.f32.mxu0 %v5268_v31  ;;  %4639 = vmatpush3.bf16.msra.mxu0 %v4636_v7  ;;  %v4648_v31 = vpack.c.bf16 %v3365_v38, %v3364_v23 }
  0xdb   : > { %4670 = vmatpush3.bf16.msra.mxu1 %v4636_v7  ;;  %4641 = vmatprep.subr.bf16.mxu0 %v4640_v8 }
  0xdc   : > { %4006 = vmatmul.mubr.f32.gmra.mrb[6].mxu1 %v5508_v10  ;;  %4663 = vmatprep.subr.bf16.mxu1 %v4640_v8  ;;  %v4652_v10 = vpack.c.bf16 %v3367_v52, %v3366_v46 }
  0xdd   : > { %4278 = vmatmul.mubr.f32.gmra.mrb[6].mxu0 %v5271_v32  ;;  %4008 = vmatprep.mubr.f32.mxu1 %v5523_v21  ;;  %v6267_v32 = vld [vmem:[#allocation3_spill] sm:$0xff]  ;;  %v3368_v21 = vld [vmem:[%s6228_s1 + $0x470] sm:$0xff] }
  0xde   : > { %4280 = vmatprep.mubr.f32.mxu0 %v6266_v24  ;;  %4643 = vmatpush3.bf16.msra.mxu0 %v4640_v8 }
  0xdf   : > { %4671 = vmatpush3.bf16.msra.mxu1 %v4640_v8  ;;  %4645 = vmatprep.subr.bf16.mxu0 %v4644_v16 }
  0xe0   : > { %4009 = vmatmul.mubr.f32.gmra.mrb[8].mxu1 %v5536_v30  ;;  %4664 = vmatprep.subr.bf16.mxu1 %v4644_v16  ;;  %v3369_v30 = vld [vmem:[%s6228_s1 + $0x478] sm:$0xff] }
  0xe1   : > { %4281 = vmatmul.mubr.f32.gmra.mrb[8].mxu0 %v6267_v32  ;;  %4011 = vmatprep.mubr.f32.mxu1 %v5551_v44  ;;  %v6270_v44 = vld [vmem:[#allocation6_spill] sm:$0xff]  ;;  %v4656_v18 = vpack.c.bf16 %v3369_v30, %v3368_v21 }
  0xe2   : > { %4283 = vmatprep.mubr.f32.mxu0 %v6268_v4  ;;  %4647 = vmatpush3.bf16.msra.mxu0 %v4644_v16 }
  0xe3   : > { %4672 = vmatpush3.bf16.msra.mxu1 %v4644_v16  ;;  %4649 = vmatprep.subr.bf16.mxu0 %v4648_v31 }
  0xe4   : > { %4012 = vmatmul.mubr.f32.gmra.mrb[10].mxu1 %v5564_v54  ;;  %4665 = vmatprep.subr.bf16.mxu1 %v4648_v31  ;;  %v6271_v54 = vld [vmem:[#allocation7_spill] sm:$0xff] }
  0xe5   : > { %4284 = vmatmul.mubr.f32.gmra.mrb[10].mxu0 %v6269_v61  ;;  %4014 = vmatprep.mubr.f32.mxu1 %v5579_v13  ;;  %v318_v13 = vld [vmem:[%s6231_s4 + $0x78] sm:$0xff] }
  0xe6   : > { %4286 = vmatprep.mubr.f32.mxu0 %v6270_v44  ;;  %4651 = vmatpush3.bf16.msra.mxu0 %v4648_v31 }
  0xe7   : > { %4673 = vmatpush3.bf16.msra.mxu1 %v4648_v31  ;;  %4653 = vmatprep.subr.bf16.mxu0 %v4652_v10 }
  0xe8   : > { %4015 = vmatmul.mubr.f32.gmra.mrb[12].mxu1 %v5592_v22  ;;  %4666 = vmatprep.subr.bf16.mxu1 %v4652_v10  ;;  %v317_v22 = vld [vmem:[%s6231_s4 + $0x70] sm:$0xff] }
  0xe9   : > { %4287 = vmatmul.mubr.f32.gmra.mrb[12].mxu0 %v6271_v54  ;;  %4017 = vmatprep.mubr.f32.mxu1 %v5605_v45  ;;  %v6274_v45 = vld [vmem:[#allocation10_spill] sm:$0xff] }
  0xea   : > { %4289 = vmatprep.mubr.f32.mxu0 %v6272_v11  ;;  %4655 = vmatpush3.bf16.msra.mxu0 %v4652_v10 }
  0xeb   : > { %4674 = vmatpush3.bf16.msra.mxu1 %v4652_v10  ;;  %4657 = vmatprep.subr.bf16.mxu0 %v4656_v18 }
  0xec   : > { %4018 = vmatmul.mubr.f32.gmra.mrb[14].mxu1 %v5612_v36  ;;  %4667 = vmatprep.subr.bf16.mxu1 %v4656_v18  ;;  %v320_v36 = vld [vmem:[%s6231_s4 + $0x88] sm:$0xff] }
  0xed   : > { %4290 = vmatmul.mubr.f32.gmra.mrb[14].mxu0 %v6273_v60  ;;  %4020 = vmatprep.mubr.f32.mxu1 %v5623_v5  ;;  %v319_v5 = vld [vmem:[%s6231_s4 + $0x80] sm:$0xff] }
  0xee   : > { %4292 = vmatprep.mubr.f32.mxu0 %v6274_v45  ;;  %4659 = vmatpush3.bf16.msra.mxu0 %v4656_v18 }
  0xef   : > { %4675 = vmatpush3.bf16.msra.mxu1 %v4656_v18  ;;  %2759 = vperm.xlu1 %4912, %v318_v13  }
  0xf0   : > { %4021 = vmatmul.mubr.f32.gmra.mrb[16].mxu1 %v5630_v2  ;;  %2754 = vperm.xlu0 %4911, %v317_v22   ;;  %v322_v2 = vld [vmem:[%s6231_s4 + $0x98] sm:$0xff] }
  0xf1   : > { %4293 = vmatmul.mubr.f32.gmra.mrb[16].mxu0 %v6275_v40  ;;  %4023 = vmatprep.mubr.f32.mxu1 %v5639_v17  ;;  %v321_v17 = vld [vmem:[%s6231_s4 + $0x90] sm:$0xff] }
  0xf2   : > { %4295 = vmatprep.mubr.f32.mxu0 %v6276_v14 }
  0xf3   : > { %2769 = vperm.xlu1 %4912, %v320_v36  }
  0xf4   : > { %4024 = vmatmul.mubr.f32.gmra.mrb[18].mxu1 %v5652_v63  ;;  %2764 = vperm.xlu0 %4911, %v319_v5   ;;  %v324_v63 = vld [vmem:[%s6231_s4 + $0xa8] sm:$0xff] }
  0xf5   : > { %4296 = vmatmul.mubr.f32.gmra.mrb[18].mxu0 %v6277_v62  ;;  %4026 = vmatprep.mubr.f32.mxu1 %v5664_v59  ;;  %v323_v59 = vld [vmem:[%s6231_s4 + $0xa0] sm:$0xff] }
  0xf6   : > { %4298 = vmatprep.mubr.f32.mxu0 %v6278_v56 }
  0xf7   : > { %2779 = vperm.xlu1 %4912, %v322_v2  }
  0xf8   : > { %4027 = vmatmul.mubr.f32.gmra.mrb[20].mxu1 %v5808_v47  ;;  %2774 = vperm.xlu0 %4911, %v321_v17   ;;  %v326_v47 = vld [vmem:[%s6231_s4 + $0xb8] sm:$0xff] }
  0xf9   : > { %4299 = vmatmul.mubr.f32.gmra.mrb[20].mxu0 %v3309_v1  ;;  %4029 = vmatprep.mubr.f32.mxu1 %v5821_v39  ;;  %v325_v39 = vld [vmem:[%s6231_s4 + $0xb0] sm:$0xff] }
  0xfa   : > { %4301 = vmatprep.mubr.f32.mxu0 %v3310_v55 }
  0xfb   : > { %2789 = vperm.xlu1 %4912, %v324_v63  }
  0xfc   : > { %4030 = vmatmul.mubr.f32.gmra.mrb[22].mxu1 %v5824_v3  ;;  %2784 = vperm.xlu0 %4911, %v323_v59  }
  0xfd   : > { %4302 = vmatmul.mubr.f32.gmra.mrb[22].mxu0 %v3311_v48  ;;  %4354 = vmatprep.mubr.f32.mxu1 %v5589_v19  ;;  %v3352_v19 = vld [vmem:[%s5108_s20 + $0xf9] sm:$0xff] }
  0xfe   : > { %4336 = vmatprep.mubr.f32.mxu0 %v5420_v25  ;;  %v6279_v25 = vld [vmem:[#allocation15_spill] sm:$0xff] }
  0xff   : > { %2799 = vperm.xlu1 %4912, %v326_v47  }
 0x100   : > { %4355 = vmatmul.mubr.f32.vlgmr.msra.gmra.mrb[24].mxu1 %v5595_v28  ;;  %2794 = vperm.xlu0 %4911, %v325_v39  }
 0x101   : > { %4337 = vmatmul.mubr.f32.vlgmr.msra.gmra.mrb[0].mxu0 %v5427_v27  ;;  %4357 = vmatprep.mubr.f32.mxu1 %v5609_v35  ;;  %v6280_v27 = vld [vmem:[#allocation16_spill] sm:$0xff] }
 0x102   : > { %4339 = vmatprep.mubr.f32.mxu0 %v5449_v37  ;;  %v6281_v37 = vld [vmem:[#allocation17_spill] sm:$0xff] }
 0x104   : > { %4358 = vmatmul.mubr.f32.gmra.mrb[26].mxu1 %v5615_v49 }
 0x105   : > { %4340 = vmatmul.mubr.f32.gmra.mrb[2].mxu0 %v5455_v41  ;;  %4360 = vmatprep.mubr.f32.mxu1 %v5627_v58  ;;  %v3351_v41 = vld [vmem:[%s5108_s20 + $0xf1] sm:$0xff] }
 0x106   : > { %4342 = vmatprep.mubr.f32.mxu0 %v5477_v51  ;;  %v3353_v51 = vld [vmem:[%s5108_s20 + $0x101] sm:$0xff] }
 0x108   : > { %4361 = vmatmul.mubr.f32.gmra.mrb[28].mxu1 %v5633_v6  ;;  %v6020_v6 = vpop.permute.xlu0 %2684 }
 0x109   : > { %4343 = vmatmul.mubr.f32.gmra.mrb[4].mxu0 %v5483_v53  ;;  %4363 = vmatprep.mubr.f32.mxu1 %v6279_v25 }
 0x10a   : > { %4345 = vmatprep.mubr.f32.mxu0 %v5505_v9 }
 0x10c   : > { %4364 = vmatmul.mubr.f32.gmra.mrb[30].mxu1 %v6280_v27  ;;  %v6063_v27 = vld [vmem:[%s6229_s2] ss:$0 sm:$0xff] }
 0x10d   : > { %4346 = vmatmul.mubr.f32.gmra.mrb[6].mxu0 %v5511_v12  ;;  %4366 = vmatprep.mubr.f32.mxu1 %v6281_v37 }
 0x10e   : > { %4348 = vmatprep.mubr.f32.mxu0 %v5533_v29 }
 0x110   : > { %4367 = vmatmul.mubr.f32.gmra.mrb[32].mxu1 %v3351_v41 }
 0x111   : > { %4349 = vmatmul.mubr.f32.gmra.mrb[8].mxu0 %v5539_v33  ;;  %4369 = vmatprep.mubr.f32.mxu1 %v3352_v19 }
 0x112   : > { %4351 = vmatprep.mubr.f32.mxu0 %v5561_v50  ;;  %v6028_v26 = vpop.permute.xlu0 %2689 }
 0x114   : > { %4370 = vmatmul.mubr.f32.gmra.mrb[34].mxu1 %v3353_v51 }
 0x115   : > { %4352 = vmatmul.mubr.f32.gmra.mrb[10].mxu0 %v5567_v57  ;;  %v6018_v57 = vpop.permute.xlu1 %2694 }
 0x116   : > { %v6032_v32 = vpop.permute.xlu0 %2704 }
 0x119   : > { %v6026_v42 = vpop.permute.xlu1 %2699 }
 0x11d   : > { %v6030_v24 = vpop.permute.xlu1 %2709 }
 0x141   : > { %v6038_v18 = vpop.permute.xlu1 %2719 }
 0x142   : > { %v6040_v60 = vpop.permute.xlu0 %2714 }
 0x145   : > { %v6046_v2 = vpop.permute.xlu1 %2729 }
 0x146   : > { %v6052_v1 = vpop.permute.xlu0 %2724 }
 0x149   : > { %v6058_v25 = vpop.permute.xlu1 %2739 }
 0x1a3   : > { %v5998_v53 = vpop.f32.mrb[0].mxu1 }
 0x1a4   : > { %v6000_v9 = vpop.f32.mrb[1].mxu1 }
 0x1a7   : > { %v6002_v12 = vpop.f32.mrb[2].mxu1 }
 0x1a8   : > { %v6004_v28 = vpop.f32.mrb[3].mxu1 }
 0x1ab   : > { %v6006_v29 = vpop.f32.mrb[4].mxu1 }
 0x1ac   : > { %v6008_v35 = vpop.f32.mrb[5].mxu1 }
 0x1af   : > { %v6010_v33 = vpop.f32.mrb[6].mxu1 }
 0x1b0   : > { %v6012_v49 = vpop.f32.mrb[7].mxu1 }
 0x1b3   : > { %v6014_v50 = vpop.f32.mrb[8].mxu1 }
 0x1b4   : > { %v6016_v58 = vpop.f32.mrb[9].mxu1 }
 0x1b7   : > { %v6022_v3 = vpop.f32.mrb[10].mxu1 }
 0x1b8   : > { %v6024_v0 = vpop.f32.mrb[11].mxu1 }
 0x1bb   : > { %v4016_v43 = vpop.f32.mrb[12].mxu1 }
 0x1bc   : > { %v4288_v7 = vpop.f32.mrb[12].mxu0  ;;  %v1229_v20 = vpop.f32.mrb[13].mxu1 }
 0x1bd   : > { %v4688_v8 = vadd.f32 %v4288_v7, %v4016_v43  ;;  %v2237_v15 = vpop.f32.mrb[13].mxu0  ;;  %v6073_v43 = vpop.permute.xlu0 %2734 }
 0x1be   : > { %v4690_v34 = vadd.f32 %v2237_v15, %v1229_v20  ;;  %v6079_v20 = vld [vmem:[%s6230_s3] ss:$0 sm:$0xff] }
 0x1bf   : > { %v4019_v16 = vpop.f32.mrb[14].mxu1 }
 0x1c0   : > { %v4291_v23 = vpop.f32.mrb[14].mxu0  ;;  %v1239_v38 = vpop.f32.mrb[15].mxu1 }
 0x1c1   : > { %v4692_v31 = vadd.f32 %v4291_v23, %v4019_v16  ;;  %v2247_v46 = vpop.f32.mrb[15].mxu0 }
 0x1c2   : > { %v4694_v52 = vadd.f32 %v2247_v46, %v1239_v38  ;;  %v2997_v46 = vld [vmem:[%s6071_s19 + $0x98] sm:$0xff] }
 0x1c3   : > { %v4022_v4 = vpop.f32.mrb[16].mxu1 }
 0x1c4   : > { %v4294_v10 = vpop.f32.mrb[16].mxu0  ;;  %v1249_v21 = vpop.f32.mrb[17].mxu1 }
 0x1c5   : > { %v6034_v30 = vadd.f32 %v4294_v10, %v4022_v4  ;;  %v2257_v61 = vpop.f32.mrb[17].mxu0 }
 0x1c6   : > { %v6036_v44 = vadd.f32 %v2257_v61, %v1249_v21  ;;  %v2985_v21 = vld [vmem:[%s6071_s19 + $0x38] sm:$0xff] }
 0x1c7   : > { %v4025_v54 = vpop.f32.mrb[18].mxu1 }
 0x1c8   : > { %v4297_v11 = vpop.f32.mrb[18].mxu0  ;;  %v1259_v13 = vpop.f32.mrb[19].mxu1 }
 0x1c9   : > { %v6042_v22 = vadd.f32 %v4297_v11, %v4025_v54  ;;  %v2267_v45 = vpop.f32.mrb[19].mxu0  ;;  %v2996_v54 = vld [vmem:[%s6071_s19 + $0x90] sm:$0xff] }
 0x1ca   : > { %v6044_v36 = vadd.f32 %v2267_v45, %v1259_v13 }
 0x1cb   : > { %v4028_v40 = vpop.f32.mrb[20].mxu1 }
 0x1cc   : > { %v4300_v5 = vpop.f32.mrb[20].mxu0  ;;  %v1269_v14 = vpop.f32.mrb[21].mxu1 }
 0x1cd   : > { %v6048_v62 = vadd.f32 %v4300_v5, %v4028_v40  ;;  %v2277_v17 = vpop.f32.mrb[21].mxu0  ;;  %v2984_v40 = vld [vmem:[%s6071_s19 + $0x30] sm:$0xff] }
 0x1ce   : > { %v6050_v56 = vadd.f32 %v2277_v17, %v1269_v14 }
 0x1cf   : > { %v4031_v55 = vpop.f32.mrb[22].mxu1 }
 0x1d0   : > { %v4303_v63 = vpop.f32.mrb[22].mxu0  ;;  %v1279_v59 = vpop.f32.mrb[23].mxu1 }
 0x1d1   : > { %v6054_v48 = vadd.f32 %v4303_v63, %v4031_v55  ;;  %v2287_v47 = vpop.f32.mrb[23].mxu0  ;;  %v2750_v55 = vpop.permute.xlu1 %2749 }
 0x1d2   : > { %v6056_v39 = vadd.f32 %v2287_v47, %v1279_v59 }
 0x1d3   : > { %v4356_v37 = vpop.f32.mrb[24].mxu1 }
 0x1d4   : > { %v4338_v41 = vpop.f32.mrb[0].mxu0  ;;  %v4689_v19 = vadd.f32 %v4688_v8, %v4356_v37  ;;  %v2489_v51 = vpop.f32.mrb[25].mxu1 }
 0x1d5   : > { %v4676_v7 = vadd.f32 %v4338_v41, %v5998_v53  ;;  %v2429_v15 = vpop.f32.mrb[1].mxu0  ;;  %v4691_v16 = vadd.f32 %v4690_v34, %v2489_v51  ;;  %v2745_v37 = vpop.permute.xlu0 %2744 }
 0x1d6   : > { %v2592_v23 = vmul.f32 %v4689_v19, %v6063_v27  ;;  %v4677_v38 = vadd.f32 %v2429_v15, %v6000_v9 }
 0x1d7   : > { %v2580_v8 = vmul.f32 %v4676_v7, %v6063_v27  ;;  %v2591_v4 = vmul.f32 %v4691_v16, %v6063_v27  ;;  %v4359_v10 = vpop.f32.mrb[26].mxu1 }
 0x1d8   : > { %v2623_v53 = vadd.f32 %v6079_v20, %v2592_v23  ;;  %v2579_v61 = vmul.f32 %v4677_v38, %v6063_v27  ;;  %v4341_v11 = vpop.f32.mrb[2].mxu0  ;;  %v4693_v13 = vadd.f32 %v4692_v31, %v4359_v10  ;;  %v2499_v45 = vpop.f32.mrb[27].mxu1  ;;  %v2987_v23 = vld [vmem:[%s6071_s19 + $0x48] sm:$0xff] }
 0x1d9   : > { %v2611_v34 = vadd.f32 %v6079_v20, %v2580_v8  ;;  %v2622_v9 = vadd.f32 %v6079_v20, %v2591_v4  ;;  %v4678_v5 = vadd.f32 %v4341_v11, %v6002_v12  ;;  %v2439_v14 = vpop.f32.mrb[3].mxu0  ;;  %v4695_v17 = vadd.f32 %v4694_v52, %v2499_v45  ;;  %v2999_v12 = vld [vmem:[%s6071_s19 + $0xa8] sm:$0xff] }
 0x1da   : > { %v2647_v63 = vadd.f32 %v2997_v46, %v2623_v53  ;;  %v2610_v59 = vadd.f32 %v6079_v20, %v2579_v61  ;;  %v2594_v47 = vmul.f32 %v4693_v13, %v6063_v27  ;;  %v4679_v31 = vadd.f32 %v2439_v14, %v6004_v28  ;;  %v2998_v28 = vld [vmem:[%s6071_s19 + $0xa0] sm:$0xff] }
 0x1db   : > { %v2635_v41 = vadd.f32 %v2985_v21, %v2611_v34  ;;  %v2646_v19 = vadd.f32 %v2996_v54, %v2622_v9  ;;  %v2582_v51 = vmul.f32 %v4678_v5, %v6063_v27  ;;  %v2593_v52 = vmul.f32 %v4695_v17, %v6063_v27  ;;  %v4362_v7 = vpop.f32.mrb[28].mxu1  ;;  %v2986_v61 = vld [vmem:[%s6071_s19 + $0x40] sm:$0xff] }
 0x1dc   : > { %v2671_v15 = vmax.f32 %v2647_v63, 0.0  ;;  %v2634_v16 = vadd.f32 %v2984_v40, %v2610_v59  ;;  %v2625_v38 = vadd.f32 %v6079_v20, %v2594_v47  ;;  %v2581_v8 = vmul.f32 %v4679_v31, %v6063_v27  ;;  %v4344_v46 = vpop.f32.mrb[4].mxu0  ;;  %v2509_v4 = vpop.f32.mrb[29].mxu1 }
 0x1dd   : > { %v2659_v10 = vmax.f32 %v2635_v41, 0.0  ;;  %v2670_v21 = vmax.f32 %v2646_v19, 0.0  ;;  %v2613_v53 = vadd.f32 %v6079_v20, %v2582_v51  ;;  %v2624_v54 = vadd.f32 %v6079_v20, %v2593_v52  ;;  %v2449_v11 = vpop.f32.mrb[5].mxu0  ;;  %v2760_v51 = vpop.permute.xlu1 %2759 }
 0x1de   : > { %v2815_v13 = vmul.f32 %v2750_v55, %v2671_v15  ;;  %v2658_v45 = vmax.f32 %v2634_v16, 0.0  ;;  %v2649_v34 = vadd.f32 %v2999_v12, %v2625_v38  ;;  %v2612_v40 = vadd.f32 %v6079_v20, %v2581_v8 }
 0x1df   : > { %v2803_v9 = vmul.f32 %v6028_v26, %v2659_v10  ;;  %v2814_v5 = vmul.f32 %v2745_v37, %v2670_v21  ;;  %v2637_v14 = vadd.f32 %v2987_v23, %v2613_v53  ;;  %v2648_v17 = vadd.f32 %v2998_v28, %v2624_v54  ;;  %v4365_v63 = vpop.f32.mrb[30].mxu1  ;;  %v3001_v53 = vld [vmem:[%s6071_s19 + $0xb8] sm:$0xff] }
 0x1e0   : > { %3387 = vst [vmem:[%s6106_s28 + $0x98] sm:$0xff] %v2815_v13  ;;  %v2802_v59 = vmul.f32 %v6020_v6, %v2658_v45  ;;  %v2673_v47 = vmax.f32 %v2649_v34, 0.0  ;;  %v2636_v31 = vadd.f32 %v2986_v61, %v2612_v40  ;;  %v4680_v55 = vadd.f32 %v4344_v46, %v6006_v29  ;;  %v4347_v41 = vpop.f32.mrb[6].mxu0  ;;  %v2519_v19 = vpop.f32.mrb[31].mxu1  ;;  %v2989_v46 = vld [vmem:[%s6071_s19 + $0x58] sm:$0xff]  ;;  %v3000_v45 = vld [vmem:[%s6071_s19 + $0xb0] sm:$0xff] }
 0x1e1   : > { %3375 = vst [vmem:[%s6106_s28 + $0x38] sm:$0xff] %v2803_v9  ;;  %3386 = vst [vmem:[%s6106_s28 + $0x90] sm:$0xff] %v2814_v5  ;;  %v2661_v12 = vmax.f32 %v2637_v14, 0.0  ;;  %v2672_v26 = vmax.f32 %v2648_v17, 0.0  ;;  %v4697_v37 = vadd.f32 %v6034_v30, %v4362_v7  ;;  %v4681_v52 = vadd.f32 %v2449_v11, %v6008_v35  ;;  %v2459_v15 = vpop.f32.mrb[7].mxu0  ;;  %v2755_v6 = vpop.permute.xlu0 %2754 }
 0x1e2   : > { %3374 = vst [vmem:[%s6106_s28 + $0x30] sm:$0xff] %v2802_v59  ;;  %v2817_v16 = vmul.f32 %v2760_v51, %v2673_v47  ;;  %v2660_v29 = vmax.f32 %v2636_v31, 0.0  ;;  %v2584_v23 = vmul.f32 %v4680_v55, %v6063_v27  ;;  %v4699_v38 = vadd.f32 %v6036_v44, %v2509_v4  ;;  %v2988_v44 = vld [vmem:[%s6071_s19 + $0x50] sm:$0xff]  ;;  %v2770_v17 = vpop.permute.xlu1 %2769  ;;  %v2991_v31 = vld [vmem:[%s6071_s19 + $0x68] sm:$0xff] }
 0x1e3   : > { %v2805_v8 = vmul.f32 %v6026_v42, %v2661_v12  ;;  %v2816_v28 = vmul.f32 %v2755_v6, %v2672_v26  ;;  %v2596_v30 = vmul.f32 %v4697_v37, %v6063_v27  ;;  %v2583_v35 = vmul.f32 %v4681_v52, %v6063_v27  ;;  %v4368_v7 = vpop.f32.mrb[32].mxu1  ;;  %v3003_v12 = vld [vmem:[%s6071_s19 + $0xc8] sm:$0xff]  ;;  %v2990_v26 = vld [vmem:[%s6071_s19 + $0x60] sm:$0xff] }
 0x1e4   : > { %3389 = vst [vmem:[%s6106_s28 + $0xa8] sm:$0xff] %v2817_v16  ;;  %v2804_v10 = vmul.f32 %v6018_v57, %v2660_v29  ;;  %v2615_v21 = vadd.f32 %v6079_v20, %v2584_v23  ;;  %v2595_v4 = vmul.f32 %v4699_v38, %v6063_v27  ;;  %v4682_v42 = vadd.f32 %v4347_v41, %v6010_v33  ;;  %v4350_v61 = vpop.f32.mrb[8].mxu0  ;;  %v2529_v54 = vpop.f32.mrb[33].mxu1  ;;  %v3002_v23 = vld [vmem:[%s6071_s19 + $0xc0] sm:$0xff] }
 0x1e5   : > { %3377 = vst [vmem:[%s6106_s28 + $0x48] sm:$0xff] %v2805_v8  ;;  %3388 = vst [vmem:[%s6106_s28 + $0xa0] sm:$0xff] %v2816_v28  ;;  %v2627_v11 = vadd.f32 %v6079_v20, %v2596_v30  ;;  %v2614_v13 = vadd.f32 %v6079_v20, %v2583_v35  ;;  %v4701_v57 = vadd.f32 %v6042_v22, %v4365_v63  ;;  %v2469_v40 = vpop.f32.mrb[9].mxu0 }
 0x1e6   : > { %v4683_v34 = vadd.f32 %v2459_v15, %v6012_v49  ;;  %3376 = vst [vmem:[%s6106_s28 + $0x40] sm:$0xff] %v2804_v10  ;;  %v2639_v9 = vadd.f32 %v2989_v46, %v2615_v21  ;;  %v2626_v33 = vadd.f32 %v6079_v20, %v2595_v4  ;;  %v2586_v5 = vmul.f32 %v4682_v42, %v6063_v27 }
 0x1e7   : > { %v4703_v14 = vadd.f32 %v6044_v36, %v2519_v19  ;;  %v2651_v59 = vadd.f32 %v3001_v53, %v2627_v11  ;;  %v2638_v47 = vadd.f32 %v2988_v44, %v2614_v13  ;;  %v2598_v55 = vmul.f32 %v4701_v57, %v6063_v27  ;;  %v4371_v22 = vpop.f32.mrb[34].mxu1  ;;  %v2765_v19 = vpop.permute.xlu0 %2764 }
 0x1e8   : > { %v2585_v49 = vmul.f32 %v4683_v34, %v6063_v27  ;;  %v2663_v63 = vmax.f32 %v2639_v9, 0.0  ;;  %v2650_v41 = vadd.f32 %v3000_v45, %v2626_v33  ;;  %v2617_v51 = vadd.f32 %v6079_v20, %v2586_v5  ;;  %v4353_v52 = vpop.f32.mrb[10].mxu0  ;;  %v2539_v36 = vpop.f32.mrb[35].mxu1 }
 0x1e9   : > { %v2597_v37 = vmul.f32 %v4703_v14, %v6063_v27  ;;  %v2675_v15 = vmax.f32 %v2651_v59, 0.0  ;;  %v2662_v6 = vmax.f32 %v2638_v47, 0.0  ;;  %v2629_v16 = vadd.f32 %v6079_v20, %v2598_v55  ;;  %v2479_v38 = vpop.f32.mrb[11].mxu0  ;;  %v2992_v59 = vld [vmem:[%s6071_s19 + $0x70] sm:$0xff] }
 0x1ea   : > { %v2616_v29 = vadd.f32 %v6079_v20, %v2585_v49  ;;  %v2807_v8 = vmul.f32 %v6030_v24, %v2663_v63  ;;  %v2674_v28 = vmax.f32 %v2650_v41, 0.0  ;;  %v2641_v46 = vadd.f32 %v2991_v31, %v2617_v51  ;;  %v3004_v31 = vld [vmem:[%s6071_s19 + $0xd0] sm:$0xff] }
 0x1eb   : > { %v2628_v30 = vadd.f32 %v6079_v20, %v2597_v37  ;;  %v2819_v35 = vmul.f32 %v2770_v17, %v2675_v15  ;;  %v2806_v10 = vmul.f32 %v6032_v32, %v2662_v6  ;;  %v2653_v21 = vadd.f32 %v3003_v12, %v2629_v16  ;;  %v2780_v32 = vpop.permute.xlu1 %2779  ;;  %v2775_v33 = vpop.permute.xlu0 %2774  ;;  %v3005_v17 = vld [vmem:[%s6071_s19 + $0xd8] sm:$0xff]  ;;  %v2995_v37 = vld [vmem:[%s6071_s19 + $0x88] sm:$0xff]  ;;  %v2994_v16 = vld [vmem:[%s6071_s19 + $0x80] sm:$0xff] }
 0x1ec   : > { %v2640_v53 = vadd.f32 %v2990_v26, %v2616_v29  ;;  %3379 = vst [vmem:[%s6106_s28 + $0x58] sm:$0xff] %v2807_v8  ;;  %v2818_v44 = vmul.f32 %v2765_v19, %v2674_v28  ;;  %v2665_v4 = vmax.f32 %v2641_v46, 0.0  ;;  %v4684_v11 = vadd.f32 %v4350_v61, %v6014_v50  ;;  %v3007_v6 = vld [vmem:[%s6071_s19 + $0xe8] sm:$0xff]  ;;  %v3006_v28 = vld [vmem:[%s6071_s19 + $0xe0] sm:$0xff] }
 0x1ed   : > { %v2652_v42 = vadd.f32 %v3002_v23, %v2628_v30  ;;  %3391 = vst [vmem:[%s6106_s28 + $0xb8] sm:$0xff] %v2819_v35  ;;  %3378 = vst [vmem:[%s6106_s28 + $0x50] sm:$0xff] %v2806_v10  ;;  %v2677_v24 = vmax.f32 %v2653_v21, 0.0  ;;  %v4705_v45 = vadd.f32 %v6048_v62, %v4368_v7  ;;  %v4685_v57 = vadd.f32 %v2469_v40, %v6016_v58  ;;  %v2993_v7 = vld [vmem:[%s6071_s19 + $0x78] sm:$0xff] }
 0x1ee   : > { %v2664_v13 = vmax.f32 %v2640_v53, 0.0  ;;  %3390 = vst [vmem:[%s6106_s28 + $0xb0] sm:$0xff] %v2818_v44  ;;  %v2809_v34 = vmul.f32 %v6038_v18, %v2665_v4  ;;  %v2588_v50 = vmul.f32 %v4684_v11, %v6063_v27  ;;  %v4707_v61 = vadd.f32 %v6050_v56, %v2529_v54 }
 0x1ef   : > { %v2676_v9 = vmax.f32 %v2652_v42, 0.0  ;;  %v2821_v5 = vmul.f32 %v2780_v32, %v2677_v24  ;;  %v2600_v58 = vmul.f32 %v4705_v45, %v6063_v27  ;;  %v2587_v40 = vmul.f32 %v4685_v57, %v6063_v27  ;;  %v2785_v23 = vpop.permute.xlu0 %2784 }
 0x1f0   : > { %v2808_v62 = vmul.f32 %v6040_v60, %v2664_v13  ;;  %3381 = vst [vmem:[%s6106_s28 + $0x68] sm:$0xff] %v2809_v34  ;;  %v2619_v14 = vadd.f32 %v6079_v20, %v2588_v50  ;;  %v2599_v47 = vmul.f32 %v4707_v61, %v6063_v27  ;;  %v4686_v56 = vadd.f32 %v4353_v52, %v6022_v3 }
 0x1f1   : > { %v2820_v18 = vmul.f32 %v2775_v33, %v2676_v9  ;;  %3393 = vst [vmem:[%s6106_s28 + $0xc8] sm:$0xff] %v2821_v5  ;;  %v2631_v60 = vadd.f32 %v6079_v20, %v2600_v58  ;;  %v2618_v54 = vadd.f32 %v6079_v20, %v2587_v40  ;;  %v4709_v55 = vadd.f32 %v6054_v48, %v4371_v22  ;;  %v2790_v22 = vpop.permute.xlu1 %2789 }
 0x1f2   : > { %3380 = vst [vmem:[%s6106_s28 + $0x60] sm:$0xff] %v2808_v62  ;;  %v4687_v49 = vadd.f32 %v2479_v38, %v6024_v0  ;;  %v2643_v63 = vadd.f32 %v2993_v7, %v2619_v14  ;;  %v2630_v41 = vadd.f32 %v6079_v20, %v2599_v47  ;;  %v2590_v51 = vmul.f32 %v4686_v56, %v6063_v27 }
 0x1f3   : > { %3392 = vst [vmem:[%s6106_s28 + $0xc0] sm:$0xff] %v2820_v18  ;;  %v4711_v3 = vadd.f32 %v6056_v39, %v2539_v36  ;;  %v2655_v12 = vadd.f32 %v3005_v17, %v2631_v60  ;;  %v2642_v26 = vadd.f32 %v2992_v59, %v2618_v54  ;;  %v2602_v52 = vmul.f32 %v4709_v55, %v6063_v27 }
 0x1f4   : > { %v2589_v48 = vmul.f32 %v4687_v49, %v6063_v27  ;;  %v2667_v19 = vmax.f32 %v2643_v63, 0.0  ;;  %v2654_v0 = vadd.f32 %v3004_v31, %v2630_v41  ;;  %v2621_v15 = vadd.f32 %v6079_v20, %v2590_v51 }
 0x1f5   : > { %v2601_v29 = vmul.f32 %v4711_v3, %v6063_v27  ;;  %v2679_v39 = vmax.f32 %v2655_v12, 0.0  ;;  %v2666_v36 = vmax.f32 %v2642_v26, 0.0  ;;  %v2633_v38 = vadd.f32 %v6079_v20, %v2602_v52  ;;  %v2800_v13 = vpop.permute.xlu1 %2799 }
 0x1f6   : > { %v2620_v8 = vadd.f32 %v6079_v20, %v2589_v48  ;;  %v2811_v46 = vmul.f32 %v6046_v2, %v2667_v19  ;;  %v2678_v30 = vmax.f32 %v2654_v0, 0.0  ;;  %v2645_v35 = vadd.f32 %v2995_v37, %v2621_v15 }
 0x1f7   : > { %v2632_v10 = vadd.f32 %v6079_v20, %v2601_v29  ;;  %v2823_v21 = vmul.f32 %v2790_v22, %v2679_v39  ;;  %v2810_v27 = vmul.f32 %v6052_v1, %v2666_v36  ;;  %v2657_v53 = vadd.f32 %v3007_v6, %v2633_v38  ;;  %v2795_v1 = vpop.permute.xlu0 %2794 }
 0x1f8   : > { %v2644_v44 = vadd.f32 %v2994_v16, %v2620_v8  ;;  %3383 = vst [vmem:[%s6106_s28 + $0x78] sm:$0xff] %v2811_v46  ;;  %v2822_v4 = vmul.f32 %v2785_v23, %v2678_v30  ;;  %v2669_v42 = vmax.f32 %v2645_v35, 0.0 }
 0x1f9   : > { %v2656_v11 = vadd.f32 %v3006_v28, %v2632_v10  ;;  %3395 = vst [vmem:[%s6106_s28 + $0xd8] sm:$0xff] %v2823_v21  ;;  %3382 = vst [vmem:[%s6106_s28 + $0x70] sm:$0xff] %v2810_v27  ;;  %v2681_v2 = vmax.f32 %v2657_v53, 0.0 }
 0x1fa   : > { %v2668_v24 = vmax.f32 %v2644_v44, 0.0  ;;  %3394 = vst [vmem:[%s6106_s28 + $0xd0] sm:$0xff] %v2822_v4  ;;  %v2813_v20 = vmul.f32 %v6058_v25, %v2669_v42 }
 0x1fb   : > { %v2680_v45 = vmax.f32 %v2656_v11, 0.0  ;;  %v2825_v57 = vmul.f32 %v2800_v13, %v2681_v2 }
 0x1fc   : > { %v2812_v32 = vmul.f32 %v6073_v43, %v2668_v24  ;;  %3385 = vst [vmem:[%s6106_s28 + $0x88] sm:$0xff] %v2813_v20 }
 0x1fd   : > { %v2824_v34 = vmul.f32 %v2795_v1, %v2680_v45  ;;  %3397 = vst [vmem:[%s6106_s28 + $0xe8] sm:$0xff] %v2825_v57 }
 0x1fe   : > { %3384 = vst [vmem:[%s6106_s28 + $0x80] sm:$0xff] %v2812_v32 }
 0x1ff   : > { %3396 = vst [vmem:[%s6106_s28 + $0xe0] sm:$0xff] %v2824_v34 }
 0x200 PF: > { %s16_s25 = sadd.s32 1, %s4951_s25   ;;  %s6282_s21 = smov %s4943_s23 }
 0x201   : > { %p13_p7 = scmp.ge.s32.totalorder %s16_s25, 6   ;;  %s6283_s22 = smov %s4947_s24 }
 0x202   : > { %s6284_s23 = smov %s6287_s26  ;;  %s6285_s24 = smov %s6291_s27 }
 0x203   :  { %15 = sbr.rel (!%p13_p7) target bundleno = 3 (0x3), region = 100 }

// kernel: basic_block_forward.2
= control target key start
LH: loop header
LB: loop body
LE: loop exit
PB: predicated region body
PF: predicated region fallthrough
CT: control target
= control target key end

     0   :  { %s9157_s30 = smov 0   ;;  %s9159_s10 = smov 0   ;;  %s10987_s0 = inlined_call_operand.vmem [shape: f32[2,480,128], index: 0, kind: input, shape index: {}]   ;;  %s10988_s1 = inlined_call_operand.vmem [shape: f32[9,128,128], index: 1, kind: input, shape index: {}]   ;;  %s10989_s2 = inlined_call_operand.vmem [shape: f32[1,128], index: 2, kind: input, shape index: {}]   ;;  %s10990_s3 = inlined_call_operand.vmem [shape: f32[1,128], index: 3, kind: input, shape index: {}]   ;;  %s10991_s4 = inlined_call_operand.vmem [shape: f32[192,1], index: 4, kind: input, shape index: {}]   ;;  %s10992_s5 = inlined_call_operand.vmem [shape: f32[9,128,128], index: 5, kind: input, shape index: {}]   ;;  %s10993_s6 = inlined_call_operand.vmem [shape: f32[1,128], index: 6, kind: input, shape index: {}]   ;;  %s10994_s7 = inlined_call_operand.vmem [shape: f32[1,128], index: 7, kind: input, shape index: {}]   ;;  %s10995_s8 = inlined_call_operand.vmem [shape: f32[2,480,128], index: 8, kind: output, shape index: {0}]   ;;  %s10996_s9 = inlined_call_operand.vmem [shape: f32[2,480,128], index: 9, kind: output, shape index: {1}]  }
   0x1   :  { %s9161_s11 = smov 0   ;;  %s9163_s12 = smov 0  }
   0x2   :  { %s9165_s13 = smov 0  }
   0x3 LB: > { %s29_s14 = sadd.s32 1, %s9095_s11  ;;  %s32_s15 = sadd.s32 1, %s9099_s12  ;;  %s9103_s13 = sphi %s9165_s13, %s20_s13   ;;  %s9099_s12 = sphi %s9163_s12, %s11000_s12   ;;  %s9095_s11 = sphi %s9161_s11, %s10999_s11   ;;  %s9091_s10 = sphi %s9159_s10, %s10998_s10   ;;  %s9087_s30 = sphi %s9157_s30, %s10997_s30  }
   0x4   : > { %p30_p0 = scmp.ge.s32.totalorder %s29_s14, 2  ;;  %p5347_p1 = scmp.ge.s32.totalorder %s9103_s13, 1 }
   0x5   : > { %p302_p2 = scmp.lt.s32.totalorder %s9103_s13, 5 }
   0x6   : > { %s11002_s14 = smov (%p30_p0, %s29_s14), 0  ;;  %s11004_s15 = smov (!%p30_p0, %s32_s15), %s9099_s12 }
   0x7   : > { %p303_p3 = pnand %p5347_p1, %p302_p2  ;;  %p34_p4 = scmp.ge.s32.totalorder %s11004_s15, 2 }
   0x8   : > { %p343_p5 = scmp.lt.s32.totalorder (!%p303_p3), %s9091_s10, 1  ;;  %p5351_p6 = scmp.ne.s32.totalorder (!%p303_p3), %s9087_s30, 0 }
   0x9   : > { %s11006_s15 = smov (%p34_p4, %s11004_s15), 0  ;;  %306 = sbr.rel (%p303_p3) target bundleno = 717 (0x2cd), region = 52 }
  0x10   : > { %s11008_s10 = smov (!%p343_p5, %s9091_s10), 1  ;;  %364 = sbr.rel (%p5351_p6) target bundleno = 32 (0x20), region = 56 }
  0x11   : > { %s9189_s16 = smul.u32 480, %s11008_s10  ;;  %v9105_v0 = vmov (!%p5351_p6), 0.0  }
  0x13   : > { %s347_s19 = scalar_lea.vmem %s10987_s0, %s9189_s16  ;;  %s9199_s22 = scalar_lea.vmem %s10995_s8, %s9189_s16 }
  0x14   : > { %s9205_s25 = scalar_lea.vmem %s10996_s9, %s9189_s16  ;;  %365 = vst [vmem:[%s9199_s22] sm:$0xff] (!%p5351_p6), %v9105_v0  ;;  %366 = vst [vmem:[%s9199_s22 + $0x8] sm:$0xff] (!%p5351_p6), %v9105_v0 }
  0x15   : > { %367 = vst [vmem:[%s9199_s22 + $0x10] sm:$0xff] (!%p5351_p6), %v9105_v0  ;;  %368 = vst [vmem:[%s9199_s22 + $0x18] sm:$0xff] (!%p5351_p6), %v9105_v0 }
  0x16   : > { %369 = vst [vmem:[%s9199_s22 + $0x20] sm:$0xff] (!%p5351_p6), %v9105_v0  ;;  %370 = vst [vmem:[%s9199_s22 + $0x28] sm:$0xff] (!%p5351_p6), %v9105_v0 }
  0x17   : > { %371 = vst [vmem:[%s9199_s22 + $0x1b0] sm:$0xff] %v9105_v0  ;;  %372 = vst [vmem:[%s9199_s22 + $0x1b8] sm:$0xff] %v9105_v0 }
  0x18   : > { %373 = vst [vmem:[%s9199_s22 + $0x1c0] sm:$0xff] %v9105_v0  ;;  %374 = vst [vmem:[%s9199_s22 + $0x1c8] sm:$0xff] %v9105_v0 }
  0x19   : > { %375 = vst [vmem:[%s9199_s22 + $0x1d0] sm:$0xff] %v9105_v0  ;;  %376 = vst [vmem:[%s9199_s22 + $0x1d8] sm:$0xff] %v9105_v0 }
  0x1a   : > { %377 = vst [vmem:[%s9205_s25] sm:$0xff] %v9105_v0  ;;  %378 = vst [vmem:[%s9205_s25 + $0x8] sm:$0xff] %v9105_v0 }
  0x1b   : > { %379 = vst [vmem:[%s9205_s25 + $0x10] sm:$0xff] %v9105_v0  ;;  %380 = vst [vmem:[%s9205_s25 + $0x18] sm:$0xff] %v9105_v0 }
  0x1c   : > { %381 = vst [vmem:[%s9205_s25 + $0x20] sm:$0xff] %v9105_v0  ;;  %382 = vst [vmem:[%s9205_s25 + $0x28] sm:$0xff] %v9105_v0 }
  0x1d   : > { %383 = vst [vmem:[%s9205_s25 + $0x1b0] sm:$0xff] %v9105_v0  ;;  %384 = vst [vmem:[%s9205_s25 + $0x1b8] sm:$0xff] %v9105_v0 }
  0x1e   : > { %385 = vst [vmem:[%s9205_s25 + $0x1c0] sm:$0xff] %v9105_v0  ;;  %386 = vst [vmem:[%s9205_s25 + $0x1c8] sm:$0xff] %v9105_v0 }
  0x1f   : > { %387 = vst [vmem:[%s9205_s25 + $0x1d0] sm:$0xff] %v9105_v0  ;;  %388 = vst [vmem:[%s9205_s25 + $0x1d8] sm:$0xff] %v9105_v0 }
  0x20 PF: > { %v5404_v1 = vld [vmem:[%s10988_s1 + $0x80] sm:$0xff]  ;;  %v5405_v2 = vld [vmem:[%s10988_s1 + $0x88] sm:$0xff]  ;;  %v5406_v6 = vld [vmem:[%s10988_s1 + $0x90] sm:$0xff]  ;;  %s9269_s28 = smul.u32 192, %s9087_s30 }
  0x21   : > { %v5790_v3 = vld [vmem:[%s10992_s5 + $0x80] sm:$0xff]  ;;  %v8060_v4 = vpack.c.bf16 %v5405_v2, %v5404_v1  ;;  %v5791_v5 = vld [vmem:[%s10992_s5 + $0x88] sm:$0xff]  ;;  %v5407_v7 = vld [vmem:[%s10988_s1 + $0x98] sm:$0xff] }
  0x22   : > { %v8348_v8 = vpack.c.bf16 %v5791_v5, %v5790_v3  ;;  %v8064_v9 = vpack.c.bf16 %v5407_v7, %v5406_v6  ;;  %v5792_v10 = vld [vmem:[%s10992_s5 + $0x90] sm:$0xff]  ;;  %v5793_v11 = vld [vmem:[%s10992_s5 + $0x98] sm:$0xff]  ;;  %v5408_v12 = vld [vmem:[%s10988_s1 + $0xa0] sm:$0xff]  ;;  %s9289_s27 = scalar_lea.vmem %s347_s19, %s9269_s28  ;;  %s10791_s26 = scalar_lea.vmem %s9205_s25, %s9269_s28 }
  0x23   : > { %8061 = vmatprep.subr.bf16.mxu0 %v8060_v4  ;;  %v8352_v13 = vpack.c.bf16 %v5793_v11, %v5792_v10  ;;  %v5409_v14 = vld [vmem:[%s10988_s1 + $0xa8] sm:$0xff]  ;;  %v5794_v15 = vld [vmem:[%s10992_s5 + $0xa0] sm:$0xff]  ;;  %v5410_v19 = vld [vmem:[%s10988_s1 + $0xb0] sm:$0xff]  ;;  %s10799_s29 = scalar_lea.vmem %s9199_s22, %s9269_s28 }
  0x24   : > { %v5795_v16 = vld [vmem:[%s10992_s5 + $0xa8] sm:$0xff]  ;;  %8349 = vmatprep.subr.bf16.mxu1 %v8348_v8  ;;  %8063 = vmatpush3.bf16.msra.mxu0 %v8060_v4  ;;  %v8068_v17 = vpack.c.bf16 %v5409_v14, %v5408_v12  ;;  %v5411_v20 = vld [vmem:[%s10988_s1 + $0xb8] sm:$0xff]  ;;  %v5796_v21 = vld [vmem:[%s10992_s5 + $0xb0] sm:$0xff] }
  0x25   : > { %8351 = vmatpush3.bf16.msra.mxu1 %v8348_v8  ;;  %8065 = vmatprep.subr.bf16.mxu0 %v8064_v9  ;;  %v8356_v18 = vpack.c.bf16 %v5795_v16, %v5794_v15  ;;  %v5797_v22 = vld [vmem:[%s10992_s5 + $0xb8] sm:$0xff]  ;;  %v8072_v23 = vpack.c.bf16 %v5411_v20, %v5410_v19  ;;  %v5412_v25 = vld [vmem:[%s10988_s1 + $0xc0] sm:$0xff]  ;;  %v5413_v26 = vld [vmem:[%s10988_s1 + $0xc8] sm:$0xff] }
  0x26   : > { %8353 = vmatprep.subr.bf16.mxu1 %v8352_v13  ;;  %v8360_v24 = vpack.c.bf16 %v5797_v22, %v5796_v21  ;;  %v5380_v27 = vld [vmem:[%s9289_s27 + $0x18] sm:$0xff]  ;;  %v5798_v28 = vld [vmem:[%s10992_s5 + $0xc0] sm:$0xff]  ;;  %v5799_v29 = vld [vmem:[%s10992_s5 + $0xc8] sm:$0xff]  ;;  %v8076_v30 = vpack.c.bf16 %v5413_v26, %v5412_v25 }
  0x27   : > { %6868 = vmatprep.mubr.f32.mxu0 %v5380_v27  ;;  %7480 = vmatprep.mubr.f32.mxu1 %v5380_v27  ;;  %v8364_v31 = vpack.c.bf16 %v5799_v29, %v5798_v28  ;;  %v5414_v32 = vld [vmem:[%s10988_s1 + $0xd0] sm:$0xff]  ;;  %v5415_v33 = vld [vmem:[%s10988_s1 + $0xd8] sm:$0xff]  ;;  %v5416_v38 = vld [vmem:[%s10988_s1 + $0xe0] sm:$0xff] }
  0x28   : > { %8067 = vmatpush3.bf16.msra.mxu0 %v8064_v9  ;;  %v5800_v34 = vld [vmem:[%s10992_s5 + $0xd0] sm:$0xff]  ;;  %v5801_v35 = vld [vmem:[%s10992_s5 + $0xd8] sm:$0xff]  ;;  %v8080_v36 = vpack.c.bf16 %v5415_v33, %v5414_v32  ;;  %v5417_v39 = vld [vmem:[%s10988_s1 + $0xe8] sm:$0xff] }
  0x29   : > { %8355 = vmatpush3.bf16.msra.mxu1 %v8352_v13  ;;  %8069 = vmatprep.subr.bf16.mxu0 %v8068_v17  ;;  %v8368_v37 = vpack.c.bf16 %v5801_v35, %v5800_v34  ;;  %v5802_v40 = vld [vmem:[%s10992_s5 + $0xe0] sm:$0xff]  ;;  %v5803_v41 = vld [vmem:[%s10992_s5 + $0xe8] sm:$0xff]  ;;  %v8084_v42 = vpack.c.bf16 %v5417_v39, %v5416_v38  ;;  %v5418_v44 = vld [vmem:[%s10988_s1 + $0xf0] sm:$0xff] }
  0x2a   : > { %8357 = vmatprep.subr.bf16.mxu1 %v8356_v18  ;;  %v8372_v43 = vpack.c.bf16 %v5803_v41, %v5802_v40  ;;  %v5419_v45 = vld [vmem:[%s10988_s1 + $0xf8] sm:$0xff]  ;;  %v5804_v46 = vld [vmem:[%s10992_s5 + $0xf0] sm:$0xff]  ;;  %v441_v50 = vld [vmem:[%s10988_s1] sm:$0xff] }
  0x2b   : > { %v5805_v47 = vld [vmem:[%s10992_s5 + $0xf8] sm:$0xff]  ;;  %v8088_v48 = vpack.c.bf16 %v5419_v45, %v5418_v44  ;;  %v442_v51 = vld [vmem:[%s10988_s1 + $0x8] sm:$0xff]  ;;  %v2912_v52 = vld [vmem:[%s10992_s5] sm:$0xff] }
  0x2c   : > { %8071 = vmatpush3.bf16.msra.mxu0 %v8068_v17  ;;  %v8376_v49 = vpack.c.bf16 %v5805_v47, %v5804_v46  ;;  %v2913_v53 = vld [vmem:[%s10992_s5 + $0x8] sm:$0xff]  ;;  %v8092_v54 = vpack.c.bf16 %v442_v51, %v441_v50  ;;  %v443_v56 = vld [vmem:[%s10988_s1 + $0x10] sm:$0xff]  ;;  %v444_v57 = vld [vmem:[%s10988_s1 + $0x18] sm:$0xff] }
  0x2d   : > { %8359 = vmatpush3.bf16.msra.mxu1 %v8356_v18  ;;  %8073 = vmatprep.subr.bf16.mxu0 %v8072_v23  ;;  %v8380_v55 = vpack.c.bf16 %v2913_v53, %v2912_v52  ;;  %v5381_v58 = vld [vmem:[%s9289_s27 + $0x20] sm:$0xff]  ;;  %v2914_v59 = vld [vmem:[%s10992_s5 + $0x10] sm:$0xff]  ;;  %v2915_v60 = vld [vmem:[%s10992_s5 + $0x18] sm:$0xff]  ;;  %v8096_v62 = vpack.c.bf16 %v444_v57, %v443_v56 }
  0x2e   : > { %8361 = vmatprep.subr.bf16.mxu1 %v8360_v24  ;;  %v5382_v61 = vld [vmem:[%s9289_s27 + $0x28] sm:$0xff]  ;;  %v8384_v63 = vpack.c.bf16 %v2915_v60, %v2914_v59  ;;  %v445_v0 = vld [vmem:[%s10988_s1 + $0x20] sm:$0xff]  ;;  %v5383_v2 = vld [vmem:[%s9289_s27 + $0x30] sm:$0xff] }
  0x2f   : > { %v446_v1 = vld [vmem:[%s10988_s1 + $0x28] sm:$0xff]  ;;  %v2916_v3 = vld [vmem:[%s10992_s5 + $0x20] sm:$0xff]  ;;  %v5384_v5 = vld [vmem:[%s9289_s27 + $0x38] sm:$0xff] }
  0x30   : > { %8075 = vmatpush3.bf16.msra.mxu0 %v8072_v23  ;;  %v2917_v4 = vld [vmem:[%s10992_s5 + $0x28] sm:$0xff]  ;;  %v8100_v6 = vpack.c.bf16 %v446_v1, %v445_v0  ;;  %v447_v8 = vld [vmem:[%s10988_s1 + $0x30] sm:$0xff]  ;;  %v448_v9 = vld [vmem:[%s10988_s1 + $0x38] sm:$0xff] }
  0x31   : > { %8363 = vmatpush3.bf16.msra.mxu1 %v8360_v24  ;;  %8077 = vmatprep.subr.bf16.mxu0 %v8076_v30  ;;  %v8388_v7 = vpack.c.bf16 %v2917_v4, %v2916_v3  ;;  %v5385_v10 = vld [vmem:[%s9289_s27 + $0x40] sm:$0xff]  ;;  %v2918_v11 = vld [vmem:[%s10992_s5 + $0x30] sm:$0xff]  ;;  %v2919_v12 = vld [vmem:[%s10992_s5 + $0x38] sm:$0xff]  ;;  %v8104_v14 = vpack.c.bf16 %v448_v9, %v447_v8 }
  0x32   : > { %8365 = vmatprep.subr.bf16.mxu1 %v8364_v31  ;;  %v5386_v13 = vld [vmem:[%s9289_s27 + $0x48] sm:$0xff]  ;;  %v8392_v15 = vpack.c.bf16 %v2919_v12, %v2918_v11  ;;  %v449_v16 = vld [vmem:[%s10988_s1 + $0x40] sm:$0xff]  ;;  %v5387_v18 = vld [vmem:[%s9289_s27 + $0x50] sm:$0xff] }
  0x33   : > { %v450_v17 = vld [vmem:[%s10988_s1 + $0x48] sm:$0xff]  ;;  %v2920_v19 = vld [vmem:[%s10992_s5 + $0x40] sm:$0xff]  ;;  %v5388_v21 = vld [vmem:[%s9289_s27 + $0x58] sm:$0xff] }
  0x34   : > { %8079 = vmatpush3.bf16.msra.mxu0 %v8076_v30  ;;  %v2921_v20 = vld [vmem:[%s10992_s5 + $0x48] sm:$0xff]  ;;  %v8108_v22 = vpack.c.bf16 %v450_v17, %v449_v16  ;;  %v451_v24 = vld [vmem:[%s10988_s1 + $0x50] sm:$0xff]  ;;  %v452_v25 = vld [vmem:[%s10988_s1 + $0x58] sm:$0xff] }
  0x35   : > { %8367 = vmatpush3.bf16.msra.mxu1 %v8364_v31  ;;  %8081 = vmatprep.subr.bf16.mxu0 %v8080_v36  ;;  %v8396_v23 = vpack.c.bf16 %v2921_v20, %v2920_v19  ;;  %v5389_v26 = vld [vmem:[%s9289_s27 + $0x60] sm:$0xff]  ;;  %v2922_v27 = vld [vmem:[%s10992_s5 + $0x50] sm:$0xff]  ;;  %v2923_v28 = vld [vmem:[%s10992_s5 + $0x58] sm:$0xff]  ;;  %v8112_v30 = vpack.c.bf16 %v452_v25, %v451_v24 }
  0x36   : > { %8369 = vmatprep.subr.bf16.mxu1 %v8368_v37  ;;  %v5390_v29 = vld [vmem:[%s9289_s27 + $0x68] sm:$0xff]  ;;  %v8400_v31 = vpack.c.bf16 %v2923_v28, %v2922_v27  ;;  %v453_v32 = vld [vmem:[%s10988_s1 + $0x60] sm:$0xff]  ;;  %v5391_v34 = vld [vmem:[%s9289_s27 + $0x70] sm:$0xff] }
  0x37   : > { %v454_v33 = vld [vmem:[%s10988_s1 + $0x68] sm:$0xff]  ;;  %v2924_v35 = vld [vmem:[%s10992_s5 + $0x60] sm:$0xff]  ;;  %v455_v40 = vld [vmem:[%s10988_s1 + $0x70] sm:$0xff] }
  0x38   : > { %8083 = vmatpush3.bf16.msra.mxu0 %v8080_v36  ;;  %v2925_v36 = vld [vmem:[%s10992_s5 + $0x68] sm:$0xff]  ;;  %v8116_v38 = vpack.c.bf16 %v454_v33, %v453_v32  ;;  %v456_v41 = vld [vmem:[%s10988_s1 + $0x78] sm:$0xff]  ;;  %v5395_v50 = vld [vmem:[%s9289_s27 + $0x90] sm:$0xff] }
  0x39   : > { %8371 = vmatpush3.bf16.msra.mxu1 %v8368_v37  ;;  %8085 = vmatprep.subr.bf16.mxu0 %v8084_v42  ;;  %v5392_v37 = vld [vmem:[%s9289_s27 + $0x78] sm:$0xff]  ;;  %v8404_v39 = vpack.c.bf16 %v2925_v36, %v2924_v35  ;;  %v5394_v45 = vld [vmem:[%s9289_s27 + $0x88] sm:$0xff]  ;;  %v8120_v46 = vpack.c.bf16 %v456_v41, %v455_v40  ;;  %v5830_v51 = vld [vmem:[%s10992_s5 + $0x100] sm:$0xff] }
  0x3a   : > { %8373 = vmatprep.subr.bf16.mxu1 %v8372_v43  ;;  %v2927_v44 = vld [vmem:[%s10992_s5 + $0x78] sm:$0xff]  ;;  %v5831_v52 = vld [vmem:[%s10992_s5 + $0x108] sm:$0xff]  ;;  %v5397_v56 = vld [vmem:[%s9289_s27 + $0xa0] sm:$0xff] }
  0x3b   : > { %v5396_v53 = vld [vmem:[%s9289_s27 + $0x98] sm:$0xff]  ;;  %v5398_v57 = vld [vmem:[%s9289_s27 + $0xa8] sm:$0xff]  ;;  %v5401_v60 = vld [vmem:[%s9289_s27 + $0xc0] sm:$0xff] }
  0x3c   : > { %8087 = vmatpush3.bf16.msra.mxu0 %v8084_v42  ;;  %v5393_v42 = vld [vmem:[%s9289_s27 + $0x80] sm:$0xff]  ;;  %v5400_v59 = vld [vmem:[%s9289_s27 + $0xb8] sm:$0xff]  ;;  %v5448_v0 = vld [vmem:[%s10988_s1 + $0x110] sm:$0xff] }
  0x3d   : > { %8375 = vmatpush3.bf16.msra.mxu1 %v8372_v43  ;;  %8089 = vmatprep.subr.bf16.mxu0 %v8088_v48  ;;  %v2926_v43 = vld [vmem:[%s10992_s5 + $0x70] sm:$0xff]  ;;  %v5449_v1 = vld [vmem:[%s10988_s1 + $0x118] sm:$0xff]  ;;  %v5450_v8 = vld [vmem:[%s10988_s1 + $0x120] sm:$0xff] }
  0x3e   : > { %8377 = vmatprep.subr.bf16.mxu1 %v8376_v49  ;;  %v8408_v47 = vpack.c.bf16 %v2927_v44, %v2926_v43  ;;  %v5832_v3 = vld [vmem:[%s10992_s5 + $0x110] sm:$0xff]  ;;  %v5833_v4 = vld [vmem:[%s10992_s5 + $0x118] sm:$0xff]  ;;  %v5451_v9 = vld [vmem:[%s10988_s1 + $0x128] sm:$0xff] }
  0x3f   : > { %v5834_v11 = vld [vmem:[%s10992_s5 + $0x120] sm:$0xff]  ;;  %v5835_v12 = vld [vmem:[%s10992_s5 + $0x128] sm:$0xff]  ;;  %v5452_v16 = vld [vmem:[%s10988_s1 + $0x130] sm:$0xff] }
  0x40   : > { %8091 = vmatpush3.bf16.msra.mxu0 %v8088_v48  ;;  %v5446_v48 = vld [vmem:[%s10988_s1 + $0x100] sm:$0xff]  ;;  %v5453_v17 = vld [vmem:[%s10988_s1 + $0x138] sm:$0xff]  ;;  %v5836_v19 = vld [vmem:[%s10992_s5 + $0x130] sm:$0xff] }
  0x41   : > { %8379 = vmatpush3.bf16.msra.mxu1 %v8376_v49  ;;  %8093 = vmatprep.subr.bf16.mxu0 %v8092_v54  ;;  %v5447_v49 = vld [vmem:[%s10988_s1 + $0x108] sm:$0xff]  ;;  %v5837_v20 = vld [vmem:[%s10992_s5 + $0x138] sm:$0xff]  ;;  %v5454_v24 = vld [vmem:[%s10988_s1 + $0x140] sm:$0xff] }
  0x42   : > { %8381 = vmatprep.subr.bf16.mxu1 %v8380_v55  ;;  %v5455_v25 = vld [vmem:[%s10988_s1 + $0x148] sm:$0xff]  ;;  %v5838_v27 = vld [vmem:[%s10992_s5 + $0x140] sm:$0xff]  ;;  %v5456_v32 = vld [vmem:[%s10988_s1 + $0x150] sm:$0xff] }
  0x43   : > { %6869 = vmatmul.mubr.f32.vlgmr.msra.gmra.mrb[0].mxu0 %v5381_v58  ;;  %v5839_v28 = vld [vmem:[%s10992_s5 + $0x148] sm:$0xff]  ;;  %v5457_v33 = vld [vmem:[%s10988_s1 + $0x158] sm:$0xff]  ;;  %v5840_v35 = vld [vmem:[%s10992_s5 + $0x150] sm:$0xff] }
  0x44   : > { %7481 = vmatmul.mubr.f32.vlgmr.msra.gmra.mrb[0].mxu1 %v5381_v58  ;;  %8095 = vmatpush3.bf16.msra.mxu0 %v8092_v54  ;;  %v8124_v54 = vpack.c.bf16 %v5447_v49, %v5446_v48  ;;  %v5399_v58 = vld [vmem:[%s9289_s27 + $0xb0] sm:$0xff]  ;;  %v5841_v36 = vld [vmem:[%s10992_s5 + $0x158] sm:$0xff]  ;;  %v5458_v40 = vld [vmem:[%s10988_s1 + $0x160] sm:$0xff] }
  0x45   : > { %6871 = vmatprep.mubr.f32.mxu0 %v5382_v61  ;;  %7483 = vmatprep.mubr.f32.mxu1 %v5382_v61  ;;  %v5402_v61 = vld [vmem:[%s9289_s27 + $0xc8] sm:$0xff]  ;;  %v5842_v43 = vld [vmem:[%s10992_s5 + $0x160] sm:$0xff]  ;;  %v5460_v48 = vld [vmem:[%s10988_s1 + $0x170] sm:$0xff] }
  0x46   : > { %8383 = vmatpush3.bf16.msra.mxu1 %v8380_v55  ;;  %8097 = vmatprep.subr.bf16.mxu0 %v8096_v62  ;;  %v8412_v55 = vpack.c.bf16 %v5831_v52, %v5830_v51  ;;  %v5459_v41 = vld [vmem:[%s10988_s1 + $0x168] sm:$0xff]  ;;  %v5461_v49 = vld [vmem:[%s10988_s1 + $0x178] sm:$0xff]  ;;  %v5844_v51 = vld [vmem:[%s10992_s5 + $0x170] sm:$0xff] }
  0x47   : > { %6872 = vmatmul.mubr.f32.gmra.mrb[2].mxu0 %v5383_v2  ;;  %8385 = vmatprep.subr.bf16.mxu1 %v8384_v63  ;;  %v5843_v44 = vld [vmem:[%s10992_s5 + $0x168] sm:$0xff]  ;;  %v5845_v52 = vld [vmem:[%s10992_s5 + $0x178] sm:$0xff] }
  0x48   : > { %7484 = vmatmul.mubr.f32.gmra.mrb[2].mxu1 %v5383_v2  ;;  %6874 = vmatprep.mubr.f32.mxu0 %v5384_v5  ;;  %v5355_v2 = vld [vmem:[%s9289_s27 + $0x1f] sm:$0xff] }
  0x49   : > { %8099 = vmatpush3.bf16.msra.mxu0 %v8096_v62  ;;  %7486 = vmatprep.mubr.f32.mxu1 %v5384_v5  ;;  %v5403_v62 = vld [vmem:[%s9289_s27 + $0xd0] sm:$0xff]  ;;  %v5356_v5 = vld [vmem:[%s9289_s27 + $0x27] sm:$0xff] }
  0x4a   : > { %8387 = vmatpush3.bf16.msra.mxu1 %v8384_v63  ;;  %8101 = vmatprep.subr.bf16.mxu0 %v8100_v6  ;;  %v5354_v63 = vld [vmem:[%s9289_s27 + $0x17] sm:$0xff] }
  0x4b   : > { %6875 = vmatmul.mubr.f32.gmra.mrb[4].mxu0 %v5385_v10  ;;  %8389 = vmatprep.subr.bf16.mxu1 %v8388_v7 }
  0x4c   : > { %7487 = vmatmul.mubr.f32.gmra.mrb[4].mxu1 %v5385_v10  ;;  %6877 = vmatprep.mubr.f32.mxu0 %v5386_v13  ;;  %v9493_v10 = vld [vmem:[%s9289_s27 + $0x2f] sm:$0xff] }
  0x4d   : > { %7489 = vmatprep.mubr.f32.mxu1 %v5386_v13  ;;  %8103 = vmatpush3.bf16.msra.mxu0 %v8100_v6  ;;  %v8128_v6 = vpack.c.bf16 %v5449_v1, %v5448_v0  ;;  %v9502_v13 = vld [vmem:[%s9289_s27 + $0x37] sm:$0xff]  ;;  %v9640_v0 = vld [vmem:[%s9289_s27 + $0x9f] sm:$0xff]  ;;  %v9644_v1 = vld [vmem:[%s9289_s27 + $0xa7] sm:$0xff] }
  0x4e   : > { %8391 = vmatpush3.bf16.msra.mxu1 %v8388_v7  ;;  %8105 = vmatprep.subr.bf16.mxu0 %v8104_v14  ;;  %v8416_v7 = vpack.c.bf16 %v5833_v4, %v5832_v3  ;;  %v9654_v3 = vld [vmem:[%s9289_s27 + $0xb7] sm:$0xff]  ;;  %v9660_v4 = vld [vmem:[%s9289_s27 + $0xbf] sm:$0xff] }
  0x4f   : > { %6878 = vmatmul.mubr.f32.gmra.mrb[6].mxu0 %v5387_v18  ;;  %8393 = vmatprep.subr.bf16.mxu1 %v8392_v15 }
  0x50   : > { %7490 = vmatmul.mubr.f32.gmra.mrb[6].mxu1 %v5387_v18  ;;  %6880 = vmatprep.mubr.f32.mxu0 %v5388_v21  ;;  %v9514_v18 = vld [vmem:[%s9289_s27 + $0x3f] sm:$0xff] }
  0x51   : > { %7492 = vmatprep.mubr.f32.mxu1 %v5388_v21  ;;  %8107 = vmatpush3.bf16.msra.mxu0 %v8104_v14  ;;  %v8132_v14 = vpack.c.bf16 %v5451_v9, %v5450_v8  ;;  %v9524_v21 = vld [vmem:[%s9289_s27 + $0x47] sm:$0xff]  ;;  %v5490_v8 = vld [vmem:[%s10988_s1 + $0x190] sm:$0xff]  ;;  %v5491_v9 = vld [vmem:[%s10988_s1 + $0x198] sm:$0xff] }
  0x52   : > { %8395 = vmatpush3.bf16.msra.mxu1 %v8392_v15  ;;  %8109 = vmatprep.subr.bf16.mxu0 %v8108_v22  ;;  %v8420_v15 = vpack.c.bf16 %v5835_v12, %v5834_v11  ;;  %v5423_v11 = vld [vmem:[%s9289_s27 + $0x21] sm:$0xff]  ;;  %v5872_v12 = vld [vmem:[%s10992_s5 + $0x190] sm:$0xff] }
  0x53   : > { %6881 = vmatmul.mubr.f32.gmra.mrb[8].mxu0 %v5389_v26  ;;  %8397 = vmatprep.subr.bf16.mxu1 %v8396_v23 }
  0x54   : > { %7493 = vmatmul.mubr.f32.gmra.mrb[8].mxu1 %v5389_v26  ;;  %6883 = vmatprep.mubr.f32.mxu0 %v5390_v29  ;;  %v9536_v26 = vld [vmem:[%s9289_s27 + $0x4f] sm:$0xff] }
  0x55   : > { %7495 = vmatprep.mubr.f32.mxu1 %v5390_v29  ;;  %8111 = vmatpush3.bf16.msra.mxu0 %v8108_v22  ;;  %v8136_v22 = vpack.c.bf16 %v5453_v17, %v5452_v16  ;;  %v9546_v29 = vld [vmem:[%s9289_s27 + $0x57] sm:$0xff]  ;;  %v8160_v16 = vpack.c.bf16 %v5491_v9, %v5490_v8  ;;  %v5882_v8 = vld [vmem:[%s10992_s5 + $0x1e0] sm:$0xff]  ;;  %v5883_v9 = vld [vmem:[%s10992_s5 + $0x1e8] sm:$0xff] }
  0x56   : > { %8399 = vmatpush3.bf16.msra.mxu1 %v8396_v23  ;;  %8113 = vmatprep.subr.bf16.mxu0 %v8112_v30  ;;  %v8424_v23 = vpack.c.bf16 %v5837_v20, %v5836_v19  ;;  %v5492_v19 = vld [vmem:[%s10988_s1 + $0x1a0] sm:$0xff]  ;;  %v5493_v20 = vld [vmem:[%s10988_s1 + $0x1a8] sm:$0xff] }
  0x57   : > { %6884 = vmatmul.mubr.f32.gmra.mrb[10].mxu0 %v5391_v34  ;;  %8401 = vmatprep.subr.bf16.mxu1 %v8400_v31 }
  0x58   : > { %7496 = vmatmul.mubr.f32.gmra.mrb[10].mxu1 %v5391_v34  ;;  %6886 = vmatprep.mubr.f32.mxu0 %v5392_v37  ;;  %v9558_v34 = vld [vmem:[%s9289_s27 + $0x5f] sm:$0xff] }
  0x59   : > { %7498 = vmatprep.mubr.f32.mxu1 %v5392_v37  ;;  %8115 = vmatpush3.bf16.msra.mxu0 %v8112_v30  ;;  %v8140_v30 = vpack.c.bf16 %v5455_v25, %v5454_v24  ;;  %v9568_v37 = vld [vmem:[%s9289_s27 + $0x67] sm:$0xff]  ;;  %v9706_v25 = vld [vmem:[%s9289_s27 + $0x39] sm:$0xff] }
  0x5a   : > { %8403 = vmatpush3.bf16.msra.mxu1 %v8400_v31  ;;  %8117 = vmatprep.subr.bf16.mxu0 %v8116_v38  ;;  %v8428_v31 = vpack.c.bf16 %v5839_v28, %v5838_v27  ;;  %v5875_v24 = vld [vmem:[%s10992_s5 + $0x1a8] sm:$0xff]  ;;  %v8164_v27 = vpack.c.bf16 %v5493_v20, %v5492_v19  ;;  %v5884_v19 = vld [vmem:[%s10992_s5 + $0x1f0] sm:$0xff]  ;;  %v5885_v20 = vld [vmem:[%s10992_s5 + $0x1f8] sm:$0xff] }
  0x5b   : > { %6887 = vmatmul.mubr.f32.gmra.mrb[12].mxu0 %v5393_v42  ;;  %8405 = vmatprep.subr.bf16.mxu1 %v8404_v39 }
  0x5c   : > { %7499 = vmatmul.mubr.f32.gmra.mrb[12].mxu1 %v5393_v42  ;;  %6889 = vmatprep.mubr.f32.mxu0 %v5394_v45  ;;  %v9580_v42 = vld [vmem:[%s9289_s27 + $0x6f] sm:$0xff] }
  0x5d   : > { %7501 = vmatprep.mubr.f32.mxu1 %v5394_v45  ;;  %8119 = vmatpush3.bf16.msra.mxu0 %v8116_v38  ;;  %v8144_v38 = vpack.c.bf16 %v5457_v33, %v5456_v32  ;;  %v9590_v45 = vld [vmem:[%s9289_s27 + $0x77] sm:$0xff]  ;;  %v9718_v32 = vld [vmem:[%s9289_s27 + $0x41] sm:$0xff] }
  0x5e   : > { %8407 = vmatpush3.bf16.msra.mxu1 %v8404_v39  ;;  %8121 = vmatprep.subr.bf16.mxu0 %v8120_v46  ;;  %v8432_v39 = vpack.c.bf16 %v5841_v36, %v5840_v35  ;;  %v5876_v33 = vld [vmem:[%s10992_s5 + $0x1b0] sm:$0xff]  ;;  %v5877_v35 = vld [vmem:[%s10992_s5 + $0x1b8] sm:$0xff] }
  0x5f   : > { %6890 = vmatmul.mubr.f32.gmra.mrb[14].mxu0 %v5395_v50  ;;  %8409 = vmatprep.subr.bf16.mxu1 %v8408_v47  ;;  %v9728_v36 = vld [vmem:[%s9289_s27 + $0x49] sm:$0xff] }
  0x60   : > { %7502 = vmatmul.mubr.f32.gmra.mrb[14].mxu1 %v5395_v50  ;;  %6892 = vmatprep.mubr.f32.mxu0 %v5396_v53  ;;  %v9602_v50 = vld [vmem:[%s9289_s27 + $0x7f] sm:$0xff] }
  0x61   : > { %7504 = vmatprep.mubr.f32.mxu1 %v5396_v53  ;;  %8123 = vmatpush3.bf16.msra.mxu0 %v8120_v46  ;;  %v8148_v46 = vpack.c.bf16 %v5459_v41, %v5458_v40  ;;  %v9612_v53 = vld [vmem:[%s9289_s27 + $0x87] sm:$0xff] }
  0x62   : > { %8411 = vmatpush3.bf16.msra.mxu1 %v8408_v47  ;;  %8125 = vmatprep.subr.bf16.mxu0 %v8124_v54  ;;  %v8436_v47 = vpack.c.bf16 %v5843_v44, %v5842_v43  ;;  %v5496_v40 = vld [vmem:[%s10988_s1 + $0x1c0] sm:$0xff]  ;;  %v5497_v41 = vld [vmem:[%s10988_s1 + $0x1c8] sm:$0xff]  ;;  %v9740_v43 = vld [vmem:[%s9289_s27 + $0x51] sm:$0xff] }
  0x63   : > { %6893 = vmatmul.mubr.f32.gmra.mrb[16].mxu0 %v5397_v56  ;;  %8413 = vmatprep.subr.bf16.mxu1 %v8412_v55  ;;  %v5878_v44 = vld [vmem:[%s10992_s5 + $0x1c0] sm:$0xff] }
  0x64   : > { %7505 = vmatmul.mubr.f32.gmra.mrb[16].mxu1 %v5397_v56  ;;  %6895 = vmatprep.mubr.f32.mxu0 %v5398_v57  ;;  %v5488_v56 = vld [vmem:[%s10988_s1 + $0x180] sm:$0xff] }
  0x65   : > { %7507 = vmatprep.mubr.f32.mxu1 %v5398_v57  ;;  %v5489_v57 = vld [vmem:[%s10988_s1 + $0x188] sm:$0xff] }
  0x67   : > { %6896 = vmatmul.mubr.f32.gmra.mrb[18].mxu0 %v5399_v58 }
  0x68   : > { %7508 = vmatmul.mubr.f32.gmra.mrb[18].mxu1 %v5399_v58  ;;  %6898 = vmatprep.mubr.f32.mxu0 %v5400_v59  ;;  %v9624_v58 = vld [vmem:[%s9289_s27 + $0x8f] sm:$0xff] }
  0x69   : > { %7510 = vmatprep.mubr.f32.mxu1 %v5400_v59  ;;  %v5870_v59 = vld [vmem:[%s10992_s5 + $0x180] sm:$0xff] }
  0x6b   : > { %6899 = vmatmul.mubr.f32.gmra.mrb[20].mxu0 %v5401_v60 }
  0x6c   : > { %7511 = vmatmul.mubr.f32.gmra.mrb[20].mxu1 %v5401_v60  ;;  %6901 = vmatprep.mubr.f32.mxu0 %v5402_v61  ;;  %v5871_v60 = vld [vmem:[%s10992_s5 + $0x188] sm:$0xff] }
  0x6d   : > { %7513 = vmatprep.mubr.f32.mxu1 %v5402_v61  ;;  %v9634_v61 = vld [vmem:[%s9289_s27 + $0x97] sm:$0xff] }
  0x6f   : > { %6902 = vmatmul.mubr.f32.gmra.mrb[22].mxu0 %v5403_v62 }
  0x70   : > { %7514 = vmatmul.mubr.f32.gmra.mrb[22].mxu1 %v5403_v62  ;;  %6936 = vmatprep.mubr.f32.mxu0 %v5354_v63  ;;  %v8156_v62 = vpack.c.bf16 %v5489_v57, %v5488_v56  ;;  %v5881_v56 = vld [vmem:[%s10992_s5 + $0x1d8] sm:$0xff]  ;;  %v9772_v57 = vld [vmem:[%s9289_s27 + $0x69] sm:$0xff] }
  0x71   : > { %7548 = vmatprep.mubr.f32.mxu1 %v5354_v63  ;;  %v8444_v63 = vpack.c.bf16 %v5871_v60, %v5870_v59 }
  0x73   : > { %6937 = vmatmul.mubr.f32.vlgmr.msra.gmra.mrb[0].mxu0 %v5355_v2 }
  0x74   : > { %7549 = vmatmul.mubr.f32.vlgmr.msra.gmra.mrb[0].mxu1 %v5355_v2  ;;  %8127 = vmatpush3.bf16.msra.mxu0 %v8124_v54  ;;  %v8152_v54 = vpack.c.bf16 %v5461_v49, %v5460_v48  ;;  %v9650_v2 = vld [vmem:[%s9289_s27 + $0xaf] sm:$0xff]  ;;  %v8172_v48 = vpack.c.bf16 %v5497_v41, %v5496_v40  ;;  %v9844_v41 = vld [vmem:[%s9289_s27 + $0xa1] sm:$0xff] }
  0x75   : > { %6939 = vmatprep.mubr.f32.mxu0 %v5356_v5  ;;  %7551 = vmatprep.mubr.f32.mxu1 %v5356_v5  ;;  %v9664_v5 = vld [vmem:[%s9289_s27 + $0xc7] sm:$0xff] }
  0x76   : > { %8415 = vmatpush3.bf16.msra.mxu1 %v8412_v55  ;;  %8129 = vmatprep.subr.bf16.mxu0 %v8128_v6  ;;  %v8440_v55 = vpack.c.bf16 %v5845_v52, %v5844_v51  ;;  %v5498_v51 = vld [vmem:[%s10988_s1 + $0x1d0] sm:$0xff]  ;;  %v5499_v52 = vld [vmem:[%s10988_s1 + $0x1d8] sm:$0xff] }
  0x77   : > { %6940 = vmatmul.mubr.f32.gmra.mrb[2].mxu0 %v9493_v10  ;;  %8417 = vmatprep.subr.bf16.mxu1 %v8416_v7  ;;  %v8176_v59 = vpack.c.bf16 %v5499_v52, %v5498_v51  ;;  %v9868_v51 = vld [vmem:[%s9289_s27 + $0xc9] sm:$0xff]  ;;  %v9874_v52 = vld [vmem:[%s9289_s27 + $0xd1] sm:$0xff] }
  0x78   : > { %7552 = vmatmul.mubr.f32.gmra.mrb[2].mxu1 %v9493_v10  ;;  %6942 = vmatprep.mubr.f32.mxu0 %v9502_v13 }
  0x79   : > { %8131 = vmatpush3.bf16.msra.mxu0 %v8128_v6  ;;  %7554 = vmatprep.mubr.f32.mxu1 %v9502_v13  ;;  %v9670_v6 = vld [vmem:[%s9289_s27 + $0xcf] sm:$0xff] }
  0x7a   : > { %8419 = vmatpush3.bf16.msra.mxu1 %v8416_v7  ;;  %8133 = vmatprep.subr.bf16.mxu0 %v8132_v14  ;;  %v5422_v7 = vld [vmem:[%s9289_s27 + $0x19] sm:$0xff] }
  0x7b   : > { %6943 = vmatmul.mubr.f32.gmra.mrb[4].mxu0 %v9514_v18  ;;  %8421 = vmatprep.subr.bf16.mxu1 %v8420_v15 }
  0x7c   : > { %7555 = vmatmul.mubr.f32.gmra.mrb[4].mxu1 %v9514_v18  ;;  %6945 = vmatprep.mubr.f32.mxu0 %v9524_v21 }
  0x7d   : > { %7557 = vmatprep.mubr.f32.mxu1 %v9524_v21  ;;  %8135 = vmatpush3.bf16.msra.mxu0 %v8132_v14  ;;  %v5873_v14 = vld [vmem:[%s10992_s5 + $0x198] sm:$0xff] }
  0x7e   : > { %8423 = vmatpush3.bf16.msra.mxu1 %v8420_v15  ;;  %8137 = vmatprep.subr.bf16.mxu0 %v8136_v22  ;;  %v5424_v15 = vld [vmem:[%s9289_s27 + $0x29] sm:$0xff]  ;;  %v8448_v17 = vpack.c.bf16 %v5873_v14, %v5872_v12  ;;  %v8468_v14 = vpack.c.bf16 %v5883_v9, %v5882_v8  ;;  %v5534_v8 = vld [vmem:[%s10988_s1 + $0x220] sm:$0xff] }
  0x7f   : > { %6946 = vmatmul.mubr.f32.gmra.mrb[6].mxu0 %v9536_v26  ;;  %8425 = vmatprep.subr.bf16.mxu1 %v8424_v23  ;;  %v5535_v9 = vld [vmem:[%s10988_s1 + $0x228] sm:$0xff] }
  0x80   : > { %7558 = vmatmul.mubr.f32.gmra.mrb[6].mxu1 %v9536_v26  ;;  %6948 = vmatprep.mubr.f32.mxu0 %v9546_v29 }
  0x81   : > { %7560 = vmatprep.mubr.f32.mxu1 %v9546_v29  ;;  %8139 = vmatpush3.bf16.msra.mxu0 %v8136_v22  ;;  %v9697_v22 = vld [vmem:[%s9289_s27 + $0x31] sm:$0xff] }
  0x82   : > { %8427 = vmatpush3.bf16.msra.mxu1 %v8424_v23  ;;  %8141 = vmatprep.subr.bf16.mxu0 %v8140_v30  ;;  %v5874_v23 = vld [vmem:[%s10992_s5 + $0x1a0] sm:$0xff] }
  0x83   : > { %6949 = vmatmul.mubr.f32.gmra.mrb[8].mxu0 %v9558_v34  ;;  %8429 = vmatprep.subr.bf16.mxu1 %v8428_v31  ;;  %v8452_v28 = vpack.c.bf16 %v5875_v24, %v5874_v23  ;;  %v9816_v23 = vld [vmem:[%s9289_s27 + $0x89] sm:$0xff] }
  0x84   : > { %7561 = vmatmul.mubr.f32.gmra.mrb[8].mxu1 %v9558_v34  ;;  %6951 = vmatprep.mubr.f32.mxu0 %v9568_v37 }
  0x85   : > { %7563 = vmatprep.mubr.f32.mxu1 %v9568_v37  ;;  %8143 = vmatpush3.bf16.msra.mxu0 %v8140_v30  ;;  %v5494_v30 = vld [vmem:[%s10988_s1 + $0x1b0] sm:$0xff] }
  0x86   : > { %8431 = vmatpush3.bf16.msra.mxu1 %v8428_v31  ;;  %8145 = vmatprep.subr.bf16.mxu0 %v8144_v38  ;;  %v5495_v31 = vld [vmem:[%s10988_s1 + $0x1b8] sm:$0xff] }
  0x87   : > { %6952 = vmatmul.mubr.f32.gmra.mrb[10].mxu0 %v9580_v42  ;;  %8433 = vmatprep.subr.bf16.mxu1 %v8432_v39 }
  0x88   : > { %7564 = vmatmul.mubr.f32.gmra.mrb[10].mxu1 %v9580_v42  ;;  %6954 = vmatprep.mubr.f32.mxu0 %v9590_v45 }
  0x89   : > { %7566 = vmatprep.mubr.f32.mxu1 %v9590_v45  ;;  %8147 = vmatpush3.bf16.msra.mxu0 %v8144_v38  ;;  %v8168_v38 = vpack.c.bf16 %v5495_v31, %v5494_v30  ;;  %v5531_v30 = vld [vmem:[%s10988_s1 + $0x208] sm:$0xff]  ;;  %v9828_v31 = vld [vmem:[%s9289_s27 + $0x91] sm:$0xff] }
  0x8a   : > { %8435 = vmatpush3.bf16.msra.mxu1 %v8432_v39  ;;  %8149 = vmatprep.subr.bf16.mxu0 %v8148_v46  ;;  %v8456_v39 = vpack.c.bf16 %v5877_v35, %v5876_v33  ;;  %v5910_v33 = vld [vmem:[%s10992_s5 + $0x200] sm:$0xff]  ;;  %v5911_v35 = vld [vmem:[%s10992_s5 + $0x208] sm:$0xff] }
  0x8b   : > { %6955 = vmatmul.mubr.f32.gmra.mrb[12].mxu0 %v9602_v50  ;;  %8437 = vmatprep.subr.bf16.mxu1 %v8436_v47  ;;  %v8476_v40 = vpack.c.bf16 %v5911_v35, %v5910_v33  ;;  %v5540_v33 = vld [vmem:[%s10988_s1 + $0x250] sm:$0xff]  ;;  %v5541_v35 = vld [vmem:[%s10988_s1 + $0x258] sm:$0xff] }
  0x8c   : > { %7567 = vmatmul.mubr.f32.gmra.mrb[12].mxu1 %v9602_v50  ;;  %6957 = vmatprep.mubr.f32.mxu0 %v9612_v53 }
  0x8d   : > { %7569 = vmatprep.mubr.f32.mxu1 %v9612_v53  ;;  %8151 = vmatpush3.bf16.msra.mxu0 %v8148_v46  ;;  %v5879_v46 = vld [vmem:[%s10992_s5 + $0x1c8] sm:$0xff] }
  0x8e   : > { %8439 = vmatpush3.bf16.msra.mxu1 %v8436_v47  ;;  %8153 = vmatprep.subr.bf16.mxu0 %v8152_v54  ;;  %v9750_v47 = vld [vmem:[%s9289_s27 + $0x59] sm:$0xff]  ;;  %v8460_v49 = vpack.c.bf16 %v5879_v46, %v5878_v44  ;;  %v9848_v44 = vld [vmem:[%s9289_s27 + $0xa9] sm:$0xff]  ;;  %v9854_v46 = vld [vmem:[%s9289_s27 + $0xb1] sm:$0xff] }
  0x8f   : > { %6958 = vmatmul.mubr.f32.gmra.mrb[14].mxu0 %v9624_v58  ;;  %8441 = vmatprep.subr.bf16.mxu1 %v8440_v55 }
  0x90   : > { %7570 = vmatmul.mubr.f32.gmra.mrb[14].mxu1 %v9624_v58  ;;  %6960 = vmatprep.mubr.f32.mxu0 %v9634_v61 }
  0x91   : > { %7572 = vmatprep.mubr.f32.mxu1 %v9634_v61  ;;  %8155 = vmatpush3.bf16.msra.mxu0 %v8152_v54  ;;  %v9762_v54 = vld [vmem:[%s9289_s27 + $0x61] sm:$0xff] }
  0x92   : > { %8443 = vmatpush3.bf16.msra.mxu1 %v8440_v55  ;;  %8157 = vmatprep.subr.bf16.mxu0 %v8156_v62  ;;  %v5880_v55 = vld [vmem:[%s10992_s5 + $0x1d0] sm:$0xff] }
  0x93   : > { %6961 = vmatmul.mubr.f32.gmra.mrb[16].mxu0 %v9640_v0  ;;  %8445 = vmatprep.subr.bf16.mxu1 %v8444_v63  ;;  %v8464_v60 = vpack.c.bf16 %v5881_v56, %v5880_v55  ;;  %v5532_v55 = vld [vmem:[%s10988_s1 + $0x210] sm:$0xff]  ;;  %v5533_v56 = vld [vmem:[%s10988_s1 + $0x218] sm:$0xff] }
  0x94   : > { %7573 = vmatmul.mubr.f32.gmra.mrb[16].mxu1 %v9640_v0  ;;  %6963 = vmatprep.mubr.f32.mxu0 %v9644_v1 }
  0x95   : > { %7575 = vmatprep.mubr.f32.mxu1 %v9644_v1 }
  0x97   : > { %6964 = vmatmul.mubr.f32.gmra.mrb[18].mxu0 %v9650_v2 }
  0x98   : > { %7576 = vmatmul.mubr.f32.gmra.mrb[18].mxu1 %v9650_v2  ;;  %6966 = vmatprep.mubr.f32.mxu0 %v9654_v3 }
  0x99   : > { %7578 = vmatprep.mubr.f32.mxu1 %v9654_v3 }
  0x9b   : > { %6967 = vmatmul.mubr.f32.gmra.mrb[20].mxu0 %v9660_v4 }
  0x9c   : > { %7579 = vmatmul.mubr.f32.gmra.mrb[20].mxu1 %v9660_v4  ;;  %6969 = vmatprep.mubr.f32.mxu0 %v9664_v5 }
  0x9d   : > { %7581 = vmatprep.mubr.f32.mxu1 %v9664_v5 }
  0x9f   : > { %6970 = vmatmul.mubr.f32.gmra.mrb[22].mxu0 %v9670_v6 }
  0xa0   : > { %7582 = vmatmul.mubr.f32.gmra.mrb[22].mxu1 %v9670_v6  ;;  %7004 = vmatprep.mubr.f32.mxu0 %v5422_v7 }
  0xa1   : > { %7616 = vmatprep.mubr.f32.mxu1 %v5422_v7  ;;  %v9784_v7 = vld [vmem:[%s9289_s27 + $0x71] sm:$0xff] }
  0xa3   : > { %7005 = vmatmul.mubr.f32.vlgmr.msra.gmra.mrb[0].mxu0 %v5423_v11 }
  0xa4   : > { %7617 = vmatmul.mubr.f32.vlgmr.msra.gmra.mrb[0].mxu1 %v5423_v11  ;;  %8159 = vmatpush3.bf16.msra.mxu0 %v8156_v62  ;;  %v5500_v62 = vld [vmem:[%s10988_s1 + $0x1e0] sm:$0xff] }
  0xa5   : > { %7007 = vmatprep.mubr.f32.mxu0 %v5424_v15  ;;  %7619 = vmatprep.mubr.f32.mxu1 %v5424_v15  ;;  %v9794_v11 = vld [vmem:[%s9289_s27 + $0x79] sm:$0xff]  ;;  %v5502_v15 = vld [vmem:[%s10988_s1 + $0x1f0] sm:$0xff] }
  0xa6   : > { %8447 = vmatpush3.bf16.msra.mxu1 %v8444_v63  ;;  %8161 = vmatprep.subr.bf16.mxu0 %v8160_v16  ;;  %v5501_v63 = vld [vmem:[%s10988_s1 + $0x1e8] sm:$0xff] }
  0xa7   : > { %7008 = vmatmul.mubr.f32.gmra.mrb[2].mxu0 %v9697_v22  ;;  %8449 = vmatprep.subr.bf16.mxu1 %v8448_v17  ;;  %v8180_v12 = vpack.c.bf16 %v5501_v63, %v5500_v62  ;;  %v8192_v62 = vpack.c.bf16 %v5533_v56, %v5532_v55  ;;  %v5542_v55 = vld [vmem:[%s10988_s1 + $0x260] sm:$0xff]  ;;  %v5543_v56 = vld [vmem:[%s10988_s1 + $0x268] sm:$0xff] }
  0xa8   : > { %7620 = vmatmul.mubr.f32.gmra.mrb[2].mxu1 %v9697_v22  ;;  %7010 = vmatprep.mubr.f32.mxu0 %v9706_v25 }
  0xa9   : > { %8163 = vmatpush3.bf16.msra.mxu0 %v8160_v16  ;;  %7622 = vmatprep.mubr.f32.mxu1 %v9706_v25  ;;  %v5503_v16 = vld [vmem:[%s10988_s1 + $0x1f8] sm:$0xff] }
  0xaa   : > { %8451 = vmatpush3.bf16.msra.mxu1 %v8448_v17  ;;  %8165 = vmatprep.subr.bf16.mxu0 %v8164_v27  ;;  %v9806_v17 = vld [vmem:[%s9289_s27 + $0x81] sm:$0xff]  ;;  %v8184_v24 = vpack.c.bf16 %v5503_v16, %v5502_v15  ;;  %v5536_v15 = vld [vmem:[%s10988_s1 + $0x230] sm:$0xff]  ;;  %v5537_v16 = vld [vmem:[%s10988_s1 + $0x238] sm:$0xff] }
  0xab   : > { %7011 = vmatmul.mubr.f32.gmra.mrb[4].mxu0 %v9718_v32  ;;  %8453 = vmatprep.subr.bf16.mxu1 %v8452_v28 }
  0xac   : > { %7623 = vmatmul.mubr.f32.gmra.mrb[4].mxu1 %v9718_v32  ;;  %7013 = vmatprep.mubr.f32.mxu0 %v9728_v36 }
  0xad   : > { %7625 = vmatprep.mubr.f32.mxu1 %v9728_v36  ;;  %8167 = vmatpush3.bf16.msra.mxu0 %v8164_v27  ;;  %v8472_v27 = vpack.c.bf16 %v5885_v20, %v5884_v19  ;;  %v5917_v19 = vld [vmem:[%s10992_s5 + $0x238] sm:$0xff]  ;;  %v8200_v20 = vpack.c.bf16 %v5537_v16, %v5536_v15  ;;  %v5952_v15 = vld [vmem:[%s10992_s5 + $0x290] sm:$0xff] }
  0xae   : > { %8455 = vmatpush3.bf16.msra.mxu1 %v8452_v28  ;;  %8169 = vmatprep.subr.bf16.mxu0 %v8168_v38  ;;  %v5530_v28 = vld [vmem:[%s10988_s1 + $0x200] sm:$0xff]  ;;  %v5953_v16 = vld [vmem:[%s10992_s5 + $0x298] sm:$0xff] }
  0xaf   : > { %7014 = vmatmul.mubr.f32.gmra.mrb[6].mxu0 %v9740_v43  ;;  %8457 = vmatprep.subr.bf16.mxu1 %v8456_v39 }
  0xb0   : > { %7626 = vmatmul.mubr.f32.gmra.mrb[6].mxu1 %v9740_v43  ;;  %7016 = vmatprep.mubr.f32.mxu0 %v9750_v47 }
  0xb1   : > { %7628 = vmatprep.mubr.f32.mxu1 %v9750_v47  ;;  %8171 = vmatpush3.bf16.msra.mxu0 %v8168_v38  ;;  %v9838_v38 = vld [vmem:[%s9289_s27 + $0x99] sm:$0xff] }
  0xb2   : > { %8459 = vmatpush3.bf16.msra.mxu1 %v8456_v39  ;;  %8173 = vmatprep.subr.bf16.mxu0 %v8172_v48  ;;  %v8188_v39 = vpack.c.bf16 %v5531_v30, %v5530_v28  ;;  %v5919_v28 = vld [vmem:[%s10992_s5 + $0x248] sm:$0xff] }
  0xb3   : > { %7017 = vmatmul.mubr.f32.gmra.mrb[8].mxu0 %v9762_v54  ;;  %8461 = vmatprep.subr.bf16.mxu1 %v8460_v49 }
  0xb4   : > { %7629 = vmatmul.mubr.f32.gmra.mrb[8].mxu1 %v9762_v54  ;;  %7019 = vmatprep.mubr.f32.mxu0 %v9772_v57 }
  0xb5   : > { %7631 = vmatprep.mubr.f32.mxu1 %v9772_v57  ;;  %8175 = vmatpush3.bf16.msra.mxu0 %v8172_v48  ;;  %v9858_v48 = vld [vmem:[%s9289_s27 + $0xb9] sm:$0xff] }
  0xb6   : > { %8463 = vmatpush3.bf16.msra.mxu1 %v8460_v49  ;;  %8177 = vmatprep.subr.bf16.mxu0 %v8176_v59  ;;  %v9864_v49 = vld [vmem:[%s9289_s27 + $0xc1] sm:$0xff] }
  0xb7   : > { %7020 = vmatmul.mubr.f32.gmra.mrb[10].mxu0 %v9784_v7  ;;  %8465 = vmatprep.subr.bf16.mxu1 %v8464_v60 }
  0xb8   : > { %7632 = vmatmul.mubr.f32.gmra.mrb[10].mxu1 %v9784_v7  ;;  %7022 = vmatprep.mubr.f32.mxu0 %v9794_v11 }
  0xb9   : > { %7634 = vmatprep.mubr.f32.mxu1 %v9794_v11  ;;  %8179 = vmatpush3.bf16.msra.mxu0 %v8176_v59  ;;  %v5912_v59 = vld [vmem:[%s10992_s5 + $0x210] sm:$0xff] }
  0xba   : > { %8467 = vmatpush3.bf16.msra.mxu1 %v8464_v60  ;;  %8181 = vmatprep.subr.bf16.mxu0 %v8180_v12  ;;  %v5913_v60 = vld [vmem:[%s10992_s5 + $0x218] sm:$0xff] }
  0xbb   : > { %7023 = vmatmul.mubr.f32.gmra.mrb[12].mxu0 %v9806_v17  ;;  %8469 = vmatprep.subr.bf16.mxu1 %v8468_v14  ;;  %v8480_v63 = vpack.c.bf16 %v5913_v60, %v5912_v59  ;;  %v5923_v59 = vld [vmem:[%s10992_s5 + $0x268] sm:$0xff]  ;;  %v8212_v60 = vpack.c.bf16 %v5543_v56, %v5542_v55  ;;  %v10085_v55 = vld [vmem:[%s9289_s27 + $0x60] sm:$0xff] }
  0xbc   : > { %7635 = vmatmul.mubr.f32.gmra.mrb[12].mxu1 %v9806_v17  ;;  %7025 = vmatprep.mubr.f32.mxu0 %v9816_v23 }
  0xbd   : > { %7637 = vmatprep.mubr.f32.mxu1 %v9816_v23  ;;  %8183 = vmatpush3.bf16.msra.mxu0 %v8180_v12  ;;  %v5914_v12 = vld [vmem:[%s10992_s5 + $0x220] sm:$0xff] }
  0xbe   : > { %8471 = vmatpush3.bf16.msra.mxu1 %v8468_v14  ;;  %8185 = vmatprep.subr.bf16.mxu0 %v8184_v24  ;;  %v8196_v14 = vpack.c.bf16 %v5535_v9, %v5534_v8  ;;  %v5925_v8 = vld [vmem:[%s10992_s5 + $0x278] sm:$0xff] }
  0xbf   : > { %7026 = vmatmul.mubr.f32.gmra.mrb[14].mxu0 %v9828_v31  ;;  %8473 = vmatprep.subr.bf16.mxu1 %v8472_v27 }
  0xc0   : > { %7638 = vmatmul.mubr.f32.gmra.mrb[14].mxu1 %v9828_v31  ;;  %7028 = vmatprep.mubr.f32.mxu0 %v9838_v38 }
  0xc1   : > { %7640 = vmatprep.mubr.f32.mxu1 %v9838_v38  ;;  %8187 = vmatpush3.bf16.msra.mxu0 %v8184_v24  ;;  %v5538_v24 = vld [vmem:[%s10988_s1 + $0x240] sm:$0xff] }
  0xc2   : > { %8475 = vmatpush3.bf16.msra.mxu1 %v8472_v27  ;;  %8189 = vmatprep.subr.bf16.mxu0 %v8188_v39  ;;  %v5539_v27 = vld [vmem:[%s10988_s1 + $0x248] sm:$0xff] }
  0xc3   : > { %7029 = vmatmul.mubr.f32.gmra.mrb[16].mxu0 %v9844_v41  ;;  %8477 = vmatprep.subr.bf16.mxu1 %v8476_v40  ;;  %v8204_v30 = vpack.c.bf16 %v5539_v27, %v5538_v24  ;;  %v5577_v24 = vld [vmem:[%s10988_s1 + $0x2a8] sm:$0xff] }
  0xc4   : > { %7641 = vmatmul.mubr.f32.gmra.mrb[16].mxu1 %v9844_v41  ;;  %7031 = vmatprep.mubr.f32.mxu0 %v9848_v44  ;;  %v10054_v27 = vld [vmem:[%s9289_s27 + $0x48] sm:$0xff] }
  0xc5   : > { %7643 = vmatprep.mubr.f32.mxu1 %v9848_v44 }
  0xc7   : > { %7032 = vmatmul.mubr.f32.gmra.mrb[18].mxu0 %v9854_v46 }
  0xc8   : > { %7644 = vmatmul.mubr.f32.gmra.mrb[18].mxu1 %v9854_v46  ;;  %7034 = vmatprep.mubr.f32.mxu0 %v9858_v48 }
  0xc9   : > { %7646 = vmatprep.mubr.f32.mxu1 %v9858_v48 }
  0xcb   : > { %7035 = vmatmul.mubr.f32.gmra.mrb[20].mxu0 %v9864_v49 }
  0xcc   : > { %7647 = vmatmul.mubr.f32.gmra.mrb[20].mxu1 %v9864_v49  ;;  %7037 = vmatprep.mubr.f32.mxu0 %v9868_v51 }
  0xcd   : > { %7649 = vmatprep.mubr.f32.mxu1 %v9868_v51 }
  0xcf   : > { %7038 = vmatmul.mubr.f32.gmra.mrb[22].mxu0 %v9874_v52 }
  0xd0   : > { %7650 = vmatmul.mubr.f32.gmra.mrb[22].mxu1 %v9874_v52  ;;  %7072 = vmatprep.mubr.f32.mxu0 %v9493_v10 }
  0xd1   : > { %7684 = vmatprep.mubr.f32.mxu1 %v9493_v10  ;;  %v5915_v10 = vld [vmem:[%s10992_s5 + $0x228] sm:$0xff] }
  0xd3   : > { %7073 = vmatmul.mubr.f32.vlgmr.msra.gmra.mrb[0].mxu0 %v9502_v13 }
  0xd4   : > { %7685 = vmatmul.mubr.f32.vlgmr.msra.gmra.mrb[0].mxu1 %v9502_v13  ;;  %8191 = vmatpush3.bf16.msra.mxu0 %v8188_v39  ;;  %v8484_v13 = vpack.c.bf16 %v5915_v10, %v5914_v12  ;;  %v5921_v39 = vld [vmem:[%s10992_s5 + $0x258] sm:$0xff]  ;;  %v5572_v12 = vld [vmem:[%s10988_s1 + $0x280] sm:$0xff]  ;;  %v5573_v10 = vld [vmem:[%s10988_s1 + $0x288] sm:$0xff] }
  0xd5   : > { %7075 = vmatprep.mubr.f32.mxu0 %v9514_v18  ;;  %7687 = vmatprep.mubr.f32.mxu1 %v9514_v18  ;;  %v5916_v18 = vld [vmem:[%s10992_s5 + $0x230] sm:$0xff] }
  0xd6   : > { %8479 = vmatpush3.bf16.msra.mxu1 %v8476_v40  ;;  %8193 = vmatprep.subr.bf16.mxu0 %v8192_v62  ;;  %v8208_v40 = vpack.c.bf16 %v5541_v35, %v5540_v33  ;;  %v5578_v35 = vld [vmem:[%s10988_s1 + $0x2b0] sm:$0xff] }
  0xd7   : > { %7076 = vmatmul.mubr.f32.gmra.mrb[2].mxu0 %v9524_v21  ;;  %8481 = vmatprep.subr.bf16.mxu1 %v8480_v63 }
  0xd8   : > { %7688 = vmatmul.mubr.f32.gmra.mrb[2].mxu1 %v9524_v21  ;;  %7078 = vmatprep.mubr.f32.mxu0 %v9536_v26  ;;  %v8488_v21 = vpack.c.bf16 %v5917_v19, %v5916_v18  ;;  %v5508_v18 = vld [vmem:[%s9289_s27 + $0x40] sm:$0xff] }
  0xd9   : > { %8195 = vmatpush3.bf16.msra.mxu0 %v8192_v62  ;;  %7690 = vmatprep.mubr.f32.mxu1 %v9536_v26  ;;  %v5918_v26 = vld [vmem:[%s10992_s5 + $0x240] sm:$0xff]  ;;  %v5544_v62 = vld [vmem:[%s10988_s1 + $0x270] sm:$0xff] }
  0xda   : > { %8483 = vmatpush3.bf16.msra.mxu1 %v8480_v63  ;;  %8197 = vmatprep.subr.bf16.mxu0 %v8196_v14  ;;  %v5545_v63 = vld [vmem:[%s10988_s1 + $0x278] sm:$0xff] }
  0xdb   : > { %7079 = vmatmul.mubr.f32.gmra.mrb[4].mxu0 %v9546_v29  ;;  %8485 = vmatprep.subr.bf16.mxu1 %v8484_v13  ;;  %v8216_v9 = vpack.c.bf16 %v5545_v63, %v5544_v62  ;;  %v5958_v62 = vld [vmem:[%s10992_s5 + $0x2c0] sm:$0xff]  ;;  %v5959_v63 = vld [vmem:[%s10992_s5 + $0x2c8] sm:$0xff] }
  0xdc   : > { %7691 = vmatmul.mubr.f32.gmra.mrb[4].mxu1 %v9546_v29  ;;  %7081 = vmatprep.mubr.f32.mxu0 %v9558_v34  ;;  %v8492_v29 = vpack.c.bf16 %v5919_v28, %v5918_v26  ;;  %v5954_v26 = vld [vmem:[%s10992_s5 + $0x2a0] sm:$0xff]  ;;  %v5955_v28 = vld [vmem:[%s10992_s5 + $0x2a8] sm:$0xff] }
  0xdd   : > { %7693 = vmatprep.mubr.f32.mxu1 %v9558_v34  ;;  %8199 = vmatpush3.bf16.msra.mxu0 %v8196_v14  ;;  %v5920_v34 = vld [vmem:[%s10992_s5 + $0x250] sm:$0xff]  ;;  %v5951_v14 = vld [vmem:[%s10992_s5 + $0x288] sm:$0xff]  ;;  %v8516_v33 = vpack.c.bf16 %v5955_v28, %v5954_v26  ;;  %v10163_v26 = vld [vmem:[%s9289_s27 + $0x98] sm:$0xff] }
  0xde   : > { %8487 = vmatpush3.bf16.msra.mxu1 %v8484_v13  ;;  %8201 = vmatprep.subr.bf16.mxu0 %v8200_v20  ;;  %v8220_v13 = vpack.c.bf16 %v5573_v10, %v5572_v12  ;;  %v5583_v12 = vld [vmem:[%s10988_s1 + $0x2d8] sm:$0xff]  ;;  %v5964_v28 = vld [vmem:[%s10992_s5 + $0x2f0] sm:$0xff] }
  0xdf   : > { %7082 = vmatmul.mubr.f32.gmra.mrb[6].mxu0 %v9568_v37  ;;  %8489 = vmatprep.subr.bf16.mxu1 %v8488_v21  ;;  %v10119_v10 = vld [vmem:[%s9289_s27 + $0x78] sm:$0xff] }
  0xe0   : > { %7694 = vmatmul.mubr.f32.gmra.mrb[6].mxu1 %v9568_v37  ;;  %7084 = vmatprep.mubr.f32.mxu0 %v9580_v42  ;;  %v8496_v37 = vpack.c.bf16 %v5921_v39, %v5920_v34  ;;  %v5579_v34 = vld [vmem:[%s10988_s1 + $0x2b8] sm:$0xff] }
  0xe1   : > { %7696 = vmatprep.mubr.f32.mxu1 %v9580_v42  ;;  %8203 = vmatpush3.bf16.msra.mxu0 %v8200_v20  ;;  %v5922_v42 = vld [vmem:[%s10992_s5 + $0x260] sm:$0xff]  ;;  %v8512_v20 = vpack.c.bf16 %v5953_v16, %v5952_v15  ;;  %v10075_v39 = vld [vmem:[%s9289_s27 + $0x58] sm:$0xff]  ;;  %v8232_v56 = vpack.c.bf16 %v5579_v34, %v5578_v35  ;;  %v5963_v16 = vld [vmem:[%s10992_s5 + $0x2e8] sm:$0xff] }
  0xe2   : > { %8491 = vmatpush3.bf16.msra.mxu1 %v8488_v21  ;;  %8205 = vmatprep.subr.bf16.mxu0 %v8204_v30  ;;  %v5576_v21 = vld [vmem:[%s10988_s1 + $0x2a0] sm:$0xff] }
  0xe3   : > { %7085 = vmatmul.mubr.f32.gmra.mrb[8].mxu0 %v9590_v45  ;;  %8493 = vmatprep.subr.bf16.mxu1 %v8492_v29  ;;  %v5962_v15 = vld [vmem:[%s10992_s5 + $0x2e0] sm:$0xff] }
  0xe4   : > { %7697 = vmatmul.mubr.f32.gmra.mrb[8].mxu1 %v9590_v45  ;;  %7087 = vmatprep.mubr.f32.mxu0 %v9602_v50  ;;  %v8500_v45 = vpack.c.bf16 %v5923_v59, %v5922_v42  ;;  %v5580_v59 = vld [vmem:[%s10988_s1 + $0x2c0] sm:$0xff] }
  0xe5   : > { %7699 = vmatprep.mubr.f32.mxu1 %v9602_v50  ;;  %8207 = vmatpush3.bf16.msra.mxu0 %v8204_v30  ;;  %v5924_v50 = vld [vmem:[%s10992_s5 + $0x270] sm:$0xff] }
  0xe6   : > { %8495 = vmatpush3.bf16.msra.mxu1 %v8492_v29  ;;  %8209 = vmatprep.subr.bf16.mxu0 %v8208_v40  ;;  %v10063_v30 = vld [vmem:[%s9289_s27 + $0x50] sm:$0xff]  ;;  %v8228_v29 = vpack.c.bf16 %v5577_v24, %v5576_v21  ;;  %v5587_v24 = vld [vmem:[%s10988_s1 + $0x2f8] sm:$0xff] }
  0xe7   : > { %7088 = vmatmul.mubr.f32.gmra.mrb[10].mxu0 %v9612_v53  ;;  %8497 = vmatprep.subr.bf16.mxu1 %v8496_v37  ;;  %v5586_v21 = vld [vmem:[%s10988_s1 + $0x2f0] sm:$0xff] }
  0xe8   : > { %7700 = vmatmul.mubr.f32.gmra.mrb[10].mxu1 %v9612_v53  ;;  %7090 = vmatprep.mubr.f32.mxu0 %v9624_v58  ;;  %v8504_v53 = vpack.c.bf16 %v5925_v8, %v5924_v50  ;;  %v10107_v50 = vld [vmem:[%s9289_s27 + $0x70] sm:$0xff]  ;;  %v8248_v35 = vpack.c.bf16 %v5587_v24, %v5586_v21  ;;  %v5619_v21 = vld [vmem:[%s10988_s1 + $0x328] sm:$0xff]  ;;  %v5994_v24 = vld [vmem:[%s10992_s5 + $0x320] sm:$0xff] }
  0xe9   : > { %7702 = vmatprep.mubr.f32.mxu1 %v9624_v58  ;;  %8211 = vmatpush3.bf16.msra.mxu0 %v8208_v40  ;;  %v5950_v58 = vld [vmem:[%s10992_s5 + $0x280] sm:$0xff]  ;;  %v5956_v40 = vld [vmem:[%s10992_s5 + $0x2b0] sm:$0xff] }
  0xea   : > { %8499 = vmatpush3.bf16.msra.mxu1 %v8496_v37  ;;  %8213 = vmatprep.subr.bf16.mxu0 %v8212_v60  ;;  %v5957_v37 = vld [vmem:[%s10992_s5 + $0x2b8] sm:$0xff] }
  0xeb   : > { %7091 = vmatmul.mubr.f32.gmra.mrb[12].mxu0 %v9634_v61  ;;  %8501 = vmatprep.subr.bf16.mxu1 %v8500_v45  ;;  %v8520_v42 = vpack.c.bf16 %v5957_v37, %v5956_v40  ;;  %v5614_v40 = vld [vmem:[%s10988_s1 + $0x300] sm:$0xff]  ;;  %v5615_v37 = vld [vmem:[%s10988_s1 + $0x308] sm:$0xff] }
  0xec   : > { %7703 = vmatmul.mubr.f32.gmra.mrb[12].mxu1 %v9634_v61  ;;  %7093 = vmatprep.mubr.f32.mxu0 %v9640_v0  ;;  %v8508_v61 = vpack.c.bf16 %v5951_v14, %v5950_v58  ;;  %v5960_v58 = vld [vmem:[%s10992_s5 + $0x2d0] sm:$0xff]  ;;  %v5961_v14 = vld [vmem:[%s10992_s5 + $0x2d8] sm:$0xff] }
  0xed   : > { %7705 = vmatprep.mubr.f32.mxu1 %v9640_v0  ;;  %8215 = vmatpush3.bf16.msra.mxu0 %v8212_v60  ;;  %v10017_v0 = vld [vmem:[%s9289_s27 + $0xd7] sm:$0xff]  ;;  %v5581_v60 = vld [vmem:[%s10988_s1 + $0x2c8] sm:$0xff] }
  0xee   : > { %8503 = vmatpush3.bf16.msra.mxu1 %v8500_v45  ;;  %8217 = vmatprep.subr.bf16.mxu0 %v8216_v9  ;;  %v10097_v45 = vld [vmem:[%s9289_s27 + $0x68] sm:$0xff]  ;;  %v8236_v8 = vpack.c.bf16 %v5581_v60, %v5580_v59  ;;  %v10195_v60 = vld [vmem:[%s9289_s27 + $0xb0] sm:$0xff] }
  0xef   : > { %7094 = vmatmul.mubr.f32.gmra.mrb[14].mxu0 %v9644_v1  ;;  %8505 = vmatprep.subr.bf16.mxu1 %v8504_v53  ;;  %v5991_v59 = vld [vmem:[%s10992_s5 + $0x308] sm:$0xff] }
  0xf0   : > { %7706 = vmatmul.mubr.f32.gmra.mrb[14].mxu1 %v9644_v1  ;;  %7096 = vmatprep.mubr.f32.mxu0 %v9650_v2  ;;  %v10021_v1 = vld [vmem:[%s9289_s27 + $0xdf] sm:$0xff] }
  0xf1   : > { %7708 = vmatprep.mubr.f32.mxu1 %v9650_v2  ;;  %8219 = vmatpush3.bf16.msra.mxu0 %v8216_v9  ;;  %v10027_v2 = vld [vmem:[%s9289_s27 + $0xe7] sm:$0xff]  ;;  %v8524_v9 = vpack.c.bf16 %v5959_v63, %v5958_v62  ;;  %v8252_v62 = vpack.c.bf16 %v5615_v37, %v5614_v40  ;;  %v5997_v40 = vld [vmem:[%s10992_s5 + $0x338] sm:$0xff] }
  0xf2   : > { %8507 = vmatpush3.bf16.msra.mxu1 %v8504_v53  ;;  %8221 = vmatprep.subr.bf16.mxu0 %v8220_v13  ;;  %v5582_v53 = vld [vmem:[%s10988_s1 + $0x2d0] sm:$0xff] }
  0xf3   : > { %7097 = vmatmul.mubr.f32.gmra.mrb[16].mxu0 %v9654_v3  ;;  %8509 = vmatprep.subr.bf16.mxu1 %v8508_v61 }
  0xf4   : > { %7709 = vmatmul.mubr.f32.gmra.mrb[16].mxu1 %v9654_v3  ;;  %7099 = vmatprep.mubr.f32.mxu0 %v9660_v4  ;;  %v5506_v3 = vld [vmem:[%s9289_s27 + $0x30] sm:$0xff] }
  0xf5   : > { %7711 = vmatprep.mubr.f32.mxu1 %v9660_v4  ;;  %v5574_v4 = vld [vmem:[%s10988_s1 + $0x290] sm:$0xff] }
  0xf7   : > { %7100 = vmatmul.mubr.f32.gmra.mrb[18].mxu0 %v9664_v5 }
  0xf8   : > { %7712 = vmatmul.mubr.f32.gmra.mrb[18].mxu1 %v9664_v5  ;;  %7102 = vmatprep.mubr.f32.mxu0 %v9670_v6  ;;  %v5575_v5 = vld [vmem:[%s10988_s1 + $0x298] sm:$0xff] }
  0xf9   : > { %7714 = vmatprep.mubr.f32.mxu1 %v9670_v6  ;;  %v5507_v6 = vld [vmem:[%s9289_s27 + $0x38] sm:$0xff]  ;;  %v8224_v19 = vpack.c.bf16 %v5575_v5, %v5574_v4  ;;  %v5584_v4 = vld [vmem:[%s10988_s1 + $0x2e0] sm:$0xff]  ;;  %v5585_v5 = vld [vmem:[%s10988_s1 + $0x2e8] sm:$0xff] }
  0xfb   : > { %7103 = vmatmul.mubr.f32.gmra.mrb[20].mxu0 %v10017_v0 }
  0xfc   : > { %7715 = vmatmul.mubr.f32.gmra.mrb[20].mxu1 %v10017_v0  ;;  %7105 = vmatprep.mubr.f32.mxu0 %v10021_v1 }
  0xfd   : > { %7717 = vmatprep.mubr.f32.mxu1 %v10021_v1 }
  0xff   : > { %7106 = vmatmul.mubr.f32.gmra.mrb[22].mxu0 %v10027_v2 }
 0x100   : > { %7718 = vmatmul.mubr.f32.gmra.mrb[22].mxu1 %v10027_v2  ;;  %7140 = vmatprep.mubr.f32.mxu0 %v5506_v3 }
 0x101   : > { %7752 = vmatprep.mubr.f32.mxu1 %v5506_v3  ;;  %v8528_v3 = vpack.c.bf16 %v5961_v14, %v5960_v58  ;;  %v10221_v58 = vld [vmem:[%s9289_s27 + $0xd8] sm:$0xff]  ;;  %v10225_v14 = vld [vmem:[%s9289_s27 + $0xe0] sm:$0xff] }
 0x103   : > { %7141 = vmatmul.mubr.f32.vlgmr.msra.gmra.mrb[0].mxu0 %v5507_v6 }
 0x104   : > { %7753 = vmatmul.mubr.f32.vlgmr.msra.gmra.mrb[0].mxu1 %v5507_v6  ;;  %8223 = vmatpush3.bf16.msra.mxu0 %v8220_v13  ;;  %v10129_v13 = vld [vmem:[%s9289_s27 + $0x80] sm:$0xff]  ;;  %v10141_v6 = vld [vmem:[%s9289_s27 + $0x88] sm:$0xff] }
 0x105   : > { %7143 = vmatprep.mubr.f32.mxu0 %v5508_v18  ;;  %7755 = vmatprep.mubr.f32.mxu1 %v5508_v18  ;;  %v10151_v18 = vld [vmem:[%s9289_s27 + $0x90] sm:$0xff] }
 0x106   : > { %8511 = vmatpush3.bf16.msra.mxu1 %v8508_v61  ;;  %8225 = vmatprep.subr.bf16.mxu0 %v8224_v19  ;;  %v8240_v61 = vpack.c.bf16 %v5583_v12, %v5582_v53  ;;  %v10211_v53 = vld [vmem:[%s9289_s27 + $0xc8] sm:$0xff]  ;;  %v10215_v12 = vld [vmem:[%s9289_s27 + $0xd0] sm:$0xff] }
 0x107   : > { %7144 = vmatmul.mubr.f32.gmra.mrb[2].mxu0 %v10054_v27  ;;  %8513 = vmatprep.subr.bf16.mxu1 %v8512_v20 }
 0x108   : > { %7756 = vmatmul.mubr.f32.gmra.mrb[2].mxu1 %v10054_v27  ;;  %7146 = vmatprep.mubr.f32.mxu0 %v10063_v30 }
 0x109   : > { %8227 = vmatpush3.bf16.msra.mxu0 %v8224_v19  ;;  %7758 = vmatprep.mubr.f32.mxu1 %v10063_v30  ;;  %v8244_v19 = vpack.c.bf16 %v5585_v5, %v5584_v4  ;;  %v5617_v4 = vld [vmem:[%s10988_s1 + $0x318] sm:$0xff]  ;;  %v5992_v5 = vld [vmem:[%s10992_s5 + $0x310] sm:$0xff] }
 0x10a   : > { %8515 = vmatpush3.bf16.msra.mxu1 %v8512_v20  ;;  %8229 = vmatprep.subr.bf16.mxu0 %v8228_v29  ;;  %v8532_v20 = vpack.c.bf16 %v5963_v16, %v5962_v15  ;;  %v5993_v15 = vld [vmem:[%s10992_s5 + $0x318] sm:$0xff] }
 0x10b   : > { %7147 = vmatmul.mubr.f32.gmra.mrb[4].mxu0 %v10075_v39  ;;  %8517 = vmatprep.subr.bf16.mxu1 %v8516_v33 }
 0x10c   : > { %7759 = vmatmul.mubr.f32.gmra.mrb[4].mxu1 %v10075_v39  ;;  %7149 = vmatprep.mubr.f32.mxu0 %v10085_v55 }
 0x10d   : > { %7761 = vmatprep.mubr.f32.mxu1 %v10085_v55  ;;  %8231 = vmatpush3.bf16.msra.mxu0 %v8228_v29  ;;  %v5965_v29 = vld [vmem:[%s10992_s5 + $0x2f8] sm:$0xff] }
 0x10e   : > { %8519 = vmatpush3.bf16.msra.mxu1 %v8516_v33  ;;  %8233 = vmatprep.subr.bf16.mxu0 %v8232_v56  ;;  %v10173_v33 = vld [vmem:[%s9289_s27 + $0xa0] sm:$0xff]  ;;  %v8536_v34 = vpack.c.bf16 %v5965_v29, %v5964_v28  ;;  %v10267_v28 = vld [vmem:[%s9289_s27 + $0x51] sm:$0xff] }
 0x10f   : > { %7150 = vmatmul.mubr.f32.gmra.mrb[6].mxu0 %v10097_v45  ;;  %8521 = vmatprep.subr.bf16.mxu1 %v8520_v42 }
 0x110   : > { %7762 = vmatmul.mubr.f32.gmra.mrb[6].mxu1 %v10097_v45  ;;  %7152 = vmatprep.mubr.f32.mxu0 %v10107_v50 }
 0x111   : > { %7764 = vmatprep.mubr.f32.mxu1 %v10107_v50  ;;  %8235 = vmatpush3.bf16.msra.mxu0 %v8232_v56  ;;  %v10185_v56 = vld [vmem:[%s9289_s27 + $0xa8] sm:$0xff] }
 0x112   : > { %8523 = vmatpush3.bf16.msra.mxu1 %v8520_v42  ;;  %8237 = vmatprep.subr.bf16.mxu0 %v8236_v8  ;;  %v5990_v42 = vld [vmem:[%s10992_s5 + $0x300] sm:$0xff] }
 0x113   : > { %7153 = vmatmul.mubr.f32.gmra.mrb[8].mxu0 %v10119_v10  ;;  %8525 = vmatprep.subr.bf16.mxu1 %v8524_v9  ;;  %v8540_v63 = vpack.c.bf16 %v5991_v59, %v5990_v42  ;;  %v5623_v42 = vld [vmem:[%s10988_s1 + $0x348] sm:$0xff]  ;;  %v5998_v59 = vld [vmem:[%s10992_s5 + $0x340] sm:$0xff] }
 0x114   : > { %7765 = vmatmul.mubr.f32.gmra.mrb[8].mxu1 %v10119_v10  ;;  %7155 = vmatprep.mubr.f32.mxu0 %v10129_v13 }
 0x115   : > { %7767 = vmatprep.mubr.f32.mxu1 %v10129_v13  ;;  %8239 = vmatpush3.bf16.msra.mxu0 %v8236_v8  ;;  %v10201_v8 = vld [vmem:[%s9289_s27 + $0xb8] sm:$0xff] }
 0x116   : > { %8527 = vmatpush3.bf16.msra.mxu1 %v8524_v9  ;;  %8241 = vmatprep.subr.bf16.mxu0 %v8240_v61  ;;  %v10205_v9 = vld [vmem:[%s9289_s27 + $0xc0] sm:$0xff] }
 0x117   : > { %7156 = vmatmul.mubr.f32.gmra.mrb[10].mxu0 %v10141_v6  ;;  %8529 = vmatprep.subr.bf16.mxu1 %v8528_v3 }
 0x118   : > { %7768 = vmatmul.mubr.f32.gmra.mrb[10].mxu1 %v10141_v6  ;;  %7158 = vmatprep.mubr.f32.mxu0 %v10151_v18 }
 0x119   : > { %7770 = vmatprep.mubr.f32.mxu1 %v10151_v18  ;;  %8243 = vmatpush3.bf16.msra.mxu0 %v8240_v61  ;;  %v10231_v61 = vld [vmem:[%s9289_s27 + $0xe8] sm:$0xff] }
 0x11a   : > { %8531 = vmatpush3.bf16.msra.mxu1 %v8528_v3  ;;  %8245 = vmatprep.subr.bf16.mxu0 %v8244_v19  ;;  %v5616_v3 = vld [vmem:[%s10988_s1 + $0x310] sm:$0xff] }
 0x11b   : > { %7159 = vmatmul.mubr.f32.gmra.mrb[12].mxu0 %v10163_v26  ;;  %8533 = vmatprep.subr.bf16.mxu1 %v8532_v20  ;;  %v8256_v16 = vpack.c.bf16 %v5617_v4, %v5616_v3  ;;  %v5624_v3 = vld [vmem:[%s10988_s1 + $0x350] sm:$0xff]  ;;  %v5625_v4 = vld [vmem:[%s10988_s1 + $0x358] sm:$0xff] }
 0x11c   : > { %7771 = vmatmul.mubr.f32.gmra.mrb[12].mxu1 %v10163_v26  ;;  %7161 = vmatprep.mubr.f32.mxu0 %v10173_v33 }
 0x11d   : > { %7773 = vmatprep.mubr.f32.mxu1 %v10173_v33  ;;  %8247 = vmatpush3.bf16.msra.mxu0 %v8244_v19  ;;  %v8544_v19 = vpack.c.bf16 %v5993_v15, %v5992_v5  ;;  %v6001_v5 = vld [vmem:[%s10992_s5 + $0x358] sm:$0xff]  ;;  %v10318_v15 = vld [vmem:[%s9289_s27 + $0x81] sm:$0xff] }
 0x11e   : > { %8535 = vmatpush3.bf16.msra.mxu1 %v8532_v20  ;;  %8249 = vmatprep.subr.bf16.mxu0 %v8248_v35  ;;  %v5618_v20 = vld [vmem:[%s10988_s1 + $0x320] sm:$0xff] }
 0x11f   : > { %7162 = vmatmul.mubr.f32.gmra.mrb[14].mxu0 %v10185_v56  ;;  %8537 = vmatprep.subr.bf16.mxu1 %v8536_v34  ;;  %v8260_v29 = vpack.c.bf16 %v5619_v21, %v5618_v20  ;;  %v5627_v20 = vld [vmem:[%s10988_s1 + $0x368] sm:$0xff] }
 0x120   : > { %7774 = vmatmul.mubr.f32.gmra.mrb[14].mxu1 %v10185_v56  ;;  %7164 = vmatprep.mubr.f32.mxu0 %v10195_v60  ;;  %v6003_v21 = vld [vmem:[%s10992_s5 + $0x368] sm:$0xff] }
 0x121   : > { %7776 = vmatprep.mubr.f32.mxu1 %v10195_v60  ;;  %8251 = vmatpush3.bf16.msra.mxu0 %v8248_v35  ;;  %v5620_v35 = vld [vmem:[%s10988_s1 + $0x330] sm:$0xff] }
 0x122   : > { %8539 = vmatpush3.bf16.msra.mxu1 %v8536_v34  ;;  %8253 = vmatprep.subr.bf16.mxu0 %v8252_v62  ;;  %v5621_v34 = vld [vmem:[%s10988_s1 + $0x338] sm:$0xff] }
 0x123   : > { %7165 = vmatmul.mubr.f32.gmra.mrb[16].mxu0 %v10201_v8  ;;  %8541 = vmatprep.subr.bf16.mxu1 %v8540_v63  ;;  %v8264_v37 = vpack.c.bf16 %v5621_v34, %v5620_v35  ;;  %v5656_v34 = vld [vmem:[%s10988_s1 + $0x380] sm:$0xff] }
 0x124   : > { %7777 = vmatmul.mubr.f32.gmra.mrb[16].mxu1 %v10201_v8  ;;  %7167 = vmatprep.mubr.f32.mxu0 %v10205_v9 }
 0x125   : > { %7779 = vmatprep.mubr.f32.mxu1 %v10205_v9 }
 0x127   : > { %7168 = vmatmul.mubr.f32.gmra.mrb[18].mxu0 %v10211_v53 }
 0x128   : > { %7780 = vmatmul.mubr.f32.gmra.mrb[18].mxu1 %v10211_v53  ;;  %7170 = vmatprep.mubr.f32.mxu0 %v10215_v12 }
 0x129   : > { %7782 = vmatprep.mubr.f32.mxu1 %v10215_v12 }
 0x12b   : > { %7171 = vmatmul.mubr.f32.gmra.mrb[20].mxu0 %v10221_v58 }
 0x12c   : > { %7783 = vmatmul.mubr.f32.gmra.mrb[20].mxu1 %v10221_v58  ;;  %7173 = vmatprep.mubr.f32.mxu0 %v10225_v14 }
 0x12d   : > { %7785 = vmatprep.mubr.f32.mxu1 %v10225_v14 }
 0x12f   : > { %7174 = vmatmul.mubr.f32.gmra.mrb[22].mxu0 %v10231_v61 }
 0x130   : > { %7786 = vmatmul.mubr.f32.gmra.mrb[22].mxu1 %v10231_v61  ;;  %7208 = vmatprep.mubr.f32.mxu0 %v9697_v22 }
 0x131   : > { %7820 = vmatprep.mubr.f32.mxu1 %v9697_v22  ;;  %v5995_v22 = vld [vmem:[%s10992_s5 + $0x328] sm:$0xff] }
 0x133   : > { %7209 = vmatmul.mubr.f32.vlgmr.msra.gmra.mrb[0].mxu0 %v9706_v25 }
 0x134   : > { %7821 = vmatmul.mubr.f32.vlgmr.msra.gmra.mrb[0].mxu1 %v9706_v25  ;;  %8255 = vmatpush3.bf16.msra.mxu0 %v8252_v62  ;;  %v8548_v25 = vpack.c.bf16 %v5995_v22, %v5994_v24  ;;  %v5999_v62 = vld [vmem:[%s10992_s5 + $0x348] sm:$0xff]  ;;  %v5629_v22 = vld [vmem:[%s10988_s1 + $0x378] sm:$0xff] }
 0x135   : > { %7211 = vmatprep.mubr.f32.mxu0 %v9718_v32  ;;  %7823 = vmatprep.mubr.f32.mxu1 %v9718_v32  ;;  %v5996_v32 = vld [vmem:[%s10992_s5 + $0x330] sm:$0xff] }
 0x136   : > { %8543 = vmatpush3.bf16.msra.mxu1 %v8540_v63  ;;  %8257 = vmatprep.subr.bf16.mxu0 %v8256_v16 }
 0x137   : > { %7212 = vmatmul.mubr.f32.gmra.mrb[2].mxu0 %v9728_v36  ;;  %8545 = vmatprep.subr.bf16.mxu1 %v8544_v19 }
 0x138   : > { %7824 = vmatmul.mubr.f32.gmra.mrb[2].mxu1 %v9728_v36  ;;  %7214 = vmatprep.mubr.f32.mxu0 %v9740_v43  ;;  %v8552_v36 = vpack.c.bf16 %v5997_v40, %v5996_v32  ;;  %v5622_v43 = vld [vmem:[%s10988_s1 + $0x340] sm:$0xff]  ;;  %v5657_v32 = vld [vmem:[%s10988_s1 + $0x388] sm:$0xff] }
 0x139   : > { %8259 = vmatpush3.bf16.msra.mxu0 %v8256_v16  ;;  %7826 = vmatprep.mubr.f32.mxu1 %v10267_v28  ;;  %v8268_v63 = vpack.c.bf16 %v5623_v42, %v5622_v43  ;;  %v8272_v16 = vpack.c.bf16 %v5625_v4, %v5624_v3  ;;  %v6031_v40 = vld [vmem:[%s10992_s5 + $0x388] sm:$0xff]  ;;  %v6032_v43 = vld [vmem:[%s10992_s5 + $0x390] sm:$0xff]  ;;  %v6033_v42 = vld [vmem:[%s10992_s5 + $0x398] sm:$0xff] }
 0x13a   : > { %8547 = vmatpush3.bf16.msra.mxu1 %v8544_v19  ;;  %8261 = vmatprep.subr.bf16.mxu0 %v8260_v29  ;;  %v5626_v19 = vld [vmem:[%s10988_s1 + $0x360] sm:$0xff]  ;;  %v5661_v3 = vld [vmem:[%s10988_s1 + $0x3a8] sm:$0xff] }
 0x13b   : > { %7215 = vmatmul.mubr.f32.gmra.mrb[4].mxu0 %v9750_v47  ;;  %8549 = vmatprep.subr.bf16.mxu1 %v8548_v25  ;;  %v8276_v24 = vpack.c.bf16 %v5627_v20, %v5626_v19  ;;  %v5593_v4 = vld [vmem:[%s9289_s27 + $0x5f] sm:$0xff]  ;;  %v5662_v20 = vld [vmem:[%s10988_s1 + $0x3b0] sm:$0xff] }
 0x13c   : > { %7827 = vmatmul.mubr.f32.gmra.mrb[4].mxu1 %v9750_v47  ;;  %7217 = vmatprep.mubr.f32.mxu0 %v9762_v54  ;;  %v8556_v47 = vpack.c.bf16 %v5999_v62, %v5998_v59  ;;  %v5592_v59 = vld [vmem:[%s9289_s27 + $0x57] sm:$0xff] }
 0x13d   : > { %7829 = vmatprep.mubr.f32.mxu1 %v9762_v54  ;;  %8263 = vmatpush3.bf16.msra.mxu0 %v8260_v29  ;;  %v6000_v54 = vld [vmem:[%s10992_s5 + $0x350] sm:$0xff] }
 0x13e   : > { %8551 = vmatpush3.bf16.msra.mxu1 %v8548_v25  ;;  %8265 = vmatprep.subr.bf16.mxu0 %v8264_v37  ;;  %v6004_v29 = vld [vmem:[%s10992_s5 + $0x370] sm:$0xff]  ;;  %v6005_v25 = vld [vmem:[%s10992_s5 + $0x378] sm:$0xff] }
 0x13f   : > { %7218 = vmatmul.mubr.f32.gmra.mrb[6].mxu0 %v9772_v57  ;;  %8553 = vmatprep.subr.bf16.mxu1 %v8552_v36 }
 0x140   : > { %7830 = vmatmul.mubr.f32.gmra.mrb[6].mxu1 %v9772_v57  ;;  %7220 = vmatprep.mubr.f32.mxu0 %v9784_v7  ;;  %v8560_v57 = vpack.c.bf16 %v6001_v5, %v6000_v54  ;;  %v6034_v54 = vld [vmem:[%s10992_s5 + $0x3a0] sm:$0xff]  ;;  %v6035_v5 = vld [vmem:[%s10992_s5 + $0x3a8] sm:$0xff] }
 0x141   : > { %7832 = vmatprep.mubr.f32.mxu1 %v9784_v7  ;;  %8267 = vmatpush3.bf16.msra.mxu0 %v8264_v37  ;;  %v6002_v7 = vld [vmem:[%s10992_s5 + $0x360] sm:$0xff]  ;;  %v10369_v37 = vld [vmem:[%s9289_s27 + $0xb1] sm:$0xff]  ;;  %v8580_v19 = vpack.c.bf16 %v6035_v5, %v6034_v54 }
 0x142   : > { %8555 = vmatpush3.bf16.msra.mxu1 %v8552_v36  ;;  %8269 = vmatprep.subr.bf16.mxu0 %v8268_v63  ;;  %v8284_v36 = vpack.c.bf16 %v5657_v32, %v5656_v34  ;;  %v6038_v34 = vld [vmem:[%s10992_s5 + $0x3c0] sm:$0xff]  ;;  %v6039_v32 = vld [vmem:[%s10992_s5 + $0x3c8] sm:$0xff] }
 0x143   : > { %7221 = vmatmul.mubr.f32.gmra.mrb[8].mxu0 %v9794_v11  ;;  %8557 = vmatprep.subr.bf16.mxu1 %v8556_v47  ;;  %v5602_v54 = vld [vmem:[%s9289_s27 + $0xa7] sm:$0xff] }
 0x144   : > { %7833 = vmatmul.mubr.f32.gmra.mrb[8].mxu1 %v9794_v11  ;;  %7223 = vmatprep.mubr.f32.mxu0 %v9806_v17  ;;  %v8564_v11 = vpack.c.bf16 %v6003_v21, %v6002_v7  ;;  %v5628_v17 = vld [vmem:[%s10988_s1 + $0x370] sm:$0xff]  ;;  %v5663_v7 = vld [vmem:[%s10988_s1 + $0x3b8] sm:$0xff] }
 0x145   : > { %7835 = vmatprep.mubr.f32.mxu1 %v10318_v15  ;;  %8271 = vmatpush3.bf16.msra.mxu0 %v8268_v63  ;;  %v8280_v35 = vpack.c.bf16 %v5629_v22, %v5628_v17  ;;  %v8576_v63 = vpack.c.bf16 %v6033_v42, %v6032_v43  ;;  %v5595_v21 = vld [vmem:[%s9289_s27 + $0x6f] sm:$0xff]  ;;  %v5596_v17 = vld [vmem:[%s9289_s27 + $0x77] sm:$0xff]  ;;  %v8296_v22 = vpack.c.bf16 %v5663_v7, %v5662_v20 }
 0x146   : > { %8559 = vmatpush3.bf16.msra.mxu1 %v8556_v47  ;;  %8273 = vmatprep.subr.bf16.mxu0 %v8272_v16  ;;  %v5660_v47 = vld [vmem:[%s10988_s1 + $0x3a0] sm:$0xff]  ;;  %v5600_v43 = vld [vmem:[%s9289_s27 + $0x97] sm:$0xff]  ;;  %v5603_v20 = vld [vmem:[%s9289_s27 + $0xaf] sm:$0xff] }
 0x147   : > { %7224 = vmatmul.mubr.f32.gmra.mrb[10].mxu0 %v9816_v23  ;;  %8561 = vmatprep.subr.bf16.mxu1 %v8560_v57  ;;  %v6044_v7 = vld [vmem:[%s10992_s5 + $0x3f0] sm:$0xff] }
 0x148   : > { %7836 = vmatmul.mubr.f32.gmra.mrb[10].mxu1 %v9816_v23  ;;  %7226 = vmatprep.mubr.f32.mxu0 %v9828_v31  ;;  %v8568_v23 = vpack.c.bf16 %v6005_v25, %v6004_v29  ;;  %v5664_v25 = vld [vmem:[%s10988_s1 + $0x3c0] sm:$0xff] }
 0x149   : > { %7838 = vmatprep.mubr.f32.mxu1 %v9828_v31  ;;  %8275 = vmatpush3.bf16.msra.mxu0 %v8272_v16  ;;  %v6030_v31 = vld [vmem:[%s10992_s5 + $0x380] sm:$0xff] }
 0x14a   : > { %8563 = vmatpush3.bf16.msra.mxu1 %v8560_v57  ;;  %8277 = vmatprep.subr.bf16.mxu0 %v8276_v24  ;;  %v5594_v16 = vld [vmem:[%s9289_s27 + $0x67] sm:$0xff]  ;;  %v8292_v57 = vpack.c.bf16 %v5661_v3, %v5660_v47  ;;  %v5601_v47 = vld [vmem:[%s9289_s27 + $0x9f] sm:$0xff] }
 0x14b   : > { %7227 = vmatmul.mubr.f32.gmra.mrb[12].mxu0 %v9838_v38  ;;  %8565 = vmatprep.subr.bf16.mxu1 %v8564_v11  ;;  %v6042_v3 = vld [vmem:[%s10992_s5 + $0x3e0] sm:$0xff] }
 0x14c   : > { %7839 = vmatmul.mubr.f32.gmra.mrb[12].mxu1 %v9838_v38  ;;  %7229 = vmatprep.mubr.f32.mxu0 %v9844_v41  ;;  %v8572_v38 = vpack.c.bf16 %v6031_v40, %v6030_v31  ;;  %v5598_v31 = vld [vmem:[%s9289_s27 + $0x87] sm:$0xff] }
 0x14d   : > { %7841 = vmatprep.mubr.f32.mxu1 %v9844_v41  ;;  %8279 = vmatpush3.bf16.msra.mxu0 %v8276_v24  ;;  %v10383_v41 = vld [vmem:[%s9289_s27 + $0xd9] sm:$0xff]  ;;  %v6036_v24 = vld [vmem:[%s10992_s5 + $0x3b0] sm:$0xff] }
 0x14e   : > { %8567 = vmatpush3.bf16.msra.mxu1 %v8564_v11  ;;  %8281 = vmatprep.subr.bf16.mxu0 %v8280_v35  ;;  %v6037_v11 = vld [vmem:[%s10992_s5 + $0x3b8] sm:$0xff] }
 0x14f   : > { %7230 = vmatmul.mubr.f32.gmra.mrb[14].mxu0 %v9848_v44  ;;  %8569 = vmatprep.subr.bf16.mxu1 %v8568_v23  ;;  %v8584_v29 = vpack.c.bf16 %v6037_v11, %v6036_v24  ;;  %v5604_v24 = vld [vmem:[%s9289_s27 + $0xb7] sm:$0xff] }
 0x150   : > { %7842 = vmatmul.mubr.f32.gmra.mrb[14].mxu1 %v9848_v44  ;;  %7232 = vmatprep.mubr.f32.mxu0 %v9854_v46  ;;  %v10387_v44 = vld [vmem:[%s9289_s27 + $0xe1] sm:$0xff]  ;;  %v10393_v46 = vld [vmem:[%s9289_s27 + $0xe9] sm:$0xff] }
 0x151   : > { %7844 = vmatprep.mubr.f32.mxu1 %v10369_v37  ;;  %8283 = vmatpush3.bf16.msra.mxu0 %v8280_v35  ;;  %v5665_v35 = vld [vmem:[%s10988_s1 + $0x3c8] sm:$0xff] }
 0x152   : > { %8571 = vmatpush3.bf16.msra.mxu1 %v8568_v23  ;;  %8285 = vmatprep.subr.bf16.mxu0 %v8284_v36  ;;  %v5597_v23 = vld [vmem:[%s9289_s27 + $0x7f] sm:$0xff]  ;;  %v8300_v40 = vpack.c.bf16 %v5665_v35, %v5664_v25 }
 0x153   : > { %7233 = vmatmul.mubr.f32.gmra.mrb[16].mxu0 %v9858_v48  ;;  %8573 = vmatprep.subr.bf16.mxu1 %v8572_v38  ;;  %v5605_v25 = vld [vmem:[%s9289_s27 + $0xbf] sm:$0xff] }
 0x154   : > { %7845 = vmatmul.mubr.f32.gmra.mrb[16].mxu1 %v9858_v48  ;;  %7235 = vmatprep.mubr.f32.mxu0 %v9864_v49  ;;  %v5590_v48 = vld [vmem:[%s9289_s27 + $0x47] sm:$0xff] }
 0x155   : > { %7847 = vmatprep.mubr.f32.mxu1 %v9864_v49  ;;  %v5658_v49 = vld [vmem:[%s10988_s1 + $0x390] sm:$0xff]  ;;  %v6070_v35 = vld [vmem:[%s10992_s5 + $0x400] sm:$0xff] }
 0x157   : > { %7236 = vmatmul.mubr.f32.gmra.mrb[18].mxu0 %v9868_v51 }
 0x158   : > { %7848 = vmatmul.mubr.f32.gmra.mrb[18].mxu1 %v9868_v51  ;;  %7238 = vmatprep.mubr.f32.mxu0 %v9874_v52  ;;  %v5659_v51 = vld [vmem:[%s10988_s1 + $0x398] sm:$0xff] }
 0x159   : > { %7850 = vmatprep.mubr.f32.mxu1 %v9874_v52  ;;  %v5591_v52 = vld [vmem:[%s9289_s27 + $0x4f] sm:$0xff]  ;;  %v8288_v62 = vpack.c.bf16 %v5659_v51, %v5658_v49 }
 0x15a   : > { %v5599_v49 = vld [vmem:[%s9289_s27 + $0x8f] sm:$0xff] }
 0x15b   : > { %7239 = vmatmul.mubr.f32.gmra.mrb[20].mxu0 %v10383_v41  ;;  %v6040_v51 = vld [vmem:[%s10992_s5 + $0x3d0] sm:$0xff] }
 0x15c   : > { %7851 = vmatmul.mubr.f32.gmra.mrb[20].mxu1 %v10383_v41  ;;  %7241 = vmatprep.mubr.f32.mxu0 %v10387_v44 }
 0x15d   : > { %7853 = vmatprep.mubr.f32.mxu1 %v10387_v44 }
 0x15f   : > { %7242 = vmatmul.mubr.f32.gmra.mrb[22].mxu0 %v10393_v46 }
 0x160   : > { %7854 = vmatmul.mubr.f32.gmra.mrb[22].mxu1 %v10393_v46  ;;  %7276 = vmatprep.mubr.f32.mxu0 %v5590_v48 }
 0x161   : > { %7888 = vmatprep.mubr.f32.mxu1 %v5590_v48  ;;  %v5667_v48 = vld [vmem:[%s10988_s1 + $0x3d8] sm:$0xff] }
 0x163   : > { %7277 = vmatmul.mubr.f32.vlgmr.msra.gmra.mrb[0].mxu0 %v5591_v52 }
 0x164   : > { %7889 = vmatmul.mubr.f32.vlgmr.msra.gmra.mrb[0].mxu1 %v5591_v52  ;;  %8287 = vmatpush3.bf16.msra.mxu0 %v8284_v36  ;;  %v8588_v36 = vpack.c.bf16 %v6039_v32, %v6038_v34  ;;  %v6041_v52 = vld [vmem:[%s10992_s5 + $0x3d8] sm:$0xff]  ;;  %v5606_v34 = vld [vmem:[%s9289_s27 + $0xc7] sm:$0xff] }
 0x165   : > { %7279 = vmatprep.mubr.f32.mxu0 %v5592_v59  ;;  %7891 = vmatprep.mubr.f32.mxu1 %v5592_v59  ;;  %v8592_v59 = vpack.c.bf16 %v6041_v52, %v6040_v51  ;;  %v5611_v51 = vld [vmem:[%s9289_s27 + $0xef] sm:$0xff]  ;;  %v5612_v52 = vld [vmem:[%s9289_s27 + $0xf7] sm:$0xff] }
 0x166   : > { %8575 = vmatpush3.bf16.msra.mxu1 %v8572_v38  ;;  %8289 = vmatprep.subr.bf16.mxu0 %v8288_v62  ;;  %v5666_v38 = vld [vmem:[%s10988_s1 + $0x3d0] sm:$0xff] }
 0x167   : > { %7280 = vmatmul.mubr.f32.gmra.mrb[2].mxu0 %v5593_v4  ;;  %8577 = vmatprep.subr.bf16.mxu1 %v8576_v63  ;;  %v8304_v42 = vpack.c.bf16 %v5667_v48, %v5666_v38  ;;  %v389_v38 = vld [vmem:[%s10991_s4] sm:$0xff]  ;;  %v9106_v48 = vmov 0  }
 0x168   : > { %7892 = vmatmul.mubr.f32.gmra.mrb[2].mxu1 %v5593_v4  ;;  %7282 = vmatprep.mubr.f32.mxu0 %v5594_v16  ;;  %v6043_v4 = vld [vmem:[%s10992_s5 + $0x3e8] sm:$0xff] }
 0x169   : > { %8291 = vmatpush3.bf16.msra.mxu0 %v8288_v62  ;;  %7894 = vmatprep.mubr.f32.mxu1 %v5594_v16  ;;  %v5668_v62 = vld [vmem:[%s10988_s1 + $0x3e0] sm:$0xff]  ;;  %v8596_v16 = vpack.c.bf16 %v6043_v4, %v6042_v3  ;;  %v395_v3 = vld [vmem:[%s10991_s4 + $0x30] sm:$0xff] }
 0x16a   : > { %8579 = vmatpush3.bf16.msra.mxu1 %v8576_v63  ;;  %8293 = vmatprep.subr.bf16.mxu0 %v8292_v57  ;;  %v5669_v63 = vld [vmem:[%s10988_s1 + $0x3e8] sm:$0xff] }
 0x16b   : > { %7283 = vmatmul.mubr.f32.gmra.mrb[4].mxu0 %v5595_v21  ;;  %8581 = vmatprep.subr.bf16.mxu1 %v8580_v19  ;;  %v8308_v5 = vpack.c.bf16 %v5669_v63, %v5668_v62  ;;  %v396_v62 = vld [vmem:[%s10991_s4 + $0x38] sm:$0xff]  ;;  %v6072_v63 = vld [vmem:[%s10992_s5 + $0x410] sm:$0xff] }
 0x16c   : > { %7895 = vmatmul.mubr.f32.gmra.mrb[4].mxu1 %v5595_v21  ;;  %7285 = vmatprep.mubr.f32.mxu0 %v5596_v17  ;;  %v6045_v21 = vld [vmem:[%s10992_s5 + $0x3f8] sm:$0xff] }
 0x16d   : > { %7897 = vmatprep.mubr.f32.mxu1 %v5596_v17  ;;  %8295 = vmatpush3.bf16.msra.mxu0 %v8292_v57  ;;  %v5670_v57 = vld [vmem:[%s10988_s1 + $0x3f0] sm:$0xff]  ;;  %v8600_v17 = vpack.c.bf16 %v6045_v21, %v6044_v7  ;;  %v5705_v21 = vld [vmem:[%s10988_s1 + $0x438] sm:$0xff] }
 0x16e   : > { %8583 = vmatpush3.bf16.msra.mxu1 %v8580_v19  ;;  %8297 = vmatprep.subr.bf16.mxu0 %v8296_v22  ;;  %v5671_v19 = vld [vmem:[%s10988_s1 + $0x3f8] sm:$0xff]  ;;  %v5704_v7 = vld [vmem:[%s10988_s1 + $0x430] sm:$0xff] }
 0x16f   : > { %7286 = vmatmul.mubr.f32.gmra.mrb[6].mxu0 %v5597_v23  ;;  %8585 = vmatprep.subr.bf16.mxu1 %v8584_v29  ;;  %v8312_v11 = vpack.c.bf16 %v5671_v19, %v5670_v57  ;;  %v6075_v57 = vld [vmem:[%s10992_s5 + $0x428] sm:$0xff] }
 0x170   : > { %7898 = vmatmul.mubr.f32.gmra.mrb[6].mxu1 %v5597_v23  ;;  %7288 = vmatprep.mubr.f32.mxu0 %v5598_v31  ;;  %v6071_v23 = vld [vmem:[%s10992_s5 + $0x408] sm:$0xff] }
 0x171   : > { %7900 = vmatprep.mubr.f32.mxu1 %v5598_v31  ;;  %8299 = vmatpush3.bf16.msra.mxu0 %v8296_v22  ;;  %v5698_v22 = vld [vmem:[%s10988_s1 + $0x400] sm:$0xff]  ;;  %v8604_v31 = vpack.c.bf16 %v6071_v23, %v6070_v35  ;;  %v6010_v19 = vld [vmem:[%s9289_s27 + $0x68] sm:$0xff]  ;;  %v5708_v35 = vld [vmem:[%s10988_s1 + $0x450] sm:$0xff] }
 0x172   : > { %8587 = vmatpush3.bf16.msra.mxu1 %v8584_v29  ;;  %8301 = vmatprep.subr.bf16.mxu0 %v8300_v40  ;;  %v5699_v29 = vld [vmem:[%s10988_s1 + $0x408] sm:$0xff]  ;;  %v5709_v23 = vld [vmem:[%s10988_s1 + $0x458] sm:$0xff] }
 0x173   : > { %7289 = vmatmul.mubr.f32.gmra.mrb[8].mxu0 %v5599_v49  ;;  %8589 = vmatprep.subr.bf16.mxu1 %v8588_v36  ;;  %v8316_v32 = vpack.c.bf16 %v5699_v29, %v5698_v22  ;;  %v6078_v22 = vld [vmem:[%s10992_s5 + $0x440] sm:$0xff]  ;;  %v6079_v29 = vld [vmem:[%s10992_s5 + $0x448] sm:$0xff] }
 0x174   : > { %7901 = vmatmul.mubr.f32.gmra.mrb[8].mxu1 %v5599_v49  ;;  %7291 = vmatprep.mubr.f32.mxu0 %v5600_v43  ;;  %v392_v49 = vld [vmem:[%s10991_s4 + $0x18] sm:$0xff] }
 0x175   : > { %7903 = vmatprep.mubr.f32.mxu1 %v5600_v43  ;;  %8303 = vmatpush3.bf16.msra.mxu0 %v8300_v40  ;;  %v5607_v40 = vld [vmem:[%s9289_s27 + $0xcf] sm:$0xff] }
 0x176   : > { %8591 = vmatpush3.bf16.msra.mxu1 %v8588_v36  ;;  %8305 = vmatprep.subr.bf16.mxu0 %v8304_v42  ;;  %v391_v36 = vld [vmem:[%s10991_s4 + $0x10] sm:$0xff]  ;;  %v394_v43 = vld [vmem:[%s10991_s4 + $0x28] sm:$0xff] }
 0x177   : > { %7292 = vmatmul.mubr.f32.gmra.mrb[10].mxu0 %v5601_v47  ;;  %8593 = vmatprep.subr.bf16.mxu1 %v8592_v59 }
 0x178   : > { %7904 = vmatmul.mubr.f32.gmra.mrb[10].mxu1 %v5601_v47  ;;  %7294 = vmatprep.mubr.f32.mxu0 %v5602_v54  ;;  %v6073_v47 = vld [vmem:[%s10992_s5 + $0x418] sm:$0xff] }
 0x179   : > { %7906 = vmatprep.mubr.f32.mxu1 %v5602_v54  ;;  %8307 = vmatpush3.bf16.msra.mxu0 %v8304_v42  ;;  %v393_v42 = vld [vmem:[%s10991_s4 + $0x20] sm:$0xff]  ;;  %v8608_v54 = vpack.c.bf16 %v6073_v47, %v6072_v63  ;;  %v408_v47 = vld [vmem:[%s10991_s4 + $0x98] sm:$0xff] }
 0x17a   : > { %8595 = vmatpush3.bf16.msra.mxu1 %v8592_v59  ;;  %8309 = vmatprep.subr.bf16.mxu0 %v8308_v5  ;;  %v5701_v59 = vld [vmem:[%s10988_s1 + $0x418] sm:$0xff] }
 0x17b   : > { %7295 = vmatmul.mubr.f32.gmra.mrb[12].mxu0 %v5603_v20  ;;  %8597 = vmatprep.subr.bf16.mxu1 %v8596_v16  ;;  %v5676_v63 = vld [vmem:[%s9289_s27 + $0x59] sm:$0xff] }
 0x17c   : > { %7907 = vmatmul.mubr.f32.gmra.mrb[12].mxu1 %v5603_v20  ;;  %7297 = vmatprep.mubr.f32.mxu0 %v5604_v24 }
 0x17d   : > { %7909 = vmatprep.mubr.f32.mxu1 %v5604_v24  ;;  %8311 = vmatpush3.bf16.msra.mxu0 %v8308_v5  ;;  %v5702_v5 = vld [vmem:[%s10988_s1 + $0x420] sm:$0xff]  ;;  %v6077_v24 = vld [vmem:[%s10992_s5 + $0x438] sm:$0xff] }
 0x17e   : > { %8599 = vmatpush3.bf16.msra.mxu1 %v8596_v16  ;;  %8313 = vmatprep.subr.bf16.mxu0 %v8312_v11  ;;  %v5703_v16 = vld [vmem:[%s10988_s1 + $0x428] sm:$0xff] }
 0x17f   : > { %7298 = vmatmul.mubr.f32.gmra.mrb[14].mxu0 %v5605_v25  ;;  %8601 = vmatprep.subr.bf16.mxu1 %v8600_v17  ;;  %v8324_v20 = vpack.c.bf16 %v5703_v16, %v5702_v5  ;;  %v410_v5 = vld [vmem:[%s10991_s4 + $0xa8] sm:$0xff]  ;;  %v5679_v16 = vld [vmem:[%s9289_s27 + $0x71] sm:$0xff] }
 0x180   : > { %7910 = vmatmul.mubr.f32.gmra.mrb[14].mxu1 %v5605_v25  ;;  %7300 = vmatprep.mubr.f32.mxu0 %v5606_v34 }
 0x181   : > { %7912 = vmatprep.mubr.f32.mxu1 %v5606_v34  ;;  %8315 = vmatpush3.bf16.msra.mxu0 %v8312_v11  ;;  %v8328_v11 = vpack.c.bf16 %v5705_v21, %v5704_v7  ;;  %v6081_v34 = vld [vmem:[%s10992_s5 + $0x458] sm:$0xff]  ;;  %v5685_v21 = vld [vmem:[%s9289_s27 + $0xa1] sm:$0xff] }
 0x182   : > { %8603 = vmatpush3.bf16.msra.mxu1 %v8600_v17  ;;  %8317 = vmatprep.subr.bf16.mxu0 %v8316_v32  ;;  %v5684_v7 = vld [vmem:[%s9289_s27 + $0x99] sm:$0xff] }
 0x183   : > { %7301 = vmatmul.mubr.f32.gmra.mrb[16].mxu0 %v5607_v40  ;;  %8605 = vmatprep.subr.bf16.mxu1 %v8604_v31 }
 0x184   : > { %7913 = vmatmul.mubr.f32.gmra.mrb[16].mxu1 %v5607_v40  ;;  %7303 = vmatprep.mubr.f32.mxu0 %v10017_v0  ;;  %v5710_v40 = vld [vmem:[%s10988_s1 + $0x460] sm:$0xff] }
 0x185   : > { %7915 = vmatprep.mubr.f32.mxu1 %v10017_v0  ;;  %9064 = vset.pattern.permute.xlu1 %v9106_v48  ;;  %v390_v0 = vld [vmem:[%s10991_s4 + $0x8] sm:$0xff] }
 0x186   : > { %9063 = vset.pattern.permute.xlu0 %v9106_v48  ;;  %2731 = vperm.xlu1 %9064, %v391_v36   ;;  %v5711_v36 = vld [vmem:[%s10988_s1 + $0x468] sm:$0xff] }
 0x187   : > { %7304 = vmatmul.mubr.f32.gmra.mrb[18].mxu0 %v10021_v1  ;;  %2721 = vperm.xlu0 %9063, %v389_v38   ;;  %v6083_v38 = vld [vmem:[%s10992_s5 + $0x468] sm:$0xff]  ;;  %v8340_v48 = vpack.c.bf16 %v5711_v36, %v5710_v40 }
 0x188   : > { %7916 = vmatmul.mubr.f32.gmra.mrb[18].mxu1 %v10021_v1  ;;  %7306 = vmatprep.mubr.f32.mxu0 %v10027_v2  ;;  %v5613_v1 = vld [vmem:[%s9289_s27 + $0xff] sm:$0xff] }
 0x189   : > { %7918 = vmatprep.mubr.f32.mxu1 %v10027_v2  ;;  %v5700_v2 = vld [vmem:[%s10988_s1 + $0x410] sm:$0xff] }
 0x18a   : > { %2736 = vperm.xlu1 %9064, %v392_v49   ;;  %v8320_v4 = vpack.c.bf16 %v5701_v59, %v5700_v2  ;;  %v403_v2 = vld [vmem:[%s10991_s4 + $0x70] sm:$0xff] }
 0x18b   : > { %7307 = vmatmul.mubr.f32.gmra.mrb[20].mxu0 %v5611_v51  ;;  %2726 = vperm.xlu0 %9063, %v390_v0   ;;  %v6085_v0 = vld [vmem:[%s10992_s5 + $0x478] sm:$0xff]  ;;  %v5674_v59 = vld [vmem:[%s9289_s27 + $0x49] sm:$0xff] }
 0x18c   : > { %7919 = vmatmul.mubr.f32.gmra.mrb[20].mxu1 %v5611_v51  ;;  %7309 = vmatprep.mubr.f32.mxu0 %v5612_v52  ;;  %v6084_v51 = vld [vmem:[%s10992_s5 + $0x470] sm:$0xff] }
 0x18d   : > { %7921 = vmatprep.mubr.f32.mxu1 %v5612_v52 }
 0x18e   : > { %2746 = vperm.xlu1 %9064, %v394_v43   ;;  %v6022_v43 = vld [vmem:[%s9289_s27 + $0xc8] sm:$0xff] }
 0x18f   : > { %7310 = vmatmul.mubr.f32.gmra.mrb[22].mxu0 %v5613_v1  ;;  %2741 = vperm.xlu0 %9063, %v393_v42   ;;  %v404_v42 = vld [vmem:[%s10991_s4 + $0x78] sm:$0xff] }
 0x190   : > { %7922 = vmatmul.mubr.f32.gmra.mrb[22].mxu1 %v5613_v1  ;;  %7344 = vmatprep.mubr.f32.mxu0 %v10054_v27  ;;  %v401_v1 = vld [vmem:[%s10991_s4 + $0x60] sm:$0xff] }
 0x191   : > { %7956 = vmatprep.mubr.f32.mxu1 %v10054_v27  ;;  %v6074_v27 = vld [vmem:[%s10992_s5 + $0x420] sm:$0xff] }
 0x192   : > { %2756 = vperm.xlu1 %9064, %v396_v62   ;;  %v405_v62 = vld [vmem:[%s10991_s4 + $0x80] sm:$0xff] }
 0x193   : > { %7345 = vmatmul.mubr.f32.vlgmr.msra.gmra.mrb[0].mxu0 %v10063_v30  ;;  %2751 = vperm.xlu0 %9063, %v395_v3   ;;  %v5677_v3 = vld [vmem:[%s9289_s27 + $0x61] sm:$0xff] }
 0x194   : > { %7957 = vmatmul.mubr.f32.vlgmr.msra.gmra.mrb[0].mxu1 %v10063_v30  ;;  %8319 = vmatpush3.bf16.msra.mxu0 %v8316_v32  ;;  %v8612_v30 = vpack.c.bf16 %v6075_v57, %v6074_v27  ;;  %v6016_v32 = vld [vmem:[%s9289_s27 + $0x98] sm:$0xff] }
 0x195   : > { %7347 = vmatprep.mubr.f32.mxu0 %v10075_v39  ;;  %7959 = vmatprep.mubr.f32.mxu1 %v10075_v39  ;;  %v6076_v39 = vld [vmem:[%s10992_s5 + $0x430] sm:$0xff]  ;;  %v5680_v27 = vld [vmem:[%s9289_s27 + $0x79] sm:$0xff] }
 0x196   : > { %8607 = vmatpush3.bf16.msra.mxu1 %v8604_v31  ;;  %8321 = vmatprep.subr.bf16.mxu0 %v8320_v4  ;;  %v8616_v17 = vpack.c.bf16 %v6077_v24, %v6076_v39  ;;  %v8336_v31 = vpack.c.bf16 %v5709_v23, %v5708_v35  ;;  %v412_v57 = vld [vmem:[%s10991_s4 + $0xb8] sm:$0xff]  ;;  %v5686_v39 = vld [vmem:[%s9289_s27 + $0xa9] sm:$0xff]  ;;  %v10766_v35 = vld [vmem:[%s10993_s6] ss:$0 sm:$0xff] }
 0x197   : > { %7348 = vmatmul.mubr.f32.gmra.mrb[2].mxu0 %v10085_v55  ;;  %8609 = vmatprep.subr.bf16.mxu1 %v8608_v54  ;;  %v5688_v24 = vld [vmem:[%s9289_s27 + $0xb9] sm:$0xff] }
 0x198   : > { %7960 = vmatmul.mubr.f32.gmra.mrb[2].mxu1 %v10085_v55  ;;  %7350 = vmatprep.mubr.f32.mxu0 %v10097_v45  ;;  %v5706_v55 = vld [vmem:[%s10988_s1 + $0x440] sm:$0xff]  ;;  %v5707_v45 = vld [vmem:[%s10988_s1 + $0x448] sm:$0xff] }
 0x199   : > { %8323 = vmatpush3.bf16.msra.mxu0 %v8320_v4  ;;  %7962 = vmatprep.mubr.f32.mxu1 %v6010_v19  ;;  %v8332_v25 = vpack.c.bf16 %v5707_v45, %v5706_v55  ;;  %v407_v4 = vld [vmem:[%s10991_s4 + $0x90] sm:$0xff]  ;;  %v5696_v55 = vld [vmem:[%s9289_s27 + $0xf9] sm:$0xff]  ;;  %v5697_v45 = vld [vmem:[%s9289_s27 + $0x101] sm:$0xff] }
 0x19a   : > { %8611 = vmatpush3.bf16.msra.mxu1 %v8608_v54  ;;  %8325 = vmatprep.subr.bf16.mxu0 %v8324_v20  ;;  %v5678_v54 = vld [vmem:[%s9289_s27 + $0x69] sm:$0xff] }
 0x19b   : > { %7351 = vmatmul.mubr.f32.gmra.mrb[4].mxu0 %v10107_v50  ;;  %8613 = vmatprep.subr.bf16.mxu1 %v8612_v30  ;;  %v411_v19 = vld [vmem:[%s10991_s4 + $0xb0] sm:$0xff] }
 0x19c   : > { %7963 = vmatmul.mubr.f32.gmra.mrb[4].mxu1 %v10107_v50  ;;  %7353 = vmatprep.mubr.f32.mxu0 %v10119_v10  ;;  %v8620_v50 = vpack.c.bf16 %v6079_v29, %v6078_v22 }
 0x19d   : > { %7965 = vmatprep.mubr.f32.mxu1 %v10119_v10  ;;  %8327 = vmatpush3.bf16.msra.mxu0 %v8324_v20  ;;  %v6080_v10 = vld [vmem:[%s10992_s5 + $0x450] sm:$0xff] }
 0x19e   : > { %8615 = vmatpush3.bf16.msra.mxu1 %v8612_v30  ;;  %8329 = vmatprep.subr.bf16.mxu0 %v8328_v11  ;;  %v5682_v20 = vld [vmem:[%s9289_s27 + $0x89] sm:$0xff]  ;;  %v5683_v30 = vld [vmem:[%s9289_s27 + $0x91] sm:$0xff] }
 0x19f   : > { %7354 = vmatmul.mubr.f32.gmra.mrb[6].mxu0 %v10129_v13  ;;  %8617 = vmatprep.subr.bf16.mxu1 %v8616_v17 }
 0x1a0   : > { %7966 = vmatmul.mubr.f32.gmra.mrb[6].mxu1 %v10129_v13  ;;  %7356 = vmatprep.mubr.f32.mxu0 %v10141_v6  ;;  %v8624_v13 = vpack.c.bf16 %v6081_v34, %v6080_v10  ;;  %v10773_v34 = vld [vmem:[%s10990_s3] ss:$0 sm:$0xff] }
 0x1a1   : > { %7968 = vmatprep.mubr.f32.mxu1 %v10141_v6  ;;  %8331 = vmatpush3.bf16.msra.mxu0 %v8328_v11  ;;  %v6082_v6 = vld [vmem:[%s10992_s5 + $0x460] sm:$0xff]  ;;  %v5690_v11 = vld [vmem:[%s9289_s27 + $0xc9] sm:$0xff] }
 0x1a2   : > { %8619 = vmatpush3.bf16.msra.mxu1 %v8616_v17  ;;  %8333 = vmatprep.subr.bf16.mxu0 %v8332_v25  ;;  %v8628_v49 = vpack.c.bf16 %v6083_v38, %v6082_v6  ;;  %v5691_v17 = vld [vmem:[%s9289_s27 + $0xd1] sm:$0xff] }
 0x1a3   : > { %7357 = vmatmul.mubr.f32.gmra.mrb[8].mxu0 %v10151_v18  ;;  %8621 = vmatprep.subr.bf16.mxu1 %v8620_v50 }
 0x1a4   : > { %7969 = vmatmul.mubr.f32.gmra.mrb[8].mxu1 %v10151_v18  ;;  %7359 = vmatprep.mubr.f32.mxu0 %v10163_v26  ;;  %v5712_v18 = vld [vmem:[%s10988_s1 + $0x470] sm:$0xff]  ;;  %v5713_v26 = vld [vmem:[%s10988_s1 + $0x478] sm:$0xff] }
 0x1a5   : > { %7971 = vmatprep.mubr.f32.mxu1 %v6016_v32  ;;  %8335 = vmatpush3.bf16.msra.mxu0 %v8332_v25  ;;  %v8344_v52 = vpack.c.bf16 %v5713_v26, %v5712_v18 }
 0x1a6   : > { %8623 = vmatpush3.bf16.msra.mxu1 %v8620_v50  ;;  %8337 = vmatprep.subr.bf16.mxu0 %v8336_v31 }
 0x1a7   : > { %7360 = vmatmul.mubr.f32.gmra.mrb[10].mxu0 %v10173_v33  ;;  %8625 = vmatprep.subr.bf16.mxu1 %v8624_v13 }
 0x1a8   : > { %7972 = vmatmul.mubr.f32.gmra.mrb[10].mxu1 %v10173_v33  ;;  %7362 = vmatprep.mubr.f32.mxu0 %v10185_v56  ;;  %v8632_v33 = vpack.c.bf16 %v6085_v0, %v6084_v51 }
 0x1a9   : > { %7974 = vmatprep.mubr.f32.mxu1 %v10185_v56  ;;  %8339 = vmatpush3.bf16.msra.mxu0 %v8336_v31  ;;  %v398_v56 = vld [vmem:[%s10991_s4 + $0x48] sm:$0xff] }
 0x1aa   : > { %8627 = vmatpush3.bf16.msra.mxu1 %v8624_v13  ;;  %8341 = vmatprep.subr.bf16.mxu0 %v8340_v48  ;;  %v10779_v13 = vld [vmem:[%s10994_s7] ss:$0 sm:$0xff] }
 0x1ab   : > { %7363 = vmatmul.mubr.f32.gmra.mrb[12].mxu0 %v10195_v60  ;;  %8629 = vmatprep.subr.bf16.mxu1 %v8628_v49 }
 0x1ac   : > { %7975 = vmatmul.mubr.f32.gmra.mrb[12].mxu1 %v10195_v60  ;;  %7365 = vmatprep.mubr.f32.mxu0 %v10201_v8  ;;  %v397_v60 = vld [vmem:[%s10991_s4 + $0x40] sm:$0xff] }
 0x1ad   : > { %7977 = vmatprep.mubr.f32.mxu1 %v10201_v8  ;;  %8343 = vmatpush3.bf16.msra.mxu0 %v8340_v48  ;;  %v400_v8 = vld [vmem:[%s10991_s4 + $0x58] sm:$0xff] }
 0x1ae   : > { %8631 = vmatpush3.bf16.msra.mxu1 %v8628_v49  ;;  %8345 = vmatprep.subr.bf16.mxu0 %v8344_v52 }
 0x1af   : > { %7366 = vmatmul.mubr.f32.gmra.mrb[14].mxu0 %v10205_v9  ;;  %8633 = vmatprep.subr.bf16.mxu1 %v8632_v33 }
 0x1b0   : > { %7978 = vmatmul.mubr.f32.gmra.mrb[14].mxu1 %v10205_v9  ;;  %7368 = vmatprep.mubr.f32.mxu0 %v10211_v53  ;;  %v399_v9 = vld [vmem:[%s10991_s4 + $0x50] sm:$0xff]  ;;  %v402_v53 = vld [vmem:[%s10991_s4 + $0x68] sm:$0xff] }
 0x1b1   : > { %7980 = vmatprep.mubr.f32.mxu1 %v6022_v43  ;;  %8347 = vmatpush3.bf16.msra.mxu0 %v8344_v52 }
 0x1b2   : > { %8635 = vmatpush3.bf16.msra.mxu1 %v8632_v33  ;;  %2766 = vperm.xlu1 %9064, %v398_v56  }
 0x1b3   : > { %7369 = vmatmul.mubr.f32.gmra.mrb[16].mxu0 %v10215_v12  ;;  %2761 = vperm.xlu0 %9063, %v397_v60  }
 0x1b4   : > { %7981 = vmatmul.mubr.f32.gmra.mrb[16].mxu1 %v10215_v12  ;;  %7371 = vmatprep.mubr.f32.mxu0 %v10221_v58  ;;  %v5653_v12 = vld [vmem:[%s9289_s27 + $0xf0] sm:$0xff] }
 0x1b5   : > { %7983 = vmatprep.mubr.f32.mxu1 %v10221_v58  ;;  %v5654_v58 = vld [vmem:[%s9289_s27 + $0xf8] sm:$0xff] }
 0x1b6   : > { %2776 = vperm.xlu1 %9064, %v400_v8  }
 0x1b7   : > { %7372 = vmatmul.mubr.f32.gmra.mrb[18].mxu0 %v10225_v14  ;;  %2771 = vperm.xlu0 %9063, %v399_v9  }
 0x1b8   : > { %7984 = vmatmul.mubr.f32.gmra.mrb[18].mxu1 %v10225_v14  ;;  %7374 = vmatprep.mubr.f32.mxu0 %v10231_v61  ;;  %v5655_v14 = vld [vmem:[%s9289_s27 + $0x100] sm:$0xff] }
 0x1b9   : > { %7986 = vmatprep.mubr.f32.mxu1 %v10231_v61  ;;  %v406_v61 = vld [vmem:[%s10991_s4 + $0x88] sm:$0xff] }
 0x1ba   : > { %2786 = vperm.xlu1 %9064, %v402_v53  }
 0x1bb   : > { %7375 = vmatmul.mubr.f32.gmra.mrb[20].mxu0 %v5653_v12  ;;  %2781 = vperm.xlu0 %9063, %v401_v1  }
 0x1bc   : > { %7987 = vmatmul.mubr.f32.gmra.mrb[20].mxu1 %v5653_v12  ;;  %7377 = vmatprep.mubr.f32.mxu0 %v5654_v58 }
 0x1bd   : > { %7989 = vmatprep.mubr.f32.mxu1 %v5654_v58 }
 0x1be   : > { %2796 = vperm.xlu1 %9064, %v404_v42  }
 0x1bf   : > { %7378 = vmatmul.mubr.f32.gmra.mrb[22].mxu0 %v5655_v14  ;;  %2791 = vperm.xlu0 %9063, %v403_v2  }
 0x1c0   : > { %7990 = vmatmul.mubr.f32.gmra.mrb[22].mxu1 %v5655_v14  ;;  %7412 = vmatprep.mubr.f32.mxu0 %v5674_v59 }
 0x1c1   : > { %8024 = vmatprep.mubr.f32.mxu1 %v5674_v59 }
 0x1c2   : > { %2806 = vperm.xlu1 %9064, %v406_v61  }
 0x1c3   : > { %7413 = vmatmul.mubr.f32.vlgmr.msra.gmra.mrb[0].mxu0 %v10267_v28  ;;  %2801 = vperm.xlu0 %9063, %v405_v62  }
 0x1c4   : > { %8025 = vmatmul.mubr.f32.vlgmr.msra.gmra.mrb[0].mxu1 %v10267_v28  ;;  %7415 = vmatprep.mubr.f32.mxu0 %v5676_v63  ;;  %v409_v28 = vld [vmem:[%s10991_s4 + $0xa0] sm:$0xff] }
 0x1c5   : > { %8027 = vmatprep.mubr.f32.mxu1 %v5676_v63 }
 0x1c6   : > { %2816 = vperm.xlu1 %9064, %v408_v47  }
 0x1c7   : > { %7416 = vmatmul.mubr.f32.gmra.mrb[2].mxu0 %v5677_v3  ;;  %2811 = vperm.xlu0 %9063, %v407_v4  }
 0x1c8   : > { %8028 = vmatmul.mubr.f32.gmra.mrb[2].mxu1 %v5677_v3  ;;  %7418 = vmatprep.mubr.f32.mxu0 %v5678_v54 }
 0x1c9   : > { %8030 = vmatprep.mubr.f32.mxu1 %v5678_v54 }
 0x1ca   : > { %2826 = vperm.xlu1 %9064, %v410_v5  }
 0x1cb   : > { %7419 = vmatmul.mubr.f32.gmra.mrb[4].mxu0 %v5679_v16  ;;  %2821 = vperm.xlu0 %9063, %v409_v28  }
 0x1cc   : > { %8031 = vmatmul.mubr.f32.gmra.mrb[4].mxu1 %v5679_v16  ;;  %7421 = vmatprep.mubr.f32.mxu0 %v5680_v27 }
 0x1cd   : > { %8033 = vmatprep.mubr.f32.mxu1 %v5680_v27 }
 0x1ce   : > { %2836 = vperm.xlu1 %9064, %v412_v57  }
 0x1cf   : > { %7422 = vmatmul.mubr.f32.gmra.mrb[6].mxu0 %v10318_v15  ;;  %2831 = vperm.xlu0 %9063, %v411_v19  }
 0x1d0   : > { %8034 = vmatmul.mubr.f32.gmra.mrb[6].mxu1 %v10318_v15  ;;  %7424 = vmatprep.mubr.f32.mxu0 %v5682_v20  ;;  %v5689_v15 = vld [vmem:[%s9289_s27 + $0xc1] sm:$0xff] }
 0x1d1   : > { %8036 = vmatprep.mubr.f32.mxu1 %v5682_v20 }
 0x1d3   : > { %7425 = vmatmul.mubr.f32.gmra.mrb[8].mxu0 %v5683_v30 }
 0x1d4   : > { %8037 = vmatmul.mubr.f32.gmra.mrb[8].mxu1 %v5683_v30  ;;  %7427 = vmatprep.mubr.f32.mxu0 %v5684_v7 }
 0x1d5   : > { %8039 = vmatprep.mubr.f32.mxu1 %v5684_v7 }
 0x1d7   : > { %7428 = vmatmul.mubr.f32.gmra.mrb[10].mxu0 %v5685_v21 }
 0x1d8   : > { %8040 = vmatmul.mubr.f32.gmra.mrb[10].mxu1 %v5685_v21  ;;  %7430 = vmatprep.mubr.f32.mxu0 %v5686_v39 }
 0x1d9   : > { %8042 = vmatprep.mubr.f32.mxu1 %v5686_v39 }
 0x1db   : > { %7431 = vmatmul.mubr.f32.gmra.mrb[12].mxu0 %v10369_v37 }
 0x1dc   : > { %8043 = vmatmul.mubr.f32.gmra.mrb[12].mxu1 %v10369_v37  ;;  %7433 = vmatprep.mubr.f32.mxu0 %v5688_v24  ;;  %v5695_v37 = vld [vmem:[%s9289_s27 + $0xf1] sm:$0xff] }
 0x1dd   : > { %8045 = vmatprep.mubr.f32.mxu1 %v5688_v24 }
 0x1df   : > { %7434 = vmatmul.mubr.f32.gmra.mrb[14].mxu0 %v5689_v15 }
 0x1e0   : > { %8046 = vmatmul.mubr.f32.gmra.mrb[14].mxu1 %v5689_v15  ;;  %7436 = vmatprep.mubr.f32.mxu0 %v5690_v11 }
 0x1e1   : > { %8048 = vmatprep.mubr.f32.mxu1 %v5690_v11 }
 0x1e3   : > { %7437 = vmatmul.mubr.f32.gmra.mrb[16].mxu0 %v5691_v17 }
 0x1e4   : > { %8049 = vmatmul.mubr.f32.gmra.mrb[16].mxu1 %v5691_v17  ;;  %7439 = vmatprep.mubr.f32.mxu0 %v10383_v41 }
 0x1e5   : > { %8051 = vmatprep.mubr.f32.mxu1 %v10383_v41 }
 0x1e7   : > { %7440 = vmatmul.mubr.f32.gmra.mrb[18].mxu0 %v10387_v44 }
 0x1e8   : > { %8052 = vmatmul.mubr.f32.gmra.mrb[18].mxu1 %v10387_v44  ;;  %7442 = vmatprep.mubr.f32.mxu0 %v10393_v46 }
 0x1e9   : > { %8054 = vmatprep.mubr.f32.mxu1 %v10393_v46  ;;  %v10761_v46 = vld [vmem:[%s10989_s2] ss:$0 sm:$0xff] }
 0x1eb   : > { %7443 = vmatmul.mubr.f32.gmra.mrb[20].mxu0 %v5695_v37 }
 0x1ec   : > { %8055 = vmatmul.mubr.f32.gmra.mrb[20].mxu1 %v5695_v37  ;;  %7445 = vmatprep.mubr.f32.mxu0 %v5696_v55 }
 0x1ed   : > { %8057 = vmatprep.mubr.f32.mxu1 %v5696_v55 }
 0x1ef   : > { %7446 = vmatmul.mubr.f32.gmra.mrb[22].mxu0 %v5697_v45 }
 0x1f0   : > { %8058 = vmatmul.mubr.f32.gmra.mrb[22].mxu1 %v5697_v45 }
 0x205   : > { %v10752_v22 = vpop.permute.xlu1 %2731 }
 0x206   : > { %v2722_v41 = vpop.permute.xlu0 %2721 }
 0x209   : > { %v2737_v29 = vpop.permute.xlu1 %2736 }
 0x20a   : > { %v2727_v25 = vpop.permute.xlu0 %2726 }
 0x20d   : > { %v10754_v50 = vpop.permute.xlu1 %2746 }
 0x20e   : > { %v10756_v44 = vpop.permute.xlu0 %2741 }
 0x211   : > { %v10768_v23 = vpop.permute.xlu1 %2756 }
 0x212   : > { %v10781_v36 = vpop.permute.xlu0 %2751 }
 0x231   : > { %v10795_v8 = vpop.permute.xlu1 %2766 }
 0x232   : > { %v10805_v61 = vpop.permute.xlu0 %2761 }
 0x235   : > { %v10820_v15 = vpop.permute.xlu1 %2776 }
 0x296   : > { %v7414_v10 = vpop.f32.mrb[0].mxu0 }
 0x297   : > { %v2641_v32 = vmul.f32 %v7414_v10, %v10761_v46  ;;  %v8026_v31 = vpop.f32.mrb[0].mxu1  ;;  %v2490_v40 = vpop.f32.mrb[1].mxu0 }
 0x298   : > { %v5097_v6 = vmul.f32 %v8026_v31, %v10766_v35  ;;  %v2640_v38 = vmul.f32 %v10761_v46, %v2490_v40  ;;  %v4946_v48 = vpop.f32.mrb[1].mxu1 }
 0x299   : > { %v2672_v49 = vadd.f32 %v10773_v34, %v2641_v32  ;;  %v5096_v18 = vmul.f32 %v10766_v35, %v4946_v48  ;;  %v10830_v32 = vpop.permute.xlu0 %2771 }
 0x29a   : > { %v5128_v26 = vadd.f32 %v10779_v13, %v5097_v6  ;;  %v2671_v51 = vadd.f32 %v10773_v34, %v2640_v38  ;;  %v7417_v0 = vpop.f32.mrb[2].mxu0 }
 0x29b   : > { %v2696_v52 = vmax.f32 %v2672_v49, 0.0  ;;  %v5127_v33 = vadd.f32 %v10779_v13, %v5096_v18  ;;  %v2643_v43 = vmul.f32 %v7417_v0, %v10761_v46  ;;  %v8029_v56 = vpop.f32.mrb[2].mxu1  ;;  %v2500_v60 = vpop.f32.mrb[3].mxu0 }
 0x29c   : > { %v5152_v9 = vmul.f32 %v5128_v26, %v2727_v25  ;;  %v2695_v53 = vmax.f32 %v2671_v51, 0.0  ;;  %v5099_v12 = vmul.f32 %v8029_v56, %v10766_v35  ;;  %v2642_v1 = vmul.f32 %v10761_v46, %v2500_v60  ;;  %v4956_v58 = vpop.f32.mrb[3].mxu1 }
 0x29d   : > { %v2840_v42 = vmul.f32 %v2727_v25, %v2696_v52  ;;  %v5151_v14 = vmul.f32 %v5127_v33, %v2722_v41  ;;  %v2674_v2 = vadd.f32 %v10773_v34, %v2643_v43  ;;  %v5098_v59 = vmul.f32 %v10766_v35, %v4956_v58 }
 0x29e   : > { %6091 = vst [vmem:[%s10791_s26 + $0x38] sm:$0xff] %v5152_v9  ;;  %v2839_v62 = vmul.f32 %v2722_v41, %v2695_v53  ;;  %v5130_v63 = vadd.f32 %v10779_v13, %v5099_v12  ;;  %v2673_v47 = vadd.f32 %v10773_v34, %v2642_v1  ;;  %v7420_v3 = vpop.f32.mrb[4].mxu0  ;;  %v10848_v53 = vpop.permute.xlu1 %2786 }
 0x29f   : > { %5719 = vst [vmem:[%s10799_s29 + $0x38] sm:$0xff] %v2840_v42  ;;  %6090 = vst [vmem:[%s10791_s26 + $0x30] sm:$0xff] %v5151_v14  ;;  %v2698_v4 = vmax.f32 %v2674_v2, 0.0  ;;  %v5129_v54 = vadd.f32 %v10779_v13, %v5098_v59  ;;  %v2645_v5 = vmul.f32 %v7420_v3, %v10761_v46  ;;  %v8032_v16 = vpop.f32.mrb[4].mxu1  ;;  %v2510_v28 = vpop.f32.mrb[5].mxu0 }
 0x2a0   : > { %5718 = vst [vmem:[%s10799_s29 + $0x30] sm:$0xff] %v2839_v62  ;;  %v5154_v27 = vmul.f32 %v5130_v63, %v2737_v29  ;;  %v2697_v57 = vmax.f32 %v2673_v47, 0.0  ;;  %v5101_v19 = vmul.f32 %v8032_v16, %v10766_v35  ;;  %v2644_v20 = vmul.f32 %v10761_v46, %v2510_v28  ;;  %v4966_v30 = vpop.f32.mrb[5].mxu1  ;;  %v10858_v63 = vpop.permute.xlu0 %2781 }
 0x2a1   : > { %v2842_v7 = vmul.f32 %v2737_v29, %v2698_v4  ;;  %v5153_v21 = vmul.f32 %v5129_v54, %v10752_v22  ;;  %v2676_v39 = vadd.f32 %v10773_v34, %v2645_v5  ;;  %v5100_v24 = vmul.f32 %v10766_v35, %v4966_v30 }
 0x2a2   : > { %6093 = vst [vmem:[%s10791_s26 + $0x48] sm:$0xff] %v5154_v27  ;;  %v2841_v11 = vmul.f32 %v10752_v22, %v2697_v57  ;;  %v5132_v17 = vadd.f32 %v10779_v13, %v5101_v19  ;;  %v2675_v37 = vadd.f32 %v10773_v34, %v2644_v20  ;;  %v7423_v55 = vpop.f32.mrb[6].mxu0 }
 0x2a3   : > { %5721 = vst [vmem:[%s10799_s29 + $0x48] sm:$0xff] %v2842_v7  ;;  %6092 = vst [vmem:[%s10791_s26 + $0x40] sm:$0xff] %v5153_v21  ;;  %v2700_v45 = vmax.f32 %v2676_v39, 0.0  ;;  %v5131_v41 = vadd.f32 %v10779_v13, %v5100_v24  ;;  %v2647_v29 = vmul.f32 %v7423_v55, %v10761_v46  ;;  %v8035_v25 = vpop.f32.mrb[6].mxu1  ;;  %v2520_v10 = vpop.f32.mrb[7].mxu0 }
 0x2a4   : > { %5720 = vst [vmem:[%s10799_s29 + $0x40] sm:$0xff] %v2841_v11  ;;  %v5156_v22 = vmul.f32 %v5132_v17, %v10754_v50  ;;  %v2699_v31 = vmax.f32 %v2675_v37, 0.0  ;;  %v5103_v40 = vmul.f32 %v8035_v25, %v10766_v35  ;;  %v2646_v6 = vmul.f32 %v10761_v46, %v2520_v10  ;;  %v4976_v38 = vpop.f32.mrb[7].mxu1  ;;  %v10876_v11 = vpop.permute.xlu1 %2796 }
 0x2a5   : > { %v2844_v48 = vmul.f32 %v10754_v50, %v2700_v45  ;;  %v5155_v49 = vmul.f32 %v5131_v41, %v10756_v44  ;;  %v2678_v18 = vadd.f32 %v10773_v34, %v2647_v29  ;;  %v5102_v26 = vmul.f32 %v10766_v35, %v4976_v38 }
 0x2a6   : > { %6095 = vst [vmem:[%s10791_s26 + $0x58] sm:$0xff] %v5156_v22  ;;  %v2843_v51 = vmul.f32 %v10756_v44, %v2699_v31  ;;  %v5134_v0 = vadd.f32 %v10779_v13, %v5103_v40  ;;  %v2677_v52 = vadd.f32 %v10773_v34, %v2646_v6  ;;  %v7426_v33 = vpop.f32.mrb[8].mxu0  ;;  %v2792_v22 = vpop.permute.xlu0 %2791 }
 0x2a7   : > { %5723 = vst [vmem:[%s10799_s29 + $0x58] sm:$0xff] %v2844_v48  ;;  %6094 = vst [vmem:[%s10791_s26 + $0x50] sm:$0xff] %v5155_v49  ;;  %v2702_v43 = vmax.f32 %v2678_v18, 0.0  ;;  %v5133_v50 = vadd.f32 %v10779_v13, %v5102_v26  ;;  %v2649_v56 = vmul.f32 %v7426_v33, %v10761_v46  ;;  %v8038_v60 = vpop.f32.mrb[8].mxu1  ;;  %v2530_v9 = vpop.f32.mrb[9].mxu0 }
 0x2a8   : > { %5722 = vst [vmem:[%s10799_s29 + $0x50] sm:$0xff] %v2843_v51  ;;  %v5158_v44 = vmul.f32 %v5134_v0, %v10768_v23  ;;  %v2701_v12 = vmax.f32 %v2677_v52, 0.0  ;;  %v5105_v1 = vmul.f32 %v8038_v60, %v10766_v35  ;;  %v2648_v58 = vmul.f32 %v10761_v46, %v2530_v9  ;;  %v4986_v42 = vpop.f32.mrb[9].mxu1  ;;  %v2807_v9 = vpop.permute.xlu1 %2806 }
 0x2a9   : > { %v2846_v14 = vmul.f32 %v10768_v23, %v2702_v43  ;;  %v5157_v2 = vmul.f32 %v5133_v50, %v10781_v36  ;;  %v2680_v59 = vadd.f32 %v10773_v34, %v2649_v56  ;;  %v5104_v62 = vmul.f32 %v10766_v35, %v4986_v42 }
 0x2aa   : > { %6097 = vst [vmem:[%s10791_s26 + $0x68] sm:$0xff] %v5158_v44  ;;  %v2845_v47 = vmul.f32 %v10781_v36, %v2701_v12  ;;  %v5136_v3 = vadd.f32 %v10779_v13, %v5105_v1  ;;  %v2679_v4 = vadd.f32 %v10773_v34, %v2648_v58  ;;  %v7429_v54 = vpop.f32.mrb[10].mxu0 }
 0x2ab   : > { %5725 = vst [vmem:[%s10799_s29 + $0x68] sm:$0xff] %v2846_v14  ;;  %6096 = vst [vmem:[%s10791_s26 + $0x60] sm:$0xff] %v5157_v2  ;;  %v2704_v23 = vmax.f32 %v2680_v59, 0.0  ;;  %v5135_v5 = vadd.f32 %v10779_v13, %v5104_v62  ;;  %v2651_v16 = vmul.f32 %v7429_v54, %v10761_v46  ;;  %v8041_v28 = vpop.f32.mrb[10].mxu1  ;;  %v2540_v27 = vpop.f32.mrb[11].mxu0 }
 0x2ac   : > { %5724 = vst [vmem:[%s10799_s29 + $0x60] sm:$0xff] %v2845_v47  ;;  %v5160_v57 = vmul.f32 %v5136_v3, %v10795_v8  ;;  %v2703_v36 = vmax.f32 %v2679_v4, 0.0  ;;  %v5107_v19 = vmul.f32 %v8041_v28, %v10766_v35  ;;  %v2650_v20 = vmul.f32 %v10761_v46, %v2540_v27  ;;  %v4996_v30 = vpop.f32.mrb[11].mxu1  ;;  %v2802_v62 = vpop.permute.xlu0 %2801 }
 0x2ad   : > { %v2848_v7 = vmul.f32 %v10795_v8, %v2704_v23  ;;  %v5159_v21 = vmul.f32 %v5135_v5, %v10805_v61  ;;  %v2682_v39 = vadd.f32 %v10773_v34, %v2651_v16  ;;  %v5106_v24 = vmul.f32 %v10766_v35, %v4996_v30 }
 0x2ae   : > { %6099 = vst [vmem:[%s10791_s26 + $0x78] sm:$0xff] %v5160_v57  ;;  %v2847_v17 = vmul.f32 %v10805_v61, %v2703_v36  ;;  %v5138_v37 = vadd.f32 %v10779_v13, %v5107_v19  ;;  %v2681_v55 = vadd.f32 %v10773_v34, %v2650_v20  ;;  %v7432_v45 = vpop.f32.mrb[12].mxu0 }
 0x2af   : > { %5727 = vst [vmem:[%s10799_s29 + $0x78] sm:$0xff] %v2848_v7  ;;  %6098 = vst [vmem:[%s10791_s26 + $0x70] sm:$0xff] %v5159_v21  ;;  %v2706_v8 = vmax.f32 %v2682_v39, 0.0  ;;  %v5137_v41 = vadd.f32 %v10779_v13, %v5106_v24  ;;  %v2653_v29 = vmul.f32 %v7432_v45, %v10761_v46  ;;  %v8044_v25 = vpop.f32.mrb[12].mxu1  ;;  %v2550_v10 = vpop.f32.mrb[13].mxu0 }
 0x2b0   : > { %5726 = vst [vmem:[%s10799_s29 + $0x70] sm:$0xff] %v2847_v17  ;;  %v5162_v61 = vmul.f32 %v5138_v37, %v10820_v15  ;;  %v2705_v31 = vmax.f32 %v2681_v55, 0.0  ;;  %v5109_v40 = vmul.f32 %v8044_v25, %v10766_v35  ;;  %v2652_v6 = vmul.f32 %v10761_v46, %v2550_v10  ;;  %v5006_v38 = vpop.f32.mrb[13].mxu1  ;;  %v2817_v39 = vpop.permute.xlu1 %2816 }
 0x2b1   : > { %v2850_v48 = vmul.f32 %v10820_v15, %v2706_v8  ;;  %v5161_v49 = vmul.f32 %v5137_v41, %v10830_v32  ;;  %v2684_v18 = vadd.f32 %v10773_v34, %v2653_v29  ;;  %v5108_v26 = vmul.f32 %v10766_v35, %v5006_v38  ;;  %v2812_v25 = vpop.permute.xlu0 %2811 }
 0x2b2   : > { %6101 = vst [vmem:[%s10791_s26 + $0x88] sm:$0xff] %v5162_v61  ;;  %v2849_v51 = vmul.f32 %v10830_v32, %v2705_v31  ;;  %v5140_v0 = vadd.f32 %v10779_v13, %v5109_v40  ;;  %v2683_v52 = vadd.f32 %v10773_v34, %v2652_v6  ;;  %v7435_v33 = vpop.f32.mrb[14].mxu0 }
 0x2b3   : > { %5729 = vst [vmem:[%s10799_s29 + $0x88] sm:$0xff] %v2850_v48  ;;  %6100 = vst [vmem:[%s10791_s26 + $0x80] sm:$0xff] %v5161_v49  ;;  %v2708_v43 = vmax.f32 %v2684_v18, 0.0  ;;  %v5139_v15 = vadd.f32 %v10779_v13, %v5108_v26  ;;  %v2655_v50 = vmul.f32 %v7435_v33, %v10761_v46  ;;  %v8047_v56 = vpop.f32.mrb[14].mxu1  ;;  %v2560_v60 = vpop.f32.mrb[15].mxu0 }
 0x2b4   : > { %5728 = vst [vmem:[%s10799_s29 + $0x80] sm:$0xff] %v2849_v51  ;;  %v5164_v32 = vmul.f32 %v5140_v0, %v10848_v53  ;;  %v2707_v44 = vmax.f32 %v2683_v52, 0.0  ;;  %v5111_v12 = vmul.f32 %v8047_v56, %v10766_v35  ;;  %v2654_v1 = vmul.f32 %v10761_v46, %v2560_v60  ;;  %v5016_v58 = vpop.f32.mrb[15].mxu1 }
 0x2b5   : > { %v2852_v42 = vmul.f32 %v10848_v53, %v2708_v43  ;;  %v5163_v14 = vmul.f32 %v5139_v15, %v10858_v63  ;;  %v2686_v2 = vadd.f32 %v10773_v34, %v2655_v50  ;;  %v5110_v59 = vmul.f32 %v10766_v35, %v5016_v58 }
 0x2b6   : > { %6103 = vst [vmem:[%s10791_s26 + $0x98] sm:$0xff] %v5164_v32  ;;  %v2851_v47 = vmul.f32 %v10858_v63, %v2707_v44  ;;  %v5142_v3 = vadd.f32 %v10779_v13, %v5111_v12  ;;  %v2685_v4 = vadd.f32 %v10773_v34, %v2654_v1  ;;  %v7438_v54 = vpop.f32.mrb[16].mxu0  ;;  %v2827_v12 = vpop.permute.xlu1 %2826 }
 0x2b7   : > { %5731 = vst [vmem:[%s10799_s29 + $0x98] sm:$0xff] %v2852_v42  ;;  %6102 = vst [vmem:[%s10791_s26 + $0x90] sm:$0xff] %v5163_v14  ;;  %v2710_v23 = vmax.f32 %v2686_v2, 0.0  ;;  %v5141_v53 = vadd.f32 %v10779_v13, %v5110_v59  ;;  %v2657_v5 = vmul.f32 %v7438_v54, %v10761_v46  ;;  %v8050_v16 = vpop.f32.mrb[16].mxu1  ;;  %v2570_v28 = vpop.f32.mrb[17].mxu0 }
 0x2b8   : > { %5730 = vst [vmem:[%s10799_s29 + $0x90] sm:$0xff] %v2851_v47  ;;  %v5166_v27 = vmul.f32 %v5142_v3, %v10876_v11  ;;  %v2709_v63 = vmax.f32 %v2685_v4, 0.0  ;;  %v5113_v57 = vmul.f32 %v8050_v16, %v10766_v35  ;;  %v2656_v36 = vmul.f32 %v10761_v46, %v2570_v28  ;;  %v5026_v19 = vpop.f32.mrb[17].mxu1  ;;  %v2822_v2 = vpop.permute.xlu0 %2821 }
 0x2b9   : > { %v2854_v20 = vmul.f32 %v10876_v11, %v2710_v23  ;;  %v5165_v30 = vmul.f32 %v5141_v53, %v2792_v22  ;;  %v2688_v7 = vadd.f32 %v10773_v34, %v2657_v5  ;;  %v5112_v21 = vmul.f32 %v10766_v35, %v5026_v19 }
 0x2ba   : > { %6105 = vst [vmem:[%s10791_s26 + $0xa8] sm:$0xff] %v5166_v27  ;;  %v2853_v24 = vmul.f32 %v2792_v22, %v2709_v63  ;;  %v5144_v17 = vadd.f32 %v10779_v13, %v5113_v57  ;;  %v2687_v37 = vadd.f32 %v10773_v34, %v2656_v36  ;;  %v7441_v55 = vpop.f32.mrb[18].mxu0 }
 0x2bb   : > { %5733 = vst [vmem:[%s10799_s29 + $0xa8] sm:$0xff] %v2854_v20  ;;  %6104 = vst [vmem:[%s10791_s26 + $0xa0] sm:$0xff] %v5165_v30  ;;  %v2712_v45 = vmax.f32 %v2688_v7, 0.0  ;;  %v5143_v11 = vadd.f32 %v10779_v13, %v5112_v21  ;;  %v2659_v8 = vmul.f32 %v7441_v55, %v10761_v46  ;;  %v8053_v41 = vpop.f32.mrb[18].mxu1  ;;  %v2580_v29 = vpop.f32.mrb[19].mxu0 }
 0x2bc   : > { %5732 = vst [vmem:[%s10799_s29 + $0xa0] sm:$0xff] %v2853_v24  ;;  %v5168_v10 = vmul.f32 %v5144_v17, %v2807_v9  ;;  %v2711_v22 = vmax.f32 %v2687_v37, 0.0  ;;  %v5115_v61 = vmul.f32 %v8053_v41, %v10766_v35  ;;  %v2658_v31 = vmul.f32 %v10761_v46, %v2580_v29  ;;  %v5036_v40 = vpop.f32.mrb[19].mxu1  ;;  %v2837_v24 = vpop.permute.xlu1 %2836 }
 0x2bd   : > { %v2856_v6 = vmul.f32 %v2807_v9, %v2712_v45  ;;  %v5167_v38 = vmul.f32 %v5143_v11, %v2802_v62  ;;  %v2690_v48 = vadd.f32 %v10773_v34, %v2659_v8  ;;  %v5114_v49 = vmul.f32 %v10766_v35, %v5036_v40  ;;  %v2832_v37 = vpop.permute.xlu0 %2831 }
 0x2be   : > { %6107 = vst [vmem:[%s10791_s26 + $0xb8] sm:$0xff] %v5168_v10  ;;  %v2855_v18 = vmul.f32 %v2802_v62, %v2711_v22  ;;  %v5146_v26 = vadd.f32 %v10779_v13, %v5115_v61  ;;  %v2689_v51 = vadd.f32 %v10773_v34, %v2658_v31  ;;  %v7444_v0 = vpop.f32.mrb[20].mxu0 }
 0x2bf   : > { %5735 = vst [vmem:[%s10799_s29 + $0xb8] sm:$0xff] %v2856_v6  ;;  %6106 = vst [vmem:[%s10791_s26 + $0xb0] sm:$0xff] %v5167_v38  ;;  %v2714_v52 = vmax.f32 %v2690_v48, 0.0  ;;  %v5145_v33 = vadd.f32 %v10779_v13, %v5114_v49  ;;  %v2661_v43 = vmul.f32 %v7444_v0, %v10761_v46  ;;  %v8056_v15 = vpop.f32.mrb[20].mxu1  ;;  %v2590_v50 = vpop.f32.mrb[21].mxu0 }
 0x2c0   : > { %5734 = vst [vmem:[%s10799_s29 + $0xb0] sm:$0xff] %v2855_v18  ;;  %v5170_v56 = vmul.f32 %v5146_v26, %v2817_v39  ;;  %v2713_v60 = vmax.f32 %v2689_v51, 0.0  ;;  %v5117_v9 = vmul.f32 %v8056_v15, %v10766_v35  ;;  %v2660_v32 = vmul.f32 %v10761_v46, %v2590_v50  ;;  %v5046_v44 = vpop.f32.mrb[21].mxu1 }
 0x2c1   : > { %v2858_v1 = vmul.f32 %v2817_v39, %v2714_v52  ;;  %v5169_v58 = vmul.f32 %v5145_v33, %v2812_v25  ;;  %v2692_v42 = vadd.f32 %v10773_v34, %v2661_v43  ;;  %v5116_v14 = vmul.f32 %v10766_v35, %v5046_v44 }
 0x2c2   : > { %6109 = vst [vmem:[%s10791_s26 + $0xc8] sm:$0xff] %v5170_v56  ;;  %v2857_v59 = vmul.f32 %v2812_v25, %v2713_v60  ;;  %v5148_v62 = vadd.f32 %v10779_v13, %v5117_v9  ;;  %v2691_v47 = vadd.f32 %v10773_v34, %v2660_v32  ;;  %v7447_v3 = vpop.f32.mrb[22].mxu0 }
 0x2c3   : > { %5737 = vst [vmem:[%s10799_s29 + $0xc8] sm:$0xff] %v2858_v1  ;;  %6108 = vst [vmem:[%s10791_s26 + $0xc0] sm:$0xff] %v5169_v58  ;;  %v2716_v4 = vmax.f32 %v2692_v42, 0.0  ;;  %v5147_v54 = vadd.f32 %v10779_v13, %v5116_v14  ;;  %v2663_v23 = vmul.f32 %v7447_v3, %v10761_v46  ;;  %v8059_v53 = vpop.f32.mrb[22].mxu1  ;;  %v2600_v5 = vpop.f32.mrb[23].mxu0 }
 0x2c4   : > { %5736 = vst [vmem:[%s10799_s29 + $0xc0] sm:$0xff] %v2857_v59  ;;  %v5172_v16 = vmul.f32 %v5148_v62, %v2827_v12  ;;  %v2715_v28 = vmax.f32 %v2691_v47, 0.0  ;;  %v5119_v27 = vmul.f32 %v8059_v53, %v10766_v35  ;;  %v2662_v63 = vmul.f32 %v10761_v46, %v2600_v5  ;;  %v5056_v57 = vpop.f32.mrb[23].mxu1 }
 0x2c5   : > { %v2860_v36 = vmul.f32 %v2827_v12, %v2716_v4  ;;  %v5171_v19 = vmul.f32 %v5147_v54, %v2822_v2  ;;  %v2694_v20 = vadd.f32 %v10773_v34, %v2663_v23  ;;  %v5118_v30 = vmul.f32 %v10766_v35, %v5056_v57 }
 0x2c6   : > { %6111 = vst [vmem:[%s10791_s26 + $0xd8] sm:$0xff] %v5172_v16  ;;  %v2859_v7 = vmul.f32 %v2822_v2, %v2715_v28  ;;  %v5150_v21 = vadd.f32 %v10779_v13, %v5119_v27  ;;  %v2693_v39 = vadd.f32 %v10773_v34, %v2662_v63 }
 0x2c7   : > { %5739 = vst [vmem:[%s10799_s29 + $0xd8] sm:$0xff] %v2860_v36  ;;  %6110 = vst [vmem:[%s10791_s26 + $0xd0] sm:$0xff] %v5171_v19  ;;  %v2718_v46 = vmax.f32 %v2694_v20, 0.0  ;;  %v5149_v17 = vadd.f32 %v10779_v13, %v5118_v30 }
 0x2c8   : > { %5738 = vst [vmem:[%s10799_s29 + $0xd0] sm:$0xff] %v2859_v7  ;;  %v5174_v55 = vmul.f32 %v5150_v21, %v2837_v24  ;;  %v2717_v35 = vmax.f32 %v2693_v39, 0.0 }
 0x2c9   : > { %v2862_v45 = vmul.f32 %v2837_v24, %v2718_v46  ;;  %v5173_v11 = vmul.f32 %v5149_v17, %v2832_v37 }
 0x2ca   : > { %6113 = vst [vmem:[%s10791_s26 + $0xe8] sm:$0xff] %v5174_v55  ;;  %v2861_v8 = vmul.f32 %v2832_v37, %v2717_v35 }
 0x2cb   : > { %5741 = vst [vmem:[%s10799_s29 + $0xe8] sm:$0xff] %v2862_v45  ;;  %6112 = vst [vmem:[%s10791_s26 + $0xe0] sm:$0xff] %v5173_v11 }
 0x2cc   : > { %5740 = vst [vmem:[%s10799_s29 + $0xe0] sm:$0xff] %v2861_v8 }
 0x2cd PF: > { %s20_s13 = sadd.s32 1, %s9103_s13   ;;  %s10997_s30 = smov %s9095_s11 }
 0x2ce   : > { %p17_p7 = scmp.ge.s32.totalorder %s20_s13, 6   ;;  %s10998_s10 = smov %s9099_s12 }
 0x2cf   : > { %s10999_s11 = smov %s11002_s14  ;;  %s11000_s12 = smov %s11006_s15 }
 0x2d0   :  { %19 = sbr.rel (!%p17_p7) target bundleno = 3 (0x3), region = 125 }

</bundles_post_ra>
